<compile_context>
chip_gen: v7x
topology: tpu7x:2x2x1
jax: 0.10.0
libtpu: 0.0.40
codegen_flags: <defaults>
</compile_context>

<pallas_src>
import inspect

import jax
import jax.numpy as jnp
from jax.experimental import pallas as pl
from jax.experimental.pallas import tpu as pltpu


_HAS_BUFFERED = (
    hasattr(pl, "Buffered")
    and "pipeline_mode" in inspect.signature(pl.BlockSpec).parameters
)


# ---------------------------------------------------------------------------
# kernel
# ---------------------------------------------------------------------------
def _make_upsample_row_kernel(*, s: int, fused: bool, apply_relu: bool):
    """Kernel over a (bh, W, C) channels-last input block.

    Writes one (bh, W*s, C) output slab per replica-grid step j (the row
    replication itself is expressed through the out BlockSpec, not in-kernel).
    C sits on the 128-lane axis; only the W interleave touches sublanes.
    """

    def kernel(*refs):
        if fused:
            scale_ref, shift_ref, x_ref, o_ref = refs
        else:
            x_ref, o_ref = refs

        x = x_ref[...]                                     # (bh, W, C)
        if fused:
            h = x.astype(jnp.float32) * scale_ref[...] + shift_ref[...]
            if apply_relu:
                h = jnp.maximum(h, 0.0)
            h = h.astype(o_ref.dtype)                      # downcast BEFORE replication
        else:
            h = jnp.maximum(x, 0) if apply_relu else x
            h = h.astype(o_ref.dtype)

        bh, w, c = h.shape
        # W interleave: out[:, wo, :] = h[:, wo // s, :]; lane axis untouched.
        # TODO(synk): if the Mosaic dump shows a materialized VMEM relayout for
        # this reshape, replace it with s strided sublane stores.
        h = jnp.broadcast_to(h[:, :, None, :], (bh, w, s, c)).reshape(bh, w * s, c)
        o_ref[...] = h

    return kernel


# ---------------------------------------------------------------------------
# sizing helpers (generation-aware)
# ---------------------------------------------------------------------------
def _round_up(x: int, m: int) -> int:
    return ((x + m - 1) // m) * m


def _vmem_capacity_bytes() -> int:
    try:
        return int(pltpu.get_tpu_info().vmem_capacity_bytes)
    except Exception:
        return 64 * 1024 * 1024  # conservative default (v7x per-TC VMEM)


def _num_tensorcores() -> int:
    """Best-effort TensorCore count for the current Pallas device."""
    try:
        info = pltpu.get_tpu_info()
        for name in ("num_cores", "core_count", "num_tensorcores", "tensorcore_count"):
            val = getattr(info, name, None)
            if isinstance(val, int) and val > 0:
                return int(val)
    except Exception:
        pass
    try:
        # v7x-class parts expose two TensorCores per Pallas device.
        if "7" in jax.devices()[0].device_kind.lower():
            return 2
    except Exception:
        pass
    return 1


def _pick_block_rows(total_rows, w, c, s, in_item, out_item, out_bufs, num_tc):
    """Largest row-block whose (8,128)-padded, multi-buffered in+out tiles fit
    a per-generation VMEM budget.  Only forces several / even grid blocks when
    more than one TensorCore exists (single-TC chips just take the biggest)."""
    vmem = _vmem_capacity_bytes()
    # 128 MiB/TC parts (v5e/v6e) get a big budget; 64 MiB/TC (v7x) stays modest
    # in case the capacity query is per-chip rather than per-TensorCore.
    budget = (48 << 20) if vmem >= (96 << 20) else (20 << 20)

    c_pad = _round_up(max(int(c), 1), 128)
    per_row = (2 * _round_up(int(w), 8) * c_pad * in_item
               + out_bufs * _round_up(int(w) * s, 8) * c_pad * out_item)
    bh = max(1, int(budget // per_row))
    bh = min(bh, int(total_rows))

    if num_tc > 1 and total_rows >= 2:
        # Even number of row blocks (>= 2 per TensorCore when possible) so the
        # single "parallel" axis shards evenly across TensorCores.
        nblocks = max(pl.cdiv(total_rows, bh), 2 * num_tc)
        nblocks = min(nblocks, total_rows)
        if nblocks % 2:
            nblocks = min(nblocks + 1, total_rows)
        bh = max(1, pl.cdiv(total_rows, nblocks))

    if bh >= 8:
        bh -= bh % 8
    return int(max(1, min(bh, total_rows)))


# ---------------------------------------------------------------------------
# core pallas_call on the channels-last row layout
# ---------------------------------------------------------------------------
def _upsample_rows(x_rows, s, scale=None, shift=None, apply_relu=False):
    """x_rows: (R, W, C) with C on lanes -> (R*s, W*s, C) nearest upsample.

    Row (H) replication is an extra length-s grid axis: the same input block
    is mapped (without re-DMA) to s output slabs of a (R, s, W*s, C) output
    buffer, which reshapes for free to (R*s, W*s, C)."""
    r, w, c = x_rows.shape
    s = int(s)
    fused = scale is not None
    out_dtype = x_rows.dtype
    in_item = jnp.dtype(x_rows.dtype).itemsize
    out_item = jnp.dtype(out_dtype).itemsize

    out_bufs = 3 if _HAS_BUFFERED else 2
    num_tc = _num_tensorcores()
    bh = _pick_block_rows(r, w, c, s, in_item, out_item, out_bufs, num_tc)
    grid = (pl.cdiv(r, bh), s)

    kernel = _make_upsample_row_kernel(s=s, fused=fused, apply_relu=apply_relu)

    in_specs = []
    args = []
    if fused:
        scale2 = jnp.asarray(scale, jnp.float32).reshape(1, c)
        shift2 = jnp.asarray(shift, jnp.float32).reshape(1, c)
        in_specs += [pl.BlockSpec((1, c), lambda i, j: (0, 0)),
                     pl.BlockSpec((1, c), lambda i, j: (0, 0))]
        args += [scale2, shift2]
    # Input block index is constant across the replica axis j -> no re-DMA.
    in_specs += [pl.BlockSpec((bh, w, c), lambda i, j: (i, 0, 0))]
    args += [x_rows]

    out_shape = jax.ShapeDtypeStruct((r, s, w * s, c), out_dtype)
    out_block = (bh, None, w * s, c)
    out_index = lambda i, j: (i, j, 0, 0)

    c_pad = _round_up(c, 128)
    in_tile = bh * _round_up(w, 8) * c_pad * in_item
    out_tile = bh * _round_up(w * s, 8) * c_pad * out_item
    need = 2 * in_tile + out_bufs * out_tile + (2 << 20)
    vmem_limit = int(min(_vmem_capacity_bytes() * 3 // 4, max(need, 16 << 20)))

    def _build(out_spec):
        return pl.pallas_call(
            kernel,
            out_shape=out_shape,
            grid_spec=pltpu.PrefetchScalarGridSpec(
                num_scalar_prefetch=0,
                grid=grid,
                in_specs=in_specs,
                out_specs=out_spec,
            ),
            compiler_params=pltpu.CompilerParams(
                dimension_semantics=("parallel", "arbitrary"),
                vmem_limit_bytes=vmem_limit,
            ),
        )

    if _HAS_BUFFERED:
        try:
            out = _build(pl.BlockSpec(out_block, out_index,
                                      pipeline_mode=pl.Buffered(3)))(*args)
        except Exception:
            # Installed jax/Mosaic rejects explicit multi-buffering on the
            # top-level grid pipeline -> fall back to default double-buffering.
            out = _build(pl.BlockSpec(out_block, out_index))(*args)
    else:
        out = _build(pl.BlockSpec(out_block, out_index))(*args)

    # (R, s, W*s, C) -> (R*s, W*s, C): contiguous row-major, free view.
    return out.reshape(r * s, w * s, c)


# ---------------------------------------------------------------------------
# NHWC-native entry points (hot path — no layout transposes)
# ---------------------------------------------------------------------------
def interpolate_nearest_nhwc(x_nhwc: jax.Array, spatial_factor: int) -> jax.Array:
    """Interpolate(spatial_factor, mode='nearest') on a channels-last tensor."""
    n, h, w, c = x_nhwc.shape
    s = int(spatial_factor)
    rows = x_nhwc.reshape(n * h, w, c)            # free reshape
    out_rows = _upsample_rows(rows, s)
    return out_rows.reshape(n, h * s, w * s, c)   # free reshape


def fused_norm_upsample_relu_nhwc(x_nhwc, scale, shift, spatial_factor,
                                  apply_relu=True):
    """Fused [per-channel affine (eval BatchNorm) -> nearest upsample -> ReLU],
    i.e. the [norm, h_upd, act] sub-sequence of conv1 in BigGANResBlock('up'),
    channels-last.  ReLU commutes with replication, so it is applied on the
    smaller pre-upsample tile."""
    n, h, w, c = x_nhwc.shape
    s = int(spatial_factor)
    rows = x_nhwc.reshape(n * h, w, c)
    out_rows = _upsample_rows(rows, s, scale=scale, shift=shift,
                              apply_relu=apply_relu)
    return out_rows.reshape(n, h * s, w * s, c)


# ---------------------------------------------------------------------------
# NCHW adapters (PyTorch layout parity only — NOT for the hot path)
# ---------------------------------------------------------------------------
def interpolate_nearest(x_nchw: jax.Array, spatial_factor: int) -> jax.Array:
    """NCHW adapter.  NOTE: the two transposes here cost more HBM traffic than
    the upsample itself — inside the ResBlock keep activations NHWC and use
    the *_nhwc entry points (TPU convs prefer NHWC anyway)."""
    y = interpolate_nearest_nhwc(jnp.transpose(x_nchw, (0, 2, 3, 1)), spatial_factor)
    return jnp.transpose(y, (0, 3, 1, 2))


def fused_norm_upsample_relu(x_nchw, scale, shift, spatial_factor, apply_relu=True):
    """NCHW adapter of the fused affine->upsample->ReLU (parity checks only)."""
    y = fused_norm_upsample_relu_nhwc(jnp.transpose(x_nchw, (0, 2, 3, 1)),
                                      scale, shift, spatial_factor, apply_relu)
    return jnp.transpose(y, (0, 3, 1, 2))


# ---------------------------------------------------------------------------
# demo / correctness check
# ---------------------------------------------------------------------------
if __name__ == "__main__":
    key = jax.random.PRNGKey(0)
    k1, k2, k3 = jax.random.split(key, 3)

    N, C, H, W = 2, 4, 16, 16
    sf = 2

    # 1) NHWC-native nearest-neighbour upsample (hot-path entry point).
    x_nhwc = jax.random.normal(k1, (N, H, W, C), dtype=jnp.float32)
    y = jax.block_until_ready(interpolate_nearest_nhwc(x_nhwc, sf))
    ref = jnp.repeat(jnp.repeat(x_nhwc, sf, axis=1), sf, axis=2)
    assert y.shape == (N, H * sf, W * sf, C)
    assert y.dtype == x_nhwc.dtype
    assert jnp.array_equal(y, ref)

    # 2) Fused eval-mode BatchNorm affine -> upsample -> ReLU (NHWC).
    scale = 1.0 + 0.1 * jax.random.normal(k2, (C,), dtype=jnp.float32)
    shift = 0.1 * jax.random.normal(k3, (C,), dtype=jnp.float32)
    y2 = jax.block_until_ready(
        fused_norm_upsample_relu_nhwc(x_nhwc, scale, shift, sf))
    affine = x_nhwc * scale[None, None, None, :] + shift[None, None, None, :]
    ref2 = jax.nn.relu(jnp.repeat(jnp.repeat(affine, sf, axis=1), sf, axis=2))
    assert jnp.allclose(y2, ref2, rtol=1e-6, atol=1e-6)

    # 3) PyTorch-layout (NCHW) adapters — module-parity check.
    x_nchw = jnp.transpose(x_nhwc, (0, 3, 1, 2))
    y3 = jax.block_until_ready(interpolate_nearest(x_nchw, sf))
    ref3 = jnp.repeat(jnp.repeat(x_nchw, sf, axis=2), sf, axis=3)
    assert y3.shape == (N, C, H * sf, W * sf)
    assert jnp.array_equal(y3, ref3)
    y4 = jax.block_until_ready(fused_norm_upsample_relu(x_nchw, scale, shift, sf))
    assert jnp.allclose(y4, jnp.transpose(ref2, (0, 3, 1, 2)), rtol=1e-6, atol=1e-6)

    # 4) Lane-dense channels (C >= 128) in bf16: exercises channels-on-lanes
    #    layout and the narrow-dtype (no f32 replication) path.
    C2 = 128
    xb = jax.random.normal(k1, (N, H, W, C2), dtype=jnp.bfloat16)
    yb = jax.block_until_ready(interpolate_nearest_nhwc(xb, sf))
    refb = jnp.repeat(jnp.repeat(xb, sf, axis=1), sf, axis=2)
    assert yb.dtype == jnp.bfloat16
    assert jnp.array_equal(yb, refb)

    print("KERNEL_OK")
</pallas_src>

<mosaic_0001>
module attributes {stable_mosaic.version = 11 : i64} {
  func.func @kernel(%arg0: i32, %arg1: i32, %arg2: memref<32x16x4xf32, #tpu.memory_space<vmem>>, %arg3: memref<32x1x32x4xf32, #tpu.memory_space<vmem>>) attributes {dimension_semantics = [#tpu.dimension_semantics<parallel>, #tpu.dimension_semantics<arbitrary>], iteration_bounds = array<i64: 1, 2>, scalar_prefetch = 0 : i64, scratch_operands = 0 : i64, tpu.core_type = #tpu.core_type<tc>, window_params = [{transform_indices = @transform_0, window_bounds = array<i64: 32, 16, 4>}, {transform_indices = @transform_1, window_bounds = array<i64: 32, 1, 32, 4>}]} {
    %c0 = arith.constant 0 : index
    %c0_0 = arith.constant 0 : index
    %c0_1 = arith.constant 0 : index
    %0 = vector.load %arg2[%c0, %c0_0, %c0_1] : memref<32x16x4xf32, #tpu.memory_space<vmem>>, vector<32x16x4xf32>
    %1 = vector.shape_cast %0 : vector<32x16x4xf32> to vector<32x16x1x4xf32>
    %2 = vector.shape_cast %1 : vector<32x16x1x4xf32> to vector<32x16x1x4xf32>
    %3 = vector.broadcast %2 : vector<32x16x1x4xf32> to vector<32x16x2x4xf32>
    %4 = vector.shape_cast %3 : vector<32x16x2x4xf32> to vector<32x32x4xf32>
    %c0_2 = arith.constant 0 : index
    %c0_3 = arith.constant 0 : index
    %c0_4 = arith.constant 0 : index
    %c0_5 = arith.constant 0 : index
    %5 = vector.load %arg3[%c0_2, %c0_3, %c0_4, %c0_5] : memref<32x1x32x4xf32, #tpu.memory_space<vmem>>, vector<32x1x32x4xf32>
    %6 = vector.shape_cast %5 : vector<32x1x32x4xf32> to vector<32x32x4xf32>
    %7 = vector.shape_cast %4 : vector<32x32x4xf32> to vector<32x1x32x4xf32>
    tpu.vector_store %arg3[%c0_2, %c0_3, %c0_4, %c0_5], %7 {strides = array<i32>} : memref<32x1x32x4xf32, #tpu.memory_space<vmem>>, vector<32x1x32x4xf32>,
    return
  }
  func.func @transform_0(%arg0: i32, %arg1: i32) -> (i32, i32, i32) {
    %c0_i32 = arith.constant 0 : i32
    %c0_i32_0 = arith.constant 0 : i32
    %c0_i32_1 = arith.constant 0 : i32
    return %arg0, %c0_i32, %c0_i32_0 : i32, i32, i32
  }
  func.func @transform_1(%arg0: i32, %arg1: i32) -> (i32, i32, i32, i32) {
    %c0_i32 = arith.constant 0 : i32
    %c0_i32_0 = arith.constant 0 : i32
    %c0_i32_1 = arith.constant 0 : i32
    return %arg0, %arg1, %c0_i32, %c0_i32_0 : i32, i32, i32, i32
  }
}

</mosaic_0001>

<bundles_post_ra>
// kernel: tpu_custom_call.1
= control target key start
LH: loop header
LB: loop body
LE: loop exit
PB: predicated region body
PF: predicated region fallthrough
CT: control target
= control target key end

     0   :  { %s8600_s6 = smov 0   ;;  %s8602_s7 = smov 0   ;;  %s10739_s0 = inlined_call_operand.vmem [shape: f32[32,16,4], index: 0, kind: input, shape index: {}]   ;;  %s10740_s1 = inlined_call_operand.vmem [shape: f32[32,2,32,4], index: 1, kind: output, shape index: {}]  }
   0x1   :  { %s8604_s8 = smov 0   ;;  %s8606_s9 = smov 0  }
   0x2   :  { %s8608_s10 = smov 0  }
   0x3 LB: > { %s8494_s11 = sadd.s32 4294967295, %s8586_s10   ;;  %s20_s12 = sadd.s32 1, %s8582_s9  ;;  %s8586_s10 = sphi %s8608_s10, %s11_s10   ;;  %s8582_s9 = sphi %s8606_s9, %s10745_s9   ;;  %s8578_s8 = sphi %s8604_s8, %s10744_s8   ;;  %s8574_s7 = sphi %s8602_s7, %s10743_s7   ;;  %s8570_s6 = sphi %s8600_s6, %s10742_s6  }
   0x4   : > { %p21_p0 = scmp.ge.s32.totalorder %s20_s12, 2  ;;  %s58_s13 = sadd.s32 1, %s8574_s7 }
   0x5   : > { %p68_p1 = scmp.ne.s32.totalorder %s8574_s7, %s8570_s6  ;;  %p69_p2 = scmp.eq.s32.totalorder %s8494_s11, 1 }
   0x6   : > { %s10747_s12 = smov (%p21_p0, %s20_s12), 0  ;;  %p8498_p4 = scmp.ge.s32.totalorder %s8586_s10, 1 }
   0x7   : > { %p8632_p3 = por %p69_p2, %p68_p1  ;;  %s54_s15 = ssub.s32 %s8582_s9, %s10747_s12 }
   0x8   : > { %p103_p5 = scmp.lt.s32.totalorder %s8586_s10, 3  ;;  %p56_p6 = scmp.eq.s32.totalorder %s54_s15, 0 }
   0xa   : > { %p104_p7 = pnand %p8498_p4, %p103_p5 }
   0xb   : > { %s8641_s16 = scalar_select %p56_p6, %s8574_s7, %s58_s13  }
   0xc   : > { %107 = sbr.rel (%p104_p7) target bundleno = 570 (0x23a), region = 24  ;;  %v131_v0 = vld [vmem:[%s10739_s0] sm:$0xff] (!%p104_p7)  ;;  %v263_v1 = vlaneseq (!%p104_p7)  ;;  %v8588_v2 = vmov (!%p104_p7), 1966171168   ;;  %v8589_v4 = vmov (!%p104_p7), 1983009808  }
   0xd   : > { %v261_v3 = vunpack.c.l.s4 (!%p104_p7), %v8588_v2  ;;  %v5446_v5 = vunpack.c.l.s4 (!%p104_p7), %v8589_v4  ;;  %v259_v6 = vcombine.high (!%p104_p7), %v131_v0, %v131_v0  ;;  %v132_v7 = vld [vmem:[%s10739_s0 + $0x8] sm:$0xff] (!%p104_p7)  ;;  %v133_v8 = vld [vmem:[%s10739_s0 + $0x10] sm:$0xff] (!%p104_p7)  ;;  %v134_v9 = vld [vmem:[%s10739_s0 + $0x18] sm:$0xff] (!%p104_p7)  ;;  %vm7747_vm0 = vcmask (!%p104_p7), 31744   ;;  %s120_s26 = sand.u32 (!%p104_p7), 1, %s8570_s6  }
   0xe   : > { %v264_v10 = vshrl.u32 (!%p104_p7), %v263_v1, 7  ;;  %v308_v11 = vcombine.high (!%p104_p7), %v132_v7, %v132_v7  ;;  %v357_v12 = vcombine.high (!%p104_p7), %v133_v8, %v133_v8  ;;  %v406_v13 = vcombine.high (!%p104_p7), %v134_v9, %v134_v9  ;;  %v8658_v14 = vld [vmem:[%s10739_s0 + $0x20] sm:$0xff] (!%p104_p7)  ;;  %v8663_v15 = vld [vmem:[%s10739_s0 + $0x28] sm:$0xff] (!%p104_p7)  ;;  %v8668_v16 = vld [vmem:[%s10739_s0 + $0x30] sm:$0xff] (!%p104_p7)  ;;  %s8499_s6 = sshll.u32 (!%p104_p7), %s120_s26, 10 }
   0xf   : > { %v262_v17 = vunpack.c.0.s8 (!%p104_p7), %v261_v3  ;;  %v5447_v18 = vunpack.c.0.s8 (!%p104_p7), %v5446_v5  ;;  %v455_v19 = vcombine.high (!%p104_p7), %v8658_v14, %v8658_v14  ;;  %v504_v20 = vcombine.high (!%p104_p7), %v8663_v15, %v8663_v15  ;;  %v8677_v21 = vld [vmem:[%s10739_s0 + $0x38] sm:$0xff] (!%p104_p7)  ;;  %v8682_v22 = vld [vmem:[%s10739_s0 + $0x40] sm:$0xff] (!%p104_p7)  ;;  %v8687_v23 = vld [vmem:[%s10739_s0 + $0x48] sm:$0xff] (!%p104_p7)  ;;  %s8791_s27 = scalar_lea.vmem (!%p104_p7), [#allocation2], %s8499_s6 }
  0x10   : > { %v8689_v24 = vsub.s32 (!%p104_p7), 0, %v264_v10  ;;  %v553_v25 = vcombine.high (!%p104_p7), %v8668_v16, %v8668_v16  ;;  %v602_v26 = vcombine.high (!%p104_p7), %v8677_v21, %v8677_v21  ;;  %v651_v27 = vcombine.high (!%p104_p7), %v8682_v22, %v8682_v22  ;;  %v8700_v28 = vld [vmem:[%s10739_s0 + $0x50] sm:$0xff] (!%p104_p7)  ;;  %v8705_v29 = vld [vmem:[%s10739_s0 + $0x58] sm:$0xff] (!%p104_p7)  ;;  %v8710_v30 = vld [vmem:[%s10739_s0 + $0x60] sm:$0xff] (!%p104_p7) }
  0x11   : > { %v8712_v31 = vsub.s32 (!%p104_p7), %v262_v17, %v264_v10  ;;  %v8714_v32 = vsub.s32 (!%p104_p7), %v5447_v18, %v264_v10  ;;  %v700_v33 = vcombine.high (!%p104_p7), %v8687_v23, %v8687_v23  ;;  %v749_v34 = vcombine.high (!%p104_p7), %v8700_v28, %v8700_v28  ;;  %v8723_v35 = vld [vmem:[%s10739_s0 + $0x68] sm:$0xff] (!%p104_p7)  ;;  %v8728_v36 = vld [vmem:[%s10739_s0 + $0x70] sm:$0xff] (!%p104_p7) }
  0x12   : > { %v798_v37 = vcombine.high (!%p104_p7), %v8705_v29, %v8705_v29  ;;  %v847_v38 = vcombine.high (!%p104_p7), %v8710_v30, %v8710_v30  ;;  %v896_v39 = vcombine.high (!%p104_p7), %v8723_v35, %v8723_v35  ;;  %v945_v40 = vcombine.high (!%p104_p7), %v8728_v36, %v8728_v36 }
  0x13   : > { %v266_v41 = vrot.slane %v131_v0, %v8712_v31  ;;  %v273_v42 = vrot.slane %v259_v6, %v8712_v31  ;;  %v315_v43 = vrot.slane %v132_v7, %v8712_v31  ;;  %v322_v44 = vrot.slane %v308_v11, %v8712_v31  ;;  %s8505_s21 = sshll.u32 (%p8632_p3), %s8578_s8, 5 }
  0x14   : > { %v8743_v45 = vrot.slane %v133_v8, %v8712_v31  ;;  %v8746_v46 = vrot.slane %v357_v12, %v8712_v31  ;;  %v8749_v47 = vrot.slane %v134_v9, %v8712_v31  ;;  %v8752_v48 = vrot.slane %v406_v13, %v8712_v31  ;;  %s10469_s24 = scalar_lea.vmem (%p8632_p3), %s10740_s1, %s8505_s21 }
  0x15   : > { %v274_v49 = vcombine.high %v266_v41, %v266_v41  ;;  %v282_v50 = vrot.slane %v266_v41, %v8712_v31  ;;  %v275_v51 = vcombine.high %v273_v42, %v273_v42  ;;  %v289_v52 = vrot.slane %v273_v42, %v8712_v31 }
  0x16   : > { %v323_v53 = vcombine.high %v315_v43, %v315_v43  ;;  %v331_v54 = vrot.slane %v315_v43, %v8712_v31  ;;  %v324_v55 = vcombine.high %v322_v44, %v322_v44  ;;  %v338_v56 = vrot.slane %v322_v44, %v8712_v31 }
  0x17   : > { %v296_v57 = vrot.slane %v274_v49, %v8712_v31  ;;  %v304_v58 = vcombine.high %v282_v50, %v282_v50  ;;  %v3398_v59 = vrot.slane %v282_v50, %v8689_v24  ;;  %v303_v60 = vrot.slane %v275_v51, %v8712_v31 }
  0x18   : > { %v305_v61 = vcombine.high %v289_v52, %v289_v52  ;;  %v3414_v62 = vrot.slane %v289_v52, %v8689_v24  ;;  %v345_v63 = vrot.slane %v323_v53, %v8712_v31  ;;  %v353_v0 = vcombine.high %v331_v54, %v331_v54 }
  0x19   : > { %v306_v1 = vcombine.high %v296_v57, %v296_v57  ;;  %v3402_v2 = vrot.slane %v296_v57, %v8689_v24  ;;  %v3406_v3 = vrot.slane %v304_v58, %v8689_v24  ;;  %v307_v4 = vcombine.high %v303_v60, %v303_v60 }
  0x1a   : > { %v3418_v5 = vrot.slane %v303_v60, %v8689_v24  ;;  %v3422_v6 = vrot.slane %v305_v61, %v8689_v24  ;;  %v355_v7 = vcombine.high %v345_v63, %v345_v63  ;;  %v3430_v8 = vrot.slane %v331_v54, %v8689_v24 }
  0x1b   : > { %v3410_v9 = vrot.slane %v306_v1, %v8689_v24  ;;  %v5443_v10 = vcombine.low %v3398_v59, %v3402_v2  ;;  %v3426_v11 = vrot.slane %v307_v4, %v8689_v24  ;;  %v3434_v12 = vrot.slane %v345_v63, %v8689_v24 }
  0x1c   : > { %v5460_v13 = vcombine.low %v3414_v62, %v3418_v5  ;;  %v3438_v17 = vrot.slane %v353_v0, %v8689_v24  ;;  %v3442_v18 = vrot.slane %v355_v7, %v8689_v24  ;;  %v352_v41 = vrot.slane %v324_v55, %v8712_v31 }
  0x1d   : > { %v5444_v42 = vcombine.low %v3406_v3, %v3410_v9  ;;  %v5451_v43 = vrot.slane %v5443_v10, %v8714_v32  ;;  %v5461_v44 = vcombine.low %v3422_v6, %v3426_v11  ;;  %v5477_v49 = vcombine.low %v3430_v8, %v3434_v12 }
  0x1e   : > { %v5468_v50 = vrot.slane %v5460_v13, %v8714_v32  ;;  %v5478_v51 = vcombine.low %v3438_v17, %v3442_v18  ;;  %v354_v52 = vcombine.high %v338_v56, %v338_v56  ;;  %v356_v53 = vcombine.high %v352_v41, %v352_v41 }
  0x1f   : > { %v5458_v54 = vrot.slane %v5444_v42, %v8714_v32  ;;  %v5475_v57 = vrot.slane %v5461_v44, %v8714_v32  ;;  %v5485_v58 = vrot.slane %v5477_v49, %v8714_v32  ;;  %v3446_v59 = vrot.slane %v338_v56, %v8689_v24 }
  0x20   : > { %v5492_v55 = vrot.slane %v5478_v51, %v8714_v32  ;;  %v3450_v60 = vrot.slane %v352_v41, %v8689_v24  ;;  %v3454_v61 = vrot.slane %v354_v52, %v8689_v24  ;;  %v3458_v62 = vrot.slane %v356_v53, %v8689_v24 }
  0x21   : > { %v5459_v63 = vcombine.low %v5451_v43, %v5458_v54  ;;  %v5476_v0 = vcombine.low %v5468_v50, %v5475_v57  ;;  %v372_v1 = vcombine.high %v8743_v45, %v8743_v45  ;;  %v380_v2 = vrot.slane %v8743_v45, %v8712_v31 }
  0x22   : > { %v5493_v3 = vcombine.low %v5485_v58, %v5492_v55  ;;  %v5494_v4 = vcombine.low %v3446_v59, %v3450_v60  ;;  %v5495_v5 = vcombine.low %v3454_v61, %v3458_v62  ;;  %v373_v56 = vcombine.high %v8746_v46, %v8746_v46 }
  0x23   : > { %7748 = vst.msk [vmem:[%s8791_s27] sm:$0xff] %vm7747_vm0, %v5459_v63  ;;  %7749 = vst.msk [vmem:[%s8791_s27 + $0x8] sm:$0xff] %vm7747_vm0, %v5476_v0  ;;  %v394_v6 = vrot.slane %v372_v1, %v8712_v31  ;;  %v402_v7 = vcombine.high %v380_v2, %v380_v2  ;;  %v3462_v45 = vrot.slane %v380_v2, %v8689_v24 }
  0x24   : > { %v387_v8 = vrot.slane %v8746_v46, %v8712_v31  ;;  %7750 = vst.msk [vmem:[%s8791_s27 + $0x10] sm:$0xff] %vm7747_vm0, %v5493_v3  ;;  %v5502_v9 = vrot.slane %v5494_v4, %v8714_v32  ;;  %v5509_v10 = vrot.slane %v5495_v5, %v8714_v32  ;;  %v401_v11 = vrot.slane %v373_v56, %v8712_v31 }
  0x25   : > { %v421_v12 = vcombine.high %v8749_v47, %v8749_v47  ;;  %v404_v13 = vcombine.high %v394_v6, %v394_v6  ;;  %v3466_v17 = vrot.slane %v394_v6, %v8689_v24  ;;  %v3470_v18 = vrot.slane %v402_v7, %v8689_v24 }
  0x26   : > { %v403_v41 = vcombine.high %v387_v8, %v387_v8  ;;  %v5510_v42 = vcombine.low %v5502_v9, %v5509_v10  ;;  %v405_v46 = vcombine.high %v401_v11, %v401_v11  ;;  %v3478_v43 = vrot.slane %v387_v8, %v8689_v24 }
  0x27   : > { %v3482_v44 = vrot.slane %v401_v11, %v8689_v24  ;;  %v3474_v49 = vrot.slane %v404_v13, %v8689_v24  ;;  %v5511_v50 = vcombine.low %v3462_v45, %v3466_v17  ;;  %v429_v52 = vrot.slane %v8749_v47, %v8712_v31 }
  0x28   : > { %v3486_v51 = vrot.slane %v403_v41, %v8689_v24  ;;  %7751 = vst.msk [vmem:[%s8791_s27 + $0x18] sm:$0xff] %vm7747_vm0, %v5510_v42  ;;  %v3490_v53 = vrot.slane %v405_v46, %v8689_v24  ;;  %v443_v57 = vrot.slane %v421_v12, %v8712_v31  ;;  %v422_v58 = vcombine.high %v8752_v48, %v8752_v48 }
  0x29   : > { %v5528_v54 = vcombine.low %v3478_v43, %v3482_v44  ;;  %v5512_v59 = vcombine.low %v3470_v18, %v3474_v49  ;;  %v5519_v55 = vrot.slane %v5511_v50, %v8714_v32  ;;  %v451_v60 = vcombine.high %v429_v52, %v429_v52 }
  0x2a   : > { %v3494_v61 = vrot.slane %v429_v52, %v8689_v24  ;;  %v5529_v62 = vcombine.low %v3486_v51, %v3490_v53  ;;  %v453_v47 = vcombine.high %v443_v57, %v443_v57  ;;  %v3498_v0 = vrot.slane %v443_v57, %v8689_v24 }
  0x2b   : > { %v5536_v63 = vrot.slane %v5528_v54, %v8714_v32  ;;  %v5526_v1 = vrot.slane %v5512_v59, %v8714_v32  ;;  %v3502_v2 = vrot.slane %v451_v60, %v8689_v24  ;;  %v436_v3 = vrot.slane %v8752_v48, %v8712_v31 }
  0x2c   : > { %v450_v4 = vrot.slane %v422_v58, %v8712_v31  ;;  %v5543_v5 = vrot.slane %v5529_v62, %v8714_v32  ;;  %v3506_v56 = vrot.slane %v453_v47, %v8689_v24  ;;  %v5545_v6 = vcombine.low %v3494_v61, %v3498_v0 }
  0x2d   : > { %v462_v7 = vrot.slane %v8658_v14, %v8712_v31  ;;  %v5527_v45 = vcombine.low %v5519_v55, %v5526_v1  ;;  %v452_v8 = vcombine.high %v436_v3, %v436_v3  ;;  %v3510_v10 = vrot.slane %v436_v3, %v8689_v24 }
  0x2e   : > { %v454_v9 = vcombine.high %v450_v4, %v450_v4  ;;  %v5544_v11 = vcombine.low %v5536_v63, %v5543_v5  ;;  %v5546_v12 = vcombine.low %v3502_v2, %v3506_v56  ;;  %v5553_v48 = vrot.slane %v5545_v6, %v8714_v32 }
  0x2f   : > { %v3514_v13 = vrot.slane %v450_v4, %v8689_v24  ;;  %7752 = vst.msk [vmem:[%s8791_s27 + $0x20] sm:$0xff] %vm7747_vm0, %v5527_v45  ;;  %v3518_v17 = vrot.slane %v452_v8, %v8689_v24  ;;  %v470_v41 = vcombine.high %v462_v7, %v462_v7  ;;  %v478_v42 = vrot.slane %v462_v7, %v8712_v31 }
  0x30   : > { %v3522_v18 = vrot.slane %v454_v9, %v8689_v24  ;;  %7753 = vst.msk [vmem:[%s8791_s27 + $0x28] sm:$0xff] %vm7747_vm0, %v5544_v11  ;;  %v5560_v46 = vrot.slane %v5546_v12, %v8714_v32  ;;  %v469_v44 = vrot.slane %v455_v19, %v8712_v31  ;;  %v511_v49 = vrot.slane %v8663_v15, %v8712_v31 }
  0x31   : > { %v5562_v43 = vcombine.low %v3510_v10, %v3514_v13  ;;  %v492_v51 = vrot.slane %v470_v41, %v8712_v31  ;;  %v500_v52 = vcombine.high %v478_v42, %v478_v42  ;;  %v3526_v53 = vrot.slane %v478_v42, %v8689_v24 }
  0x32   : > { %v5563_v50 = vcombine.low %v3518_v17, %v3522_v18  ;;  %v5561_v54 = vcombine.low %v5553_v48, %v5560_v46  ;;  %v471_v58 = vcombine.high %v469_v44, %v469_v44  ;;  %v485_v59 = vrot.slane %v469_v44, %v8712_v31 }
  0x33   : > { %v5570_v57 = vrot.slane %v5562_v43, %v8714_v32  ;;  %v502_v60 = vcombine.high %v492_v51, %v492_v51  ;;  %v3530_v14 = vrot.slane %v492_v51, %v8689_v24  ;;  %v3534_v19 = vrot.slane %v500_v52, %v8689_v24 }
  0x34   : > { %v5577_v55 = vrot.slane %v5563_v50, %v8714_v32  ;;  %7754 = vst.msk [vmem:[%s8791_s27 + $0x30] sm:$0xff] %vm7747_vm0, %v5561_v54  ;;  %v499_v61 = vrot.slane %v471_v58, %v8712_v31  ;;  %v501_v62 = vcombine.high %v485_v59, %v485_v59  ;;  %v3542_v63 = vrot.slane %v485_v59, %v8689_v24 }
  0x35   : > { %v519_v47 = vcombine.high %v511_v49, %v511_v49  ;;  %v3538_v1 = vrot.slane %v502_v60, %v8689_v24  ;;  %v5579_v2 = vcombine.low %v3526_v53, %v3530_v14  ;;  %v527_v3 = vrot.slane %v511_v49, %v8712_v31 }
  0x36   : > { %v5578_v0 = vcombine.low %v5570_v57, %v5577_v55  ;;  %v503_v4 = vcombine.high %v499_v61, %v499_v61  ;;  %v3546_v5 = vrot.slane %v499_v61, %v8689_v24  ;;  %v3550_v56 = vrot.slane %v501_v62, %v8689_v24 }
  0x37   : > { %v541_v6 = vrot.slane %v519_v47, %v8712_v31  ;;  %v5580_v7 = vcombine.low %v3534_v19, %v3538_v1  ;;  %v5587_v45 = vrot.slane %v5579_v2, %v8714_v32  ;;  %v549_v8 = vcombine.high %v527_v3, %v527_v3 }
  0x38   : > { %7755 = vst.msk [vmem:[%s8791_s27 + $0x38] sm:$0xff] %vm7747_vm0, %v5578_v0  ;;  %v3558_v9 = vrot.slane %v527_v3, %v8689_v24  ;;  %v3554_v10 = vrot.slane %v503_v4, %v8689_v24  ;;  %v5596_v11 = vcombine.low %v3542_v63, %v3546_v5  ;;  %v518_v18 = vrot.slane %v504_v20, %v8712_v31 }
  0x39   : > { %v551_v12 = vcombine.high %v541_v6, %v541_v6  ;;  %v3562_v48 = vrot.slane %v541_v6, %v8689_v24  ;;  %v5594_v13 = vrot.slane %v5580_v7, %v8714_v32  ;;  %v3566_v17 = vrot.slane %v549_v8, %v8689_v24 }
  0x3a   : > { %v560_v41 = vrot.slane %v8668_v16, %v8712_v31  ;;  %v5597_v42 = vcombine.low %v3550_v56, %v3554_v10  ;;  %v5604_v46 = vrot.slane %v5596_v11, %v8714_v32  ;;  %v520_v50 = vcombine.high %v518_v18, %v518_v18 }
  0x3b   : > { %v3570_v43 = vrot.slane %v551_v12, %v8689_v24  ;;  %v5613_v44 = vcombine.low %v3558_v9, %v3562_v48  ;;  %v5595_v49 = vcombine.low %v5587_v45, %v5594_v13  ;;  %v534_v51 = vrot.slane %v518_v18, %v8712_v31 }
  0x3c   : > { %v568_v52 = vcombine.high %v560_v41, %v560_v41  ;;  %v5611_v53 = vrot.slane %v5597_v42, %v8714_v32  ;;  %v576_v20 = vrot.slane %v560_v41, %v8712_v31  ;;  %v548_v57 = vrot.slane %v520_v50, %v8712_v31 }
  0x3d   : > { %v5614_v54 = vcombine.low %v3566_v17, %v3570_v43  ;;  %v5621_v15 = vrot.slane %v5613_v44, %v8714_v32  ;;  %7756 = vst.msk [vmem:[%s8791_s27 + $0x40] sm:$0xff] %vm7747_vm0, %v5595_v49  ;;  %v550_v58 = vcombine.high %v534_v51, %v534_v51  ;;  %v3574_v59 = vrot.slane %v534_v51, %v8689_v24 }
  0x3e   : > { %v590_v55 = vrot.slane %v568_v52, %v8712_v31  ;;  %v5612_v60 = vcombine.low %v5604_v46, %v5611_v53  ;;  %v598_v19 = vcombine.high %v576_v20, %v576_v20  ;;  %v3590_v61 = vrot.slane %v576_v20, %v8689_v24 }
  0x3f   : > { %v5628_v14 = vrot.slane %v5614_v54, %v8714_v32  ;;  %v552_v62 = vcombine.high %v548_v57, %v548_v57  ;;  %v3578_v63 = vrot.slane %v548_v57, %v8689_v24  ;;  %v3582_v47 = vrot.slane %v550_v58, %v8689_v24 }
  0x40   : > { %v600_v0 = vcombine.high %v590_v55, %v590_v55  ;;  %7757 = vst.msk [vmem:[%s8791_s27 + $0x48] sm:$0xff] %vm7747_vm0, %v5612_v60  ;;  %v3594_v2 = vrot.slane %v590_v55, %v8689_v24  ;;  %v3598_v3 = vrot.slane %v598_v19, %v8689_v24  ;;  %v567_v4 = vrot.slane %v553_v25, %v8712_v31 }
  0x41   : > { %v5629_v1 = vcombine.low %v5621_v15, %v5628_v14  ;;  %v3586_v5 = vrot.slane %v552_v62, %v8689_v24  ;;  %v5630_v56 = vcombine.low %v3574_v59, %v3578_v63  ;;  %v609_v7 = vrot.slane %v8677_v21, %v8712_v31 }
  0x42   : > { %v3602_v6 = vrot.slane %v600_v0, %v8689_v24  ;;  %v5647_v45 = vcombine.low %v3590_v61, %v3594_v2  ;;  %v569_v8 = vcombine.high %v567_v4, %v567_v4  ;;  %v583_v9 = vrot.slane %v567_v4, %v8712_v31 }
  0x43   : > { %7758 = vst.msk [vmem:[%s8791_s27 + $0x50] sm:$0xff] %vm7747_vm0, %v5629_v1  ;;  %v616_v16 = vrot.slane %v602_v26, %v8712_v31  ;;  %v5631_v25 = vcombine.low %v3582_v47, %v3586_v5  ;;  %v5638_v10 = vrot.slane %v5630_v56, %v8714_v32  ;;  %v617_v12 = vcombine.high %v609_v7, %v609_v7 }
  0x44   : > { %v5648_v11 = vcombine.low %v3598_v3, %v3602_v6  ;;  %v5655_v48 = vrot.slane %v5647_v45, %v8714_v32  ;;  %v597_v13 = vrot.slane %v569_v8, %v8712_v31  ;;  %v599_v17 = vcombine.high %v583_v9, %v583_v9 }
  0x45   : > { %v3606_v18 = vrot.slane %v583_v9, %v8689_v24  ;;  %v5645_v41 = vrot.slane %v5631_v25, %v8714_v32  ;;  %v625_v21 = vrot.slane %v609_v7, %v8712_v31  ;;  %v639_v26 = vrot.slane %v617_v12, %v8712_v31 }
  0x46   : > { %v5662_v42 = vrot.slane %v5648_v11, %v8714_v32  ;;  %v601_v46 = vcombine.high %v597_v13, %v597_v13  ;;  %v3610_v43 = vrot.slane %v597_v13, %v8689_v24  ;;  %v3614_v44 = vrot.slane %v599_v17, %v8689_v24 }
  0x47   : > { %v618_v49 = vcombine.high %v616_v16, %v616_v16  ;;  %v5646_v50 = vcombine.low %v5638_v10, %v5645_v41  ;;  %v647_v52 = vcombine.high %v625_v21, %v625_v21  ;;  %v649_v53 = vcombine.high %v639_v26, %v639_v26 }
  0x48   : > { %v5663_v51 = vcombine.low %v5655_v48, %v5662_v42  ;;  %v3618_v54 = vrot.slane %v601_v46, %v8689_v24  ;;  %v5664_v15 = vcombine.low %v3606_v18, %v3610_v43  ;;  %v3622_v20 = vrot.slane %v625_v21, %v8689_v24 }
  0x49   : > { %v3626_v57 = vrot.slane %v639_v26, %v8689_v24  ;;  %7759 = vst.msk [vmem:[%s8791_s27 + $0x58] sm:$0xff] %vm7747_vm0, %v5646_v50  ;;  %v3630_v58 = vrot.slane %v647_v52, %v8689_v24  ;;  %v3634_v59 = vrot.slane %v649_v53, %v8689_v24  ;;  %v632_v55 = vrot.slane %v616_v16, %v8712_v31 }
  0x4a   : > { %7760 = vst.msk [vmem:[%s8791_s27 + $0x60] sm:$0xff] %vm7747_vm0, %v5663_v51  ;;  %v646_v60 = vrot.slane %v618_v49, %v8712_v31  ;;  %v5665_v14 = vcombine.low %v3614_v44, %v3618_v54  ;;  %v5672_v19 = vrot.slane %v5664_v15, %v8714_v32  ;;  %v658_v62 = vrot.slane %v8682_v22, %v8712_v31 }
  0x4b   : > { %v5681_v61 = vcombine.low %v3622_v20, %v3626_v57  ;;  %v5682_v63 = vcombine.low %v3630_v58, %v3634_v59  ;;  %v648_v47 = vcombine.high %v632_v55, %v632_v55  ;;  %v3638_v1 = vrot.slane %v632_v55, %v8689_v24 }
  0x4c   : > { %v650_v0 = vcombine.high %v646_v60, %v646_v60  ;;  %v5679_v2 = vrot.slane %v5665_v14, %v8714_v32  ;;  %v3642_v4 = vrot.slane %v646_v60, %v8689_v24  ;;  %v666_v5 = vcombine.high %v658_v62, %v658_v62 }
  0x4d   : > { %v5689_v3 = vrot.slane %v5681_v61, %v8714_v32  ;;  %v5696_v56 = vrot.slane %v5682_v63, %v8714_v32  ;;  %v3646_v6 = vrot.slane %v648_v47, %v8689_v24  ;;  %v674_v45 = vrot.slane %v658_v62, %v8712_v31 }
  0x4e   : > { %v3650_v7 = vrot.slane %v650_v0, %v8689_v24  ;;  %v5680_v8 = vcombine.low %v5672_v19, %v5679_v2  ;;  %v5698_v9 = vcombine.low %v3638_v1, %v3642_v4  ;;  %v688_v16 = vrot.slane %v666_v5, %v8712_v31 }
  0x4f   : > { %v665_v25 = vrot.slane %v651_v27, %v8712_v31  ;;  %v5697_v10 = vcombine.low %v5689_v3, %v5696_v56  ;;  %v696_v12 = vcombine.high %v674_v45, %v674_v45  ;;  %v3654_v48 = vrot.slane %v674_v45, %v8689_v24 }
  0x50   : > { %v5699_v11 = vcombine.low %v3646_v6, %v3650_v7  ;;  %7761 = vst.msk [vmem:[%s8791_s27 + $0x68] sm:$0xff] %vm7747_vm0, %v5680_v8  ;;  %v5706_v13 = vrot.slane %v5698_v9, %v8714_v32  ;;  %v698_v17 = vcombine.high %v688_v16, %v688_v16  ;;  %v3658_v18 = vrot.slane %v688_v16, %v8689_v24 }
  0x51   : > { %v667_v41 = vcombine.high %v665_v25, %v665_v25  ;;  %7762 = vst.msk [vmem:[%s8791_s27 + $0x70] sm:$0xff] %vm7747_vm0, %v5697_v10  ;;  %v3662_v22 = vrot.slane %v696_v12, %v8689_v24  ;;  %v681_v27 = vrot.slane %v665_v25, %v8712_v31  ;;  %v707_v21 = vrot.slane %v8687_v23, %v8712_v31 }
  0x52   : > { %v5713_v42 = vrot.slane %v5699_v11, %v8714_v32  ;;  %v3666_v26 = vrot.slane %v698_v17, %v8689_v24  ;;  %v5715_v46 = vcombine.low %v3654_v48, %v3658_v18  ;;  %v714_v44 = vrot.slane %v700_v33, %v8712_v31 }
  0x53   : > { %v695_v43 = vrot.slane %v667_v41, %v8712_v31  ;;  %v697_v50 = vcombine.high %v681_v27, %v681_v27  ;;  %v3670_v51 = vrot.slane %v681_v27, %v8689_v24  ;;  %v715_v52 = vcombine.high %v707_v21, %v707_v21 }
  0x54   : > { %v5714_v49 = vcombine.low %v5706_v13, %v5713_v42  ;;  %v5716_v53 = vcombine.low %v3662_v22, %v3666_v26  ;;  %v5723_v54 = vrot.slane %v5715_v46, %v8714_v32  ;;  %v723_v58 = vrot.slane %v707_v21, %v8712_v31 }
  0x55   : > { %v699_v15 = vcombine.high %v695_v43, %v695_v43  ;;  %v3674_v20 = vrot.slane %v695_v43, %v8689_v24  ;;  %v3678_v57 = vrot.slane %v697_v50, %v8689_v24  ;;  %v737_v23 = vrot.slane %v715_v52, %v8712_v31 }
  0x56   : > { %7763 = vst.msk [vmem:[%s8791_s27 + $0x78] sm:$0xff] %vm7747_vm0, %v5714_v49  ;;  %v716_v33 = vcombine.high %v714_v44, %v714_v44  ;;  %v5730_v59 = vrot.slane %v5716_v53, %v8714_v32  ;;  %v730_v14 = vrot.slane %v714_v44, %v8712_v31  ;;  %v745_v19 = vcombine.high %v723_v58, %v723_v58 }
  0x57   : > { %v3682_v55 = vrot.slane %v699_v15, %v8689_v24  ;;  %v5732_v60 = vcombine.low %v3670_v51, %v3674_v20  ;;  %v747_v61 = vcombine.high %v737_v23, %v737_v23  ;;  %v3686_v62 = vrot.slane %v723_v58, %v8689_v24 }
  0x58   : > { %v3690_v63 = vrot.slane %v737_v23, %v8689_v24  ;;  %v5731_v47 = vcombine.low %v5723_v54, %v5730_v59  ;;  %v744_v2 = vrot.slane %v716_v33, %v8712_v31  ;;  %v3694_v3 = vrot.slane %v745_v19, %v8689_v24 }
  0x59   : > { %v5733_v0 = vcombine.low %v3678_v57, %v3682_v55  ;;  %v5740_v1 = vrot.slane %v5732_v60, %v8714_v32  ;;  %v3698_v4 = vrot.slane %v747_v61, %v8689_v24  ;;  %v746_v56 = vcombine.high %v730_v14, %v730_v14 }
  0x5a   : > { %v5749_v5 = vcombine.low %v3686_v62, %v3690_v63  ;;  %7764 = vst.msk [vmem:[%s8791_s27 + $0x80] sm:$0xff] %vm7747_vm0, %v5731_v47  ;;  %v748_v7 = vcombine.high %v744_v2, %v744_v2  ;;  %v3702_v45 = vrot.slane %v730_v14, %v8689_v24  ;;  %v3706_v8 = vrot.slane %v744_v2, %v8689_v24 }
  0x5b   : > { %v5747_v6 = vrot.slane %v5733_v0, %v8714_v32  ;;  %v5750_v9 = vcombine.low %v3694_v3, %v3698_v4  ;;  %v3710_v25 = vrot.slane %v746_v56, %v8689_v24  ;;  %v756_v10 = vrot.slane %v8700_v28, %v8712_v31 }
  0x5c   : > { %v5757_v16 = vrot.slane %v5749_v5, %v8714_v32  ;;  %v3714_v12 = vrot.slane %v748_v7, %v8689_v24  ;;  %v5766_v48 = vcombine.low %v3702_v45, %v3706_v8  ;;  %v763_v13 = vrot.slane %v749_v34, %v8712_v31 }
  0x5d   : > { %v5748_v11 = vcombine.low %v5740_v1, %v5747_v6  ;;  %v5764_v17 = vrot.slane %v5750_v9, %v8714_v32  ;;  %v764_v18 = vcombine.high %v756_v10, %v756_v10  ;;  %v772_v41 = vrot.slane %v756_v10, %v8712_v31 }
  0x5e   : > { %v805_v42 = vrot.slane %v8705_v29, %v8712_v31  ;;  %v5767_v22 = vcombine.low %v3710_v25, %v3714_v12  ;;  %v5774_v27 = vrot.slane %v5766_v48, %v8714_v32  ;;  %v765_v21 = vcombine.high %v763_v13, %v763_v13 }
  0x5f   : > { %7765 = vst.msk [vmem:[%s8791_s27 + $0x88] sm:$0xff] %vm7747_vm0, %v5748_v11  ;;  %v779_v26 = vrot.slane %v763_v13, %v8712_v31  ;;  %v5765_v46 = vcombine.low %v5757_v16, %v5764_v17  ;;  %v786_v28 = vrot.slane %v764_v18, %v8712_v31  ;;  %v794_v34 = vcombine.high %v772_v41, %v772_v41 }
  0x60   : > { %v3718_v43 = vrot.slane %v772_v41, %v8689_v24  ;;  %v5781_v44 = vrot.slane %v5767_v22, %v8714_v32  ;;  %v793_v49 = vrot.slane %v765_v21, %v8712_v31  ;;  %v813_v15 = vcombine.high %v805_v42, %v805_v42 }
  0x61   : > { %v795_v50 = vcombine.high %v779_v26, %v779_v26  ;;  %v3734_v51 = vrot.slane %v779_v26, %v8689_v24  ;;  %7766 = vst.msk [vmem:[%s8791_s27 + $0x90] sm:$0xff] %vm7747_vm0, %v5765_v46  ;;  %v796_v52 = vcombine.high %v786_v28, %v786_v28  ;;  %v3722_v53 = vrot.slane %v786_v28, %v8689_v24 }
  0x62   : > { %v3726_v54 = vrot.slane %v794_v34, %v8689_v24  ;;  %v5782_v20 = vcombine.low %v5774_v27, %v5781_v44  ;;  %v797_v57 = vcombine.high %v793_v49, %v793_v49  ;;  %v3738_v58 = vrot.slane %v793_v49, %v8689_v24 }
  0x63   : > { %v3742_v23 = vrot.slane %v795_v50, %v8689_v24  ;;  %v3730_v33 = vrot.slane %v796_v52, %v8689_v24  ;;  %v5783_v59 = vcombine.low %v3718_v43, %v3722_v53  ;;  %v821_v55 = vrot.slane %v805_v42, %v8712_v31 }
  0x64   : > { %v835_v60 = vrot.slane %v813_v15, %v8712_v31  ;;  %7767 = vst.msk [vmem:[%s8791_s27 + $0x98] sm:$0xff] %vm7747_vm0, %v5782_v20  ;;  %v3746_v14 = vrot.slane %v797_v57, %v8689_v24  ;;  %v5800_v19 = vcombine.low %v3734_v51, %v3738_v58  ;;  %v812_v61 = vrot.slane %v798_v37, %v8712_v31 }
  0x65   : > { %v854_v62 = vrot.slane %v8710_v30, %v8712_v31  ;;  %v5784_v63 = vcombine.low %v3726_v54, %v3730_v33  ;;  %v5791_v47 = vrot.slane %v5783_v59, %v8714_v32  ;;  %v843_v0 = vcombine.high %v821_v55, %v821_v55 }
  0x66   : > { %v845_v1 = vcombine.high %v835_v60, %v835_v60  ;;  %v5801_v2 = vcombine.low %v3742_v23, %v3746_v14  ;;  %v5808_v3 = vrot.slane %v5800_v19, %v8714_v32  ;;  %v3750_v4 = vrot.slane %v821_v55, %v8689_v24 }
  0x67   : > { %v3754_v5 = vrot.slane %v835_v60, %v8689_v24  ;;  %v5798_v56 = vrot.slane %v5784_v63, %v8714_v32  ;;  %v3758_v29 = vrot.slane %v843_v0, %v8689_v24  ;;  %v814_v6 = vcombine.high %v812_v61, %v812_v61 }
  0x68   : > { %v3762_v37 = vrot.slane %v845_v1, %v8689_v24  ;;  %v5815_v7 = vrot.slane %v5801_v2, %v8714_v32  ;;  %v828_v8 = vrot.slane %v812_v61, %v8712_v31  ;;  %v862_v9 = vcombine.high %v854_v62, %v854_v62 }
  0x69   : > { %v5817_v45 = vcombine.low %v3750_v4, %v3754_v5  ;;  %v5799_v16 = vcombine.low %v5791_v47, %v5798_v56  ;;  %v842_v10 = vrot.slane %v814_v6, %v8712_v31  ;;  %v870_v11 = vrot.slane %v854_v62, %v8712_v31 }
  0x6a   : > { %v5818_v25 = vcombine.low %v3758_v29, %v3762_v37  ;;  %v5816_v12 = vcombine.low %v5808_v3, %v5815_v7  ;;  %v844_v13 = vcombine.high %v828_v8, %v828_v8  ;;  %v3766_v17 = vrot.slane %v828_v8, %v8689_v24 }
  0x6b   : > { %v5825_v48 = vrot.slane %v5817_v45, %v8714_v32  ;;  %7768 = vst.msk [vmem:[%s8791_s27 + $0xa0] sm:$0xff] %vm7747_vm0, %v5799_v16  ;;  %v846_v41 = vcombine.high %v842_v10, %v842_v10  ;;  %v3770_v42 = vrot.slane %v842_v10, %v8689_v24  ;;  %v884_v22 = vrot.slane %v862_v9, %v8712_v31 }
  0x6c   : > { %v5832_v18 = vrot.slane %v5818_v25, %v8714_v32  ;;  %7769 = vst.msk [vmem:[%s8791_s27 + $0xa8] sm:$0xff] %vm7747_vm0, %v5816_v12  ;;  %v3774_v27 = vrot.slane %v844_v13, %v8689_v24  ;;  %v892_v21 = vcombine.high %v870_v11, %v870_v11  ;;  %v3782_v26 = vrot.slane %v870_v11, %v8689_v24 }
  0x6d   : > { %v861_v46 = vrot.slane %v847_v38, %v8712_v31  ;;  %v3778_v34 = vrot.slane %v846_v41, %v8689_v24  ;;  %v5834_v43 = vcombine.low %v3766_v17, %v3770_v42  ;;  %v894_v44 = vcombine.high %v884_v22, %v884_v22 }
  0x6e   : > { %v5833_v28 = vcombine.low %v5825_v48, %v5832_v18  ;;  %v3786_v49 = vrot.slane %v884_v22, %v8689_v24  ;;  %v3790_v50 = vrot.slane %v892_v21, %v8689_v24  ;;  %v903_v38 = vrot.slane %v8723_v35, %v8712_v31 }
  0x6f   : > { %v863_v51 = vcombine.high %v861_v46, %v861_v46  ;;  %v877_v52 = vrot.slane %v861_v46, %v8712_v31  ;;  %v5835_v53 = vcombine.low %v3774_v27, %v3778_v34  ;;  %v5842_v54 = vrot.slane %v5834_v43, %v8714_v32 }
  0x70   : > { %7770 = vst.msk [vmem:[%s8791_s27 + $0xb0] sm:$0xff] %vm7747_vm0, %v5833_v28  ;;  %v3794_v30 = vrot.slane %v894_v44, %v8689_v24  ;;  %v5851_v15 = vcombine.low %v3782_v26, %v3786_v49  ;;  %v911_v59 = vcombine.high %v903_v38, %v903_v38  ;;  %v919_v55 = vrot.slane %v903_v38, %v8712_v31  ;;  %v146_v38 = vld [vmem:[%s10739_s0 + $0x78] sm:$0xff] }
  0x71   : > { %v891_v20 = vrot.slane %v863_v51, %v8712_v31  ;;  %v893_v57 = vcombine.high %v877_v52, %v877_v52  ;;  %v3798_v58 = vrot.slane %v877_v52, %v8689_v24  ;;  %v5849_v23 = vrot.slane %v5835_v53, %v8714_v32 }
  0x72   : > { %v5852_v33 = vcombine.low %v3790_v50, %v3794_v30  ;;  %v5859_v60 = vrot.slane %v5851_v15, %v8714_v32  ;;  %v933_v47 = vrot.slane %v911_v59, %v8712_v31  ;;  %v941_v0 = vcombine.high %v919_v55, %v919_v55 }
  0x73   : > { %v895_v14 = vcombine.high %v891_v20, %v891_v20  ;;  %v3802_v19 = vrot.slane %v891_v20, %v8689_v24  ;;  %v3806_v61 = vrot.slane %v893_v57, %v8689_v24  ;;  %v5850_v62 = vcombine.low %v5842_v54, %v5849_v23 }
  0x74   : > { %v5866_v63 = vrot.slane %v5852_v33, %v8714_v32  ;;  %v3814_v3 = vrot.slane %v919_v55, %v8689_v24  ;;  %v910_v4 = vrot.slane %v896_v39, %v8712_v31  ;;  %v943_v56 = vcombine.high %v933_v47, %v933_v47 }
  0x75   : > { %v3810_v1 = vrot.slane %v895_v14, %v8689_v24  ;;  %v5868_v2 = vcombine.low %v3798_v58, %v3802_v19  ;;  %7771 = vst.msk [vmem:[%s8791_s27 + $0xb8] sm:$0xff] %vm7747_vm0, %v5850_v62  ;;  %v3818_v29 = vrot.slane %v933_v47, %v8689_v24  ;;  %v3822_v37 = vrot.slane %v941_v0, %v8689_v24 }
  0x76   : > { %v5867_v5 = vcombine.low %v5859_v60, %v5866_v63  ;;  %v912_v45 = vcombine.high %v910_v4, %v910_v4  ;;  %v926_v8 = vrot.slane %v910_v4, %v8712_v31  ;;  %v3826_v9 = vrot.slane %v943_v56, %v8689_v24 }
  0x77   : > { %v5869_v6 = vcombine.low %v3806_v61, %v3810_v1  ;;  %v5876_v7 = vrot.slane %v5868_v2, %v8714_v32  ;;  %v5885_v35 = vcombine.low %v3814_v3, %v3818_v29  ;;  %v952_v39 = vrot.slane %v8728_v36, %v8712_v31 }
  0x78   : > { %7772 = vst.msk [vmem:[%s8791_s27 + $0xc0] sm:$0xff] %vm7747_vm0, %v5867_v5  ;;  %v959_v16 = vrot.slane %v945_v40, %v8712_v31  ;;  %v940_v10 = vrot.slane %v912_v45, %v8712_v31  ;;  %v942_v11 = vcombine.high %v926_v8, %v926_v8  ;;  %v3830_v12 = vrot.slane %v926_v8, %v8689_v24  ;;  %v147_v5 = vld [vmem:[%s10739_s0 + $0x80] sm:$0xff] }
  0x79   : > { %v5883_v25 = vrot.slane %v5869_v6, %v8714_v32  ;;  %v5886_v48 = vcombine.low %v3822_v37, %v3826_v9  ;;  %v5893_v13 = vrot.slane %v5885_v35, %v8714_v32  ;;  %v960_v17 = vcombine.high %v952_v39, %v952_v39 }
  0x7a   : > { %v968_v18 = vrot.slane %v952_v39, %v8712_v31  ;;  %v944_v42 = vcombine.high %v940_v10, %v940_v10  ;;  %v3834_v22 = vrot.slane %v940_v10, %v8689_v24  ;;  %v3838_v36 = vrot.slane %v942_v11, %v8689_v24 }
  0x7b   : > { %v5884_v41 = vcombine.low %v5876_v7, %v5883_v25  ;;  %v5900_v40 = vrot.slane %v5886_v48, %v8714_v32  ;;  %v982_v27 = vrot.slane %v960_v17, %v8712_v31  ;;  %v961_v34 = vcombine.high %v959_v16, %v959_v16 }
  0x7c   : > { %v990_v21 = vcombine.high %v968_v18, %v968_v18  ;;  %v3846_v26 = vrot.slane %v968_v18, %v8689_v24  ;;  %v3842_v46 = vrot.slane %v944_v42, %v8689_v24  ;;  %v5902_v28 = vcombine.low %v3830_v12, %v3834_v22 }
  0x7d   : > { %7773 = vst.msk [vmem:[%s8791_s27 + $0xc8] sm:$0xff] %vm7747_vm0, %v5884_v41  ;;  %v975_v43 = vrot.slane %v959_v16, %v8712_v31  ;;  %v5901_v44 = vcombine.low %v5893_v13, %v5900_v40  ;;  %v992_v49 = vcombine.high %v982_v27, %v982_v27  ;;  %v3850_v50 = vrot.slane %v982_v27, %v8689_v24 }
  0x7e   : > { %v3854_v51 = vrot.slane %v990_v21, %v8689_v24  ;;  %v5903_v52 = vcombine.low %v3838_v36, %v3842_v46  ;;  %v5910_v53 = vrot.slane %v5902_v28, %v8714_v32  ;;  %v989_v54 = vrot.slane %v961_v34, %v8712_v31  ;;  %v148_v28 = vld [vmem:[%s10739_s0 + $0x88] sm:$0xff] }
  0x7f   : > { %v991_v30 = vcombine.high %v975_v43, %v975_v43  ;;  %7774 = vst.msk [vmem:[%s8791_s27 + $0xd0] sm:$0xff] %vm7747_vm0, %v5901_v44  ;;  %v3858_v15 = vrot.slane %v992_v49, %v8689_v24  ;;  %v5919_v20 = vcombine.low %v3846_v26, %v3850_v50  ;;  %v3862_v57 = vrot.slane %v975_v43, %v8689_v24 }
  0x80   : > { %v1001_v58 = vrot.slane %v146_v38, %v8712_v31  ;;  %v5917_v23 = vrot.slane %v5903_v52, %v8714_v32  ;;  %v993_v33 = vcombine.high %v989_v54, %v989_v54  ;;  %v3866_v59 = vrot.slane %v989_v54, %v8689_v24 }
  0x81   : > { %v3870_v55 = vrot.slane %v991_v30, %v8689_v24  ;;  %v5920_v60 = vcombine.low %v3854_v51, %v3858_v15  ;;  %v5927_v14 = vrot.slane %v5919_v20, %v8714_v32  ;;  %v994_v0 = vcombine.high %v146_v38, %v146_v38 }
  0x82   : > { %v1009_v19 = vcombine.high %v1001_v58, %v1001_v58  ;;  %v1017_v61 = vrot.slane %v1001_v58, %v8712_v31  ;;  %v5918_v62 = vcombine.low %v5910_v53, %v5917_v23  ;;  %v3874_v63 = vrot.slane %v993_v33, %v8689_v24 }
  0x83   : > { %v5936_v47 = vcombine.low %v3862_v57, %v3866_v59  ;;  %v5934_v1 = vrot.slane %v5920_v60, %v8714_v32  ;;  %v1008_v37 = vrot.slane %v994_v0, %v8712_v31  ;;  %v1050_v6 = vrot.slane %v147_v5, %v8712_v31 }
  0x84   : > { %v1031_v2 = vrot.slane %v1009_v19, %v8712_v31  ;;  %v1039_v3 = vcombine.high %v1017_v61, %v1017_v61  ;;  %v3878_v4 = vrot.slane %v1017_v61, %v8689_v24  ;;  %7775 = vst.msk [vmem:[%s8791_s27 + $0xd8] sm:$0xff] %vm7747_vm0, %v5918_v62  ;;  %v5937_v56 = vcombine.low %v3870_v55, %v3874_v63 }
  0x85   : > { %v5944_v29 = vrot.slane %v5936_v47, %v8714_v32  ;;  %v5935_v7 = vcombine.low %v5927_v14, %v5934_v1  ;;  %v1010_v39 = vcombine.high %v1008_v37, %v1008_v37  ;;  %v1024_v16 = vrot.slane %v1008_v37, %v8712_v31 }
  0x86   : > { %v1041_v45 = vcombine.high %v1031_v2, %v1031_v2  ;;  %v3882_v8 = vrot.slane %v1031_v2, %v8689_v24  ;;  %v3886_v9 = vrot.slane %v1039_v3, %v8689_v24  ;;  %v5951_v35 = vrot.slane %v5937_v56, %v8714_v32  ;;  %v149_v56 = vld [vmem:[%s10739_s0 + $0x90] sm:$0xff] }
  0x87   : > { %v1058_v25 = vcombine.high %v1050_v6, %v1050_v6  ;;  %7776 = vst.msk [vmem:[%s8791_s27 + $0xe0] sm:$0xff] %vm7747_vm0, %v5935_v7  ;;  %v1066_v12 = vrot.slane %v1050_v6, %v8712_v31  ;;  %v1043_v48 = vcombine.high %v147_v5, %v147_v5  ;;  %v1038_v17 = vrot.slane %v1010_v39, %v8712_v31  ;;  %v9196_v39 = vld [vmem:[%s10739_s0 + $0x98] sm:$0xff] }
  0x88   : > { %v3890_v10 = vrot.slane %v1041_v45, %v8689_v24  ;;  %v5953_v11 = vcombine.low %v3878_v4, %v3882_v8  ;;  %v5952_v13 = vcombine.low %v5944_v29, %v5951_v35  ;;  %v1040_v18 = vcombine.high %v1024_v16, %v1024_v16 }
  0x89   : > { %v3894_v41 = vrot.slane %v1024_v16, %v8689_v24  ;;  %v1080_v36 = vrot.slane %v1058_v25, %v8712_v31  ;;  %v1088_v40 = vcombine.high %v1066_v12, %v1066_v12  ;;  %v1042_v27 = vcombine.high %v1038_v17, %v1038_v17 }
  0x8a   : > { %v5954_v42 = vcombine.low %v3886_v9, %v3890_v10  ;;  %v5961_v22 = vrot.slane %v5953_v11, %v8714_v32  ;;  %7777 = vst.msk [vmem:[%s8791_s27 + $0xe8] sm:$0xff] %vm7747_vm0, %v5952_v13  ;;  %v3898_v21 = vrot.slane %v1038_v17, %v8689_v24  ;;  %v3902_v26 = vrot.slane %v1040_v18, %v8689_v24 }
  0x8b   : > { %v3910_v46 = vrot.slane %v1066_v12, %v8689_v24  ;;  %v1090_v43 = vcombine.high %v1080_v36, %v1080_v36  ;;  %v3914_v44 = vrot.slane %v1080_v36, %v8689_v24  ;;  %v3918_v49 = vrot.slane %v1088_v40, %v8689_v24 }
  0x8c   : > { %v5968_v34 = vrot.slane %v5954_v42, %v8714_v32  ;;  %v3906_v50 = vrot.slane %v1042_v27, %v8689_v24  ;;  %v5970_v51 = vcombine.low %v3894_v41, %v3898_v21  ;;  %v1057_v52 = vrot.slane %v1043_v48, %v8712_v31 }
  0x8d   : > { %v1099_v53 = vrot.slane %v148_v28, %v8712_v31  ;;  %v3922_v30 = vrot.slane %v1090_v43, %v8689_v24  ;;  %v5987_v38 = vcombine.low %v3910_v46, %v3914_v44  ;;  %v1092_v15 = vcombine.high %v148_v28, %v148_v28 }
  0x8e   : > { %v5969_v54 = vcombine.low %v5961_v22, %v5968_v34  ;;  %v5971_v20 = vcombine.low %v3902_v26, %v3906_v50  ;;  %v5978_v57 = vrot.slane %v5970_v51, %v8714_v32  ;;  %v1059_v58 = vcombine.high %v1057_v52, %v1057_v52 }
  0x8f   : > { %v1073_v23 = vrot.slane %v1057_v52, %v8712_v31  ;;  %v5988_v33 = vcombine.low %v3918_v49, %v3922_v30  ;;  %v5995_v59 = vrot.slane %v5987_v38, %v8714_v32  ;;  %v1107_v55 = vcombine.high %v1099_v53, %v1099_v53 }
  0x90   : > { %7778 = vst.msk [vmem:[%s8791_s27 + $0xf0] sm:$0xff] %vm7747_vm0, %v5969_v54  ;;  %v1115_v60 = vrot.slane %v1099_v53, %v8712_v31  ;;  %v5985_v14 = vrot.slane %v5971_v20, %v8714_v32  ;;  %v1087_v19 = vrot.slane %v1059_v58, %v8712_v31  ;;  %v1106_v9 = vrot.slane %v1092_v15, %v8712_v31 }
  0x91   : > { %v1089_v61 = vcombine.high %v1073_v23, %v1073_v23  ;;  %v3926_v62 = vrot.slane %v1073_v23, %v8689_v24  ;;  %v6002_v63 = vrot.slane %v5988_v33, %v8714_v32  ;;  %v1129_v47 = vrot.slane %v1107_v55, %v8712_v31 }
  0x92   : > { %v1137_v0 = vcombine.high %v1115_v60, %v1115_v60  ;;  %v3942_v1 = vrot.slane %v1115_v60, %v8689_v24  ;;  %v5986_v2 = vcombine.low %v5978_v57, %v5985_v14  ;;  %v1091_v3 = vcombine.high %v1087_v19, %v1087_v19 }
  0x93   : > { %v3930_v4 = vrot.slane %v1087_v19, %v8689_v24  ;;  %v3934_v5 = vrot.slane %v1089_v61, %v8689_v24  ;;  %v6003_v29 = vcombine.low %v5995_v59, %v6002_v63  ;;  %v1139_v37 = vcombine.high %v1129_v47, %v1129_v47 }
  0x94   : > { %v3946_v6 = vrot.slane %v1129_v47, %v8689_v24  ;;  %v3950_v7 = vrot.slane %v1137_v0, %v8689_v24  ;;  %7779 = vst.msk [vmem:[%s8791_s27 + $0xf8] sm:$0xff] %vm7747_vm0, %v5986_v2  ;;  %v3938_v45 = vrot.slane %v1091_v3, %v8689_v24  ;;  %v1148_v35 = vrot.slane %v149_v56, %v8712_v31 }
  0x95   : > { %v6004_v8 = vcombine.low %v3926_v62, %v3930_v4  ;;  %7780 = vst.msk [vmem:[%s8791_s27 + $0x100] sm:$0xff] %vm7747_vm0, %v6003_v29  ;;  %v3954_v16 = vrot.slane %v1139_v37, %v8689_v24  ;;  %v1141_v10 = vcombine.high %v149_v56, %v149_v56  ;;  %v1197_v11 = vrot.slane %v9196_v39, %v8712_v31 }
  0x96   : > { %v6021_v25 = vcombine.low %v3942_v1, %v3946_v6  ;;  %v6005_v12 = vcombine.low %v3934_v5, %v3938_v45  ;;  %v1108_v13 = vcombine.high %v1106_v9, %v1106_v9  ;;  %v1122_v17 = vrot.slane %v1106_v9, %v8712_v31  ;;  %v151_v45 = vld [vmem:[%s10739_s0 + $0xa0] sm:$0xff] }
  0x97   : > { %v6012_v48 = vrot.slane %v6004_v8, %v8714_v32  ;;  %v6022_v18 = vcombine.low %v3950_v7, %v3954_v16  ;;  %v1156_v42 = vcombine.high %v1148_v35, %v1148_v35  ;;  %v1164_v22 = vrot.slane %v1148_v35, %v8712_v31 }
  0x98   : > { %v6029_v41 = vrot.slane %v6021_v25, %v8714_v32  ;;  %v6019_v36 = vrot.slane %v6005_v12, %v8714_v32  ;;  %v1136_v40 = vrot.slane %v1108_v13, %v8712_v31  ;;  %v1138_v27 = vcombine.high %v1122_v17, %v1122_v17  ;;  %v9252_v12 = vld [vmem:[%s10739_s0 + $0xa8] sm:$0xff] }
  0x99   : > { %v3958_v21 = vrot.slane %v1122_v17, %v8689_v24  ;;  %v6036_v26 = vrot.slane %v6022_v18, %v8714_v32  ;;  %v1178_v46 = vrot.slane %v1156_v42, %v8712_v31  ;;  %v1186_v28 = vcombine.high %v1164_v22, %v1164_v22 }
  0x9a   : > { %v3974_v34 = vrot.slane %v1164_v22, %v8689_v24  ;;  %v6020_v43 = vcombine.low %v6012_v48, %v6019_v36  ;;  %v1140_v44 = vcombine.high %v1136_v40, %v1136_v40  ;;  %v3962_v49 = vrot.slane %v1136_v40, %v8689_v24 }
  0x9b   : > { %v3966_v50 = vrot.slane %v1138_v27, %v8689_v24  ;;  %v6037_v51 = vcombine.low %v6029_v41, %v6036_v26  ;;  %v1188_v52 = vcombine.high %v1178_v46, %v1178_v46  ;;  %v3978_v53 = vrot.slane %v1178_v46, %v8689_v24 }
  0x9c   : > { %v3982_v54 = vrot.slane %v1186_v28, %v8689_v24  ;;  %7781 = vst.msk [vmem:[%s8791_s27 + $0x108] sm:$0xff] %vm7747_vm0, %v6020_v43  ;;  %v3970_v30 = vrot.slane %v1140_v44, %v8689_v24  ;;  %v6038_v38 = vcombine.low %v3958_v21, %v3962_v49  ;;  %v1155_v15 = vrot.slane %v1141_v10, %v8712_v31 }
  0x9d   : > { %v1205_v20 = vcombine.high %v1197_v11, %v1197_v11  ;;  %7782 = vst.msk [vmem:[%s8791_s27 + $0x110] sm:$0xff] %vm7747_vm0, %v6037_v51  ;;  %v3986_v57 = vrot.slane %v1188_v52, %v8689_v24  ;;  %v6055_v58 = vcombine.low %v3974_v34, %v3978_v53  ;;  %v1213_v23 = vrot.slane %v1197_v11, %v8712_v31 }
  0x9e   : > { %v1190_v33 = vcombine.high %v9196_v39, %v9196_v39  ;;  %v6039_v59 = vcombine.low %v3966_v50, %v3970_v30  ;;  %v6046_v55 = vrot.slane %v6038_v38, %v8714_v32  ;;  %v1157_v60 = vcombine.high %v1155_v15, %v1155_v15 }
  0x9f   : > { %v1171_v14 = vrot.slane %v1155_v15, %v8712_v31  ;;  %v6056_v19 = vcombine.low %v3982_v54, %v3986_v57  ;;  %v6063_v61 = vrot.slane %v6055_v58, %v8714_v32  ;;  %v1227_v62 = vrot.slane %v1205_v20, %v8712_v31 }
  0xa0   : > { %v1235_v63 = vcombine.high %v1213_v23, %v1213_v23  ;;  %v6053_v47 = vrot.slane %v6039_v59, %v8714_v32  ;;  %v1185_v0 = vrot.slane %v1157_v60, %v8712_v31  ;;  %v4006_v5 = vrot.slane %v1213_v23, %v8689_v24 }
  0xa1   : > { %v1187_v1 = vcombine.high %v1171_v14, %v1171_v14  ;;  %v3990_v2 = vrot.slane %v1171_v14, %v8689_v24  ;;  %v6070_v3 = vrot.slane %v6056_v19, %v8714_v32  ;;  %v1237_v4 = vcombine.high %v1227_v62, %v1227_v62 }
  0xa2   : > { %v4010_v56 = vrot.slane %v1227_v62, %v8689_v24  ;;  %v6054_v29 = vcombine.low %v6046_v55, %v6053_v47  ;;  %v1189_v37 = vcombine.high %v1185_v0, %v1185_v0  ;;  %v3994_v6 = vrot.slane %v1185_v0, %v8689_v24 }
  0xa3   : > { %v3998_v7 = vrot.slane %v1187_v1, %v8689_v24  ;;  %v6071_v8 = vcombine.low %v6063_v61, %v6070_v3  ;;  %v4014_v9 = vrot.slane %v1235_v63, %v8689_v24  ;;  %v4018_v35 = vrot.slane %v1237_v4, %v8689_v24 }
  0xa4   : > { %v6089_v39 = vcombine.low %v4006_v5, %v4010_v56  ;;  %7783 = vst.msk [vmem:[%s8791_s27 + $0x118] sm:$0xff] %vm7747_vm0, %v6054_v29  ;;  %v4002_v16 = vrot.slane %v1189_v37, %v8689_v24  ;;  %v6072_v25 = vcombine.low %v3990_v2, %v3994_v6  ;;  %v1204_v10 = vrot.slane %v1190_v33, %v8712_v31 }
  0xa5   : > { %v1246_v11 = vrot.slane %v151_v45, %v8712_v31  ;;  %7784 = vst.msk [vmem:[%s8791_s27 + $0x120] sm:$0xff] %vm7747_vm0, %v6071_v8  ;;  %v6090_v48 = vcombine.low %v4014_v9, %v4018_v35  ;;  %v1239_v17 = vcombine.high %v151_v45, %v151_v45  ;;  %v1295_v18 = vrot.slane %v9252_v12, %v8712_v31  ;;  %v153_v8 = vld [vmem:[%s10739_s0 + $0xb0] sm:$0xff] }
  0xa6   : > { %v6097_v13 = vrot.slane %v6089_v39, %v8714_v32  ;;  %v6073_v41 = vcombine.low %v3998_v7, %v4002_v16  ;;  %v6080_v42 = vrot.slane %v6072_v25, %v8714_v32  ;;  %v1206_v22 = vcombine.high %v1204_v10, %v1204_v10  ;;  %v9300_v25 = vld [vmem:[%s10739_s0 + $0xb8] sm:$0xff] }
  0xa7   : > { %v1220_v36 = vrot.slane %v1204_v10, %v8712_v31  ;;  %v6104_v40 = vrot.slane %v6090_v48, %v8714_v32  ;;  %v1254_v27 = vcombine.high %v1246_v11, %v1246_v11  ;;  %v1262_v21 = vrot.slane %v1246_v11, %v8712_v31 }
  0xa8   : > { %v1253_v26 = vrot.slane %v1239_v17, %v8712_v31  ;;  %v6087_v46 = vrot.slane %v6073_v41, %v8714_v32  ;;  %v1234_v28 = vrot.slane %v1206_v22, %v8712_v31  ;;  %v1303_v59 = vcombine.high %v1295_v18, %v1295_v18 }
  0xa9   : > { %v1236_v34 = vcombine.high %v1220_v36, %v1220_v36  ;;  %v4022_v43 = vrot.slane %v1220_v36, %v8689_v24  ;;  %v6105_v44 = vcombine.low %v6097_v13, %v6104_v40  ;;  %v1276_v49 = vrot.slane %v1254_v27, %v8712_v31 }
  0xaa   : > { %v1284_v50 = vcombine.high %v1262_v21, %v1262_v21  ;;  %v4038_v51 = vrot.slane %v1262_v21, %v8689_v24  ;;  %v6088_v52 = vcombine.low %v6080_v42, %v6087_v46  ;;  %v1238_v53 = vcombine.high %v1234_v28, %v1234_v28 }
  0xab   : > { %v4026_v54 = vrot.slane %v1234_v28, %v8689_v24  ;;  %v4030_v30 = vrot.slane %v1236_v34, %v8689_v24  ;;  %7786 = vst.msk [vmem:[%s8791_s27 + $0x130] sm:$0xff] %vm7747_vm0, %v6105_v44  ;;  %v1286_v38 = vcombine.high %v1276_v49, %v1276_v49  ;;  %v4042_v15 = vrot.slane %v1276_v49, %v8689_v24 }
  0xac   : > { %v4046_v20 = vrot.slane %v1284_v50, %v8689_v24  ;;  %v1255_v57 = vcombine.high %v1253_v26, %v1253_v26  ;;  %7785 = vst.msk [vmem:[%s8791_s27 + $0x128] sm:$0xff] %vm7747_vm0, %v6088_v52  ;;  %v4034_v58 = vrot.slane %v1238_v53, %v8689_v24  ;;  %v1269_v33 = vrot.slane %v1253_v26, %v8712_v31 }
  0xad   : > { %v6106_v23 = vcombine.low %v4022_v43, %v4026_v54  ;;  %v4050_v55 = vrot.slane %v1286_v38, %v8689_v24  ;;  %v6123_v60 = vcombine.low %v4038_v51, %v4042_v15  ;;  %v1311_v19 = vrot.slane %v1295_v18, %v8712_v31 }
  0xae   : > { %v1283_v14 = vrot.slane %v1255_v57, %v8712_v31  ;;  %v6107_v61 = vcombine.low %v4030_v30, %v4034_v58  ;;  %v1285_v63 = vcombine.high %v1269_v33, %v1269_v33  ;;  %v4054_v47 = vrot.slane %v1269_v33, %v8689_v24 }
  0xaf   : > { %v6114_v62 = vrot.slane %v6106_v23, %v8714_v32  ;;  %v6124_v0 = vcombine.low %v4046_v20, %v4050_v55  ;;  %v6131_v1 = vrot.slane %v6123_v60, %v8714_v32  ;;  %v1325_v56 = vrot.slane %v1303_v59, %v8712_v31 }
  0xb0   : > { %v1287_v2 = vcombine.high %v1283_v14, %v1283_v14  ;;  %v4058_v3 = vrot.slane %v1283_v14, %v8689_v24  ;;  %v6121_v4 = vrot.slane %v6107_v61, %v8714_v32  ;;  %v4062_v5 = vrot.slane %v1285_v63, %v8689_v24 }
  0xb1   : > { %v1333_v29 = vcombine.high %v1311_v19, %v1311_v19  ;;  %v6138_v37 = vrot.slane %v6124_v0, %v8714_v32  ;;  %v4070_v45 = vrot.slane %v1311_v19, %v8689_v24  ;;  %v1335_v35 = vcombine.high %v1325_v56, %v1325_v56 }
  0xb2   : > { %v4066_v6 = vrot.slane %v1287_v2, %v8689_v24  ;;  %v6140_v7 = vcombine.low %v4054_v47, %v4058_v3  ;;  %v6122_v9 = vcombine.low %v6114_v62, %v6121_v4  ;;  %v4074_v39 = vrot.slane %v1325_v56, %v8689_v24 }
  0xb3   : > { %v4078_v16 = vrot.slane %v1333_v29, %v8689_v24  ;;  %v6139_v10 = vcombine.low %v6131_v1, %v6138_v37  ;;  %v1288_v13 = vcombine.high %v9252_v12, %v9252_v12  ;;  %v4082_v17 = vrot.slane %v1335_v35, %v8689_v24 }
  0xb4   : > { %v6141_v11 = vcombine.low %v4062_v5, %v4066_v6  ;;  %v6148_v48 = vrot.slane %v6140_v7, %v8714_v32  ;;  %7787 = vst.msk [vmem:[%s8791_s27 + $0x138] sm:$0xff] %vm7747_vm0, %v6122_v9  ;;  %v6157_v18 = vcombine.low %v4070_v45, %v4074_v39  ;;  %v1344_v41 = vrot.slane %v153_v8, %v8712_v31 }
  0xb5   : > { %v1337_v42 = vcombine.high %v153_v8, %v153_v8  ;;  %7788 = vst.msk [vmem:[%s8791_s27 + $0x140] sm:$0xff] %vm7747_vm0, %v6139_v10  ;;  %v1302_v36 = vrot.slane %v1288_v13, %v8712_v31  ;;  %v1393_v40 = vrot.slane %v9300_v25, %v8712_v31  ;;  %v1386_v12 = vcombine.high %v9300_v25, %v9300_v25  ;;  %v155_v13 = vld [vmem:[%s10739_s0 + $0xc0] sm:$0xff] }
  0xb6   : > { %v6155_v22 = vrot.slane %v6141_v11, %v8714_v32  ;;  %v6158_v27 = vcombine.low %v4078_v16, %v4082_v17  ;;  %v6165_v21 = vrot.slane %v6157_v18, %v8714_v32  ;;  %v1352_v26 = vcombine.high %v1344_v41, %v1344_v41 }
  0xb7   : > { %v1360_v46 = vrot.slane %v1344_v41, %v8712_v31  ;;  %v1304_v34 = vcombine.high %v1302_v36, %v1302_v36  ;;  %v1318_v43 = vrot.slane %v1302_v36, %v8712_v31  ;;  %v1351_v44 = vrot.slane %v1337_v42, %v8712_v31 }
  0xb8   : > { %v6156_v28 = vcombine.low %v6148_v48, %v6155_v22  ;;  %v6172_v49 = vrot.slane %v6158_v27, %v8714_v32  ;;  %v1374_v50 = vrot.slane %v1352_v26, %v8712_v31  ;;  %v1401_v61 = vcombine.high %v1393_v40, %v1393_v40  ;;  %v9365_v27 = vld [vmem:[%s10739_s0 + $0xc8] sm:$0xff] }
  0xb9   : > { %v1382_v51 = vcombine.high %v1360_v46, %v1360_v46  ;;  %v4102_v52 = vrot.slane %v1360_v46, %v8689_v24  ;;  %v1332_v53 = vrot.slane %v1304_v34, %v8712_v31  ;;  %v1334_v54 = vcombine.high %v1318_v43, %v1318_v43 }
  0xba   : > { %7789 = vst.msk [vmem:[%s8791_s27 + $0x148] sm:$0xff] %vm7747_vm0, %v6156_v28  ;;  %v4086_v30 = vrot.slane %v1318_v43, %v8689_v24  ;;  %v1353_v38 = vcombine.high %v1351_v44, %v1351_v44  ;;  %v6173_v15 = vcombine.low %v6165_v21, %v6172_v49  ;;  %v1384_v20 = vcombine.high %v1374_v50, %v1374_v50 }
  0xbb   : > { %v4106_v57 = vrot.slane %v1374_v50, %v8689_v24  ;;  %v4110_v58 = vrot.slane %v1382_v51, %v8689_v24  ;;  %v1336_v23 = vcombine.high %v1332_v53, %v1332_v53  ;;  %v4090_v33 = vrot.slane %v1332_v53, %v8689_v24 }
  0xbc   : > { %v4094_v59 = vrot.slane %v1334_v54, %v8689_v24  ;;  %v1367_v55 = vrot.slane %v1351_v44, %v8712_v31  ;;  %7790 = vst.msk [vmem:[%s8791_s27 + $0x150] sm:$0xff] %vm7747_vm0, %v6173_v15  ;;  %v4114_v60 = vrot.slane %v1384_v20, %v8689_v24  ;;  %v1381_v19 = vrot.slane %v1353_v38, %v8712_v31 }
  0xbd   : > { %v6191_v14 = vcombine.low %v4102_v52, %v4106_v57  ;;  %v4098_v62 = vrot.slane %v1336_v23, %v8689_v24  ;;  %v6174_v63 = vcombine.low %v4086_v30, %v4090_v33  ;;  %v1409_v37 = vrot.slane %v1393_v40, %v8712_v31 }
  0xbe   : > { %v1383_v47 = vcombine.high %v1367_v55, %v1367_v55  ;;  %v4118_v0 = vrot.slane %v1367_v55, %v8689_v24  ;;  %v6192_v1 = vcombine.low %v4110_v58, %v4114_v60  ;;  %v1385_v3 = vcombine.high %v1381_v19, %v1381_v19 }
  0xbf   : > { %v6199_v2 = vrot.slane %v6191_v14, %v8714_v32  ;;  %v4122_v4 = vrot.slane %v1381_v19, %v8689_v24  ;;  %v6175_v5 = vcombine.low %v4094_v59, %v4098_v62  ;;  %v6182_v56 = vrot.slane %v6174_v63, %v8714_v32 }
  0xc0   : > { %v4126_v29 = vrot.slane %v1383_v47, %v8689_v24  ;;  %v6206_v6 = vrot.slane %v6192_v1, %v8714_v32  ;;  %v4130_v7 = vrot.slane %v1385_v3, %v8689_v24  ;;  %v1423_v8 = vrot.slane %v1401_v61, %v8712_v31 }
  0xc1   : > { %v6208_v45 = vcombine.low %v4118_v0, %v4122_v4  ;;  %v6189_v9 = vrot.slane %v6175_v5, %v8714_v32  ;;  %v1431_v35 = vcombine.high %v1409_v37, %v1409_v37  ;;  %v4134_v39 = vrot.slane %v1409_v37, %v8689_v24 }
  0xc2   : > { %v1400_v16 = vrot.slane %v1386_v12, %v8712_v31  ;;  %v6207_v25 = vcombine.low %v6199_v2, %v6206_v6  ;;  %v6209_v10 = vcombine.low %v4126_v29, %v4130_v7  ;;  %v1433_v48 = vcombine.high %v1423_v8, %v1423_v8 }
  0xc3   : > { %v6216_v11 = vrot.slane %v6208_v45, %v8714_v32  ;;  %v6190_v17 = vcombine.low %v6182_v56, %v6189_v9  ;;  %v4138_v18 = vrot.slane %v1423_v8, %v8689_v24  ;;  %v4142_v41 = vrot.slane %v1431_v35, %v8689_v24 }
  0xc4   : > { %v1402_v42 = vcombine.high %v1400_v16, %v1400_v16  ;;  %7792 = vst.msk [vmem:[%s8791_s27 + $0x160] sm:$0xff] %vm7747_vm0, %v6207_v25  ;;  %v6223_v22 = vrot.slane %v6209_v10, %v8714_v32  ;;  %v4146_v36 = vrot.slane %v1433_v48, %v8689_v24  ;;  %v1416_v40 = vrot.slane %v1400_v16, %v8712_v31  ;;  %v157_v10 = vld [vmem:[%s10739_s0 + $0xd0] sm:$0xff] }
  0xc5   : > { %v1442_v12 = vrot.slane %v155_v13, %v8712_v31  ;;  %7791 = vst.msk [vmem:[%s8791_s27 + $0x158] sm:$0xff] %vm7747_vm0, %v6190_v17  ;;  %v6225_v21 = vcombine.low %v4134_v39, %v4138_v18  ;;  %v1435_v46 = vcombine.high %v155_v13, %v155_v13  ;;  %v1491_v28 = vrot.slane %v9365_v27, %v8712_v31 }
  0xc6   : > { %v1430_v26 = vrot.slane %v1402_v42, %v8712_v31  ;;  %v6224_v34 = vcombine.low %v6216_v11, %v6223_v22  ;;  %v6226_v43 = vcombine.low %v4142_v41, %v4146_v36  ;;  %v1432_v44 = vcombine.high %v1416_v40, %v1416_v40 }
  0xc7   : > { %v4150_v49 = vrot.slane %v1416_v40, %v8689_v24  ;;  %v6233_v50 = vrot.slane %v6225_v21, %v8714_v32  ;;  %v1450_v53 = vcombine.high %v1442_v12, %v1442_v12  ;;  %v1458_v38 = vrot.slane %v1442_v12, %v8712_v31 }
  0xc8   : > { %v1434_v51 = vcombine.high %v1430_v26, %v1430_v26  ;;  %v4154_v52 = vrot.slane %v1430_v26, %v8689_v24  ;;  %7793 = vst.msk [vmem:[%s8791_s27 + $0x168] sm:$0xff] %vm7747_vm0, %v6224_v34  ;;  %v6240_v54 = vrot.slane %v6226_v43, %v8714_v32  ;;  %v4158_v30 = vrot.slane %v1432_v44, %v8689_v24  ;;  %v9417_v26 = vld [vmem:[%s10739_s0 + $0xd8] sm:$0xff] }
  0xc9   : > { %v1449_v15 = vrot.slane %v1435_v46, %v8712_v31  ;;  %v1472_v58 = vrot.slane %v1450_v53, %v8712_v31  ;;  %v1499_v23 = vcombine.high %v1491_v28, %v1491_v28  ;;  %v1480_v59 = vcombine.high %v1458_v38, %v1458_v38 }
  0xca   : > { %v4162_v20 = vrot.slane %v1434_v51, %v8689_v24  ;;  %v6242_v57 = vcombine.low %v4150_v49, %v4154_v52  ;;  %v6241_v33 = vcombine.low %v6233_v50, %v6240_v54  ;;  %v4166_v55 = vrot.slane %v1458_v38, %v8689_v24 }
  0xcb   : > { %v1451_v60 = vcombine.high %v1449_v15, %v1449_v15  ;;  %v1482_v61 = vcombine.high %v1472_v58, %v1472_v58  ;;  %v4170_v62 = vrot.slane %v1472_v58, %v8689_v24  ;;  %v4174_v63 = vrot.slane %v1480_v59, %v8689_v24 }
  0xcc   : > { %v6243_v14 = vcombine.low %v4158_v30, %v4162_v20  ;;  %v6250_v19 = vrot.slane %v6242_v57, %v8714_v32  ;;  %7794 = vst.msk [vmem:[%s8791_s27 + $0x170] sm:$0xff] %vm7747_vm0, %v6241_v33  ;;  %v1465_v47 = vrot.slane %v1449_v15, %v8712_v31  ;;  %v1507_v1 = vrot.slane %v1491_v28, %v8712_v31 }
  0xcd   : > { %v1479_v0 = vrot.slane %v1451_v60, %v8712_v31  ;;  %v4178_v3 = vrot.slane %v1482_v61, %v8689_v24  ;;  %v6259_v4 = vcombine.low %v4166_v55, %v4170_v62  ;;  %v1521_v5 = vrot.slane %v1499_v23, %v8712_v31 }
  0xce   : > { %v6257_v2 = vrot.slane %v6243_v14, %v8714_v32  ;;  %v1481_v56 = vcombine.high %v1465_v47, %v1465_v47  ;;  %v4182_v37 = vrot.slane %v1465_v47, %v8689_v24  ;;  %v1529_v9 = vcombine.high %v1507_v1, %v1507_v1 }
  0xcf   : > { %v1483_v29 = vcombine.high %v1479_v0, %v1479_v0  ;;  %v4186_v6 = vrot.slane %v1479_v0, %v8689_v24  ;;  %v6260_v45 = vcombine.low %v4174_v63, %v4178_v3  ;;  %v6267_v8 = vrot.slane %v6259_v4, %v8714_v32 }
  0xd0   : > { %v6258_v7 = vcombine.low %v6250_v19, %v6257_v2  ;;  %v4190_v35 = vrot.slane %v1481_v56, %v8689_v24  ;;  %v1531_v25 = vcombine.high %v1521_v5, %v1521_v5  ;;  %v4198_v48 = vrot.slane %v1507_v1, %v8689_v24 }
  0xd1   : > { %v4194_v39 = vrot.slane %v1483_v29, %v8689_v24  ;;  %v6276_v16 = vcombine.low %v4182_v37, %v4186_v6  ;;  %v6274_v11 = vrot.slane %v6260_v45, %v8714_v32  ;;  %v4202_v13 = vrot.slane %v1521_v5, %v8689_v24 }
  0xd2   : > { %7795 = vst.msk [vmem:[%s8791_s27 + $0x178] sm:$0xff] %vm7747_vm0, %v6258_v7  ;;  %v4206_v17 = vrot.slane %v1529_v9, %v8689_v24  ;;  %v4210_v42 = vrot.slane %v1531_v25, %v8689_v24  ;;  %v1484_v22 = vcombine.high %v9365_v27, %v9365_v27  ;;  %v1540_v12 = vrot.slane %v157_v10, %v8712_v31 }
  0xd3   : > { %v6277_v18 = vcombine.low %v4190_v35, %v4194_v39  ;;  %v6284_v41 = vrot.slane %v6276_v16, %v8714_v32  ;;  %v6275_v36 = vcombine.low %v6267_v8, %v6274_v11  ;;  %v6293_v40 = vcombine.low %v4198_v48, %v4202_v13  ;;  %v159_v11 = vld [vmem:[%s10739_s0 + $0xe0] sm:$0xff] }
  0xd4   : > { %v1533_v21 = vcombine.high %v157_v10, %v157_v10  ;;  %v6294_v28 = vcombine.low %v4206_v17, %v4210_v42  ;;  %v1498_v34 = vrot.slane %v1484_v22, %v8712_v31  ;;  %v1589_v43 = vrot.slane %v9417_v26, %v8712_v31 }
  0xd5   : > { %v6291_v46 = vrot.slane %v6277_v18, %v8714_v32  ;;  %7796 = vst.msk [vmem:[%s8791_s27 + $0x180] sm:$0xff] %vm7747_vm0, %v6275_v36  ;;  %v6301_v27 = vrot.slane %v6293_v40, %v8714_v32  ;;  %v1548_v44 = vcombine.high %v1540_v12, %v1540_v12  ;;  %v1556_v49 = vrot.slane %v1540_v12, %v8712_v31 }
  0xd6   : > { %v1547_v50 = vrot.slane %v1533_v21, %v8712_v31  ;;  %v6308_v52 = vrot.slane %v6294_v28, %v8714_v32  ;;  %v1500_v53 = vcombine.high %v1498_v34, %v1498_v34  ;;  %v1514_v54 = vrot.slane %v1498_v34, %v8712_v31 }
  0xd7   : > { %v6292_v51 = vcombine.low %v6284_v41, %v6291_v46  ;;  %v1570_v30 = vrot.slane %v1548_v44, %v8712_v31  ;;  %v1578_v38 = vcombine.high %v1556_v49, %v1556_v49  ;;  %v4230_v15 = vrot.slane %v1556_v49, %v8689_v24 }
  0xd8   : > { %v1549_v20 = vcombine.high %v1547_v50, %v1547_v50  ;;  %v6309_v57 = vcombine.low %v6301_v27, %v6308_v52  ;;  %v1528_v58 = vrot.slane %v1500_v53, %v8712_v31  ;;  %v1530_v23 = vcombine.high %v1514_v54, %v1514_v54 }
  0xd9   : > { %7797 = vst.msk [vmem:[%s8791_s27 + $0x188] sm:$0xff] %vm7747_vm0, %v6292_v51  ;;  %v4214_v33 = vrot.slane %v1514_v54, %v8689_v24  ;;  %v1580_v59 = vcombine.high %v1570_v30, %v1570_v30  ;;  %v4234_v55 = vrot.slane %v1570_v30, %v8689_v24  ;;  %v4238_v60 = vrot.slane %v1578_v38, %v8689_v24 }
  0xda   : > { %v1563_v14 = vrot.slane %v1547_v50, %v8712_v31  ;;  %7798 = vst.msk [vmem:[%s8791_s27 + $0x190] sm:$0xff] %vm7747_vm0, %v6309_v57  ;;  %v1532_v19 = vcombine.high %v1528_v58, %v1528_v58  ;;  %v4218_v61 = vrot.slane %v1528_v58, %v8689_v24  ;;  %v4222_v62 = vrot.slane %v1530_v23, %v8689_v24 }
  0xdb   : > { %v1577_v63 = vrot.slane %v1549_v20, %v8712_v31  ;;  %v4242_v47 = vrot.slane %v1580_v59, %v8689_v24  ;;  %v6327_v0 = vcombine.low %v4230_v15, %v4234_v55  ;;  %v1597_v7 = vcombine.high %v1589_v43, %v1589_v43  ;;  %v160_v59 = vld [vmem:[%s10739_s0 + $0xe8] sm:$0xff] }
  0xdc   : > { %v1579_v1 = vcombine.high %v1563_v14, %v1563_v14  ;;  %v4246_v2 = vrot.slane %v1563_v14, %v8689_v24  ;;  %v4226_v3 = vrot.slane %v1532_v19, %v8689_v24  ;;  %v6310_v4 = vcombine.low %v4214_v33, %v4218_v61 }
  0xdd   : > { %v1581_v5 = vcombine.high %v1577_v63, %v1577_v63  ;;  %v4250_v56 = vrot.slane %v1577_v63, %v8689_v24  ;;  %v6328_v29 = vcombine.low %v4238_v60, %v4242_v47  ;;  %v6335_v37 = vrot.slane %v6327_v0, %v8714_v32 }
  0xde   : > { %v4254_v6 = vrot.slane %v1579_v1, %v8689_v24  ;;  %v6311_v45 = vcombine.low %v4222_v62, %v4226_v3  ;;  %v6318_v8 = vrot.slane %v6310_v4, %v8714_v32  ;;  %v1605_v16 = vrot.slane %v1589_v43, %v8712_v31 }
  0xdf   : > { %v4258_v9 = vrot.slane %v1581_v5, %v8689_v24  ;;  %v6344_v35 = vcombine.low %v4246_v2, %v4250_v56  ;;  %v6342_v39 = vrot.slane %v6328_v29, %v8714_v32  ;;  %v1619_v25 = vrot.slane %v1597_v7, %v8712_v31 }
  0xe0   : > { %v1582_v10 = vcombine.high %v9417_v26, %v9417_v26  ;;  %v6325_v48 = vrot.slane %v6311_v45, %v8714_v32  ;;  %v1638_v18 = vrot.slane %v159_v11, %v8712_v31  ;;  %v1627_v42 = vcombine.high %v1605_v16, %v1605_v16 }
  0xe1   : > { %v6345_v13 = vcombine.low %v4254_v6, %v4258_v9  ;;  %v6352_v17 = vrot.slane %v6344_v35, %v8714_v32  ;;  %v6343_v41 = vcombine.low %v6335_v37, %v6342_v39  ;;  %v1629_v22 = vcombine.high %v1619_v25, %v1619_v25 }
  0xe2   : > { %v4262_v36 = vrot.slane %v1605_v16, %v8689_v24  ;;  %v6326_v40 = vcombine.low %v6318_v8, %v6325_v48  ;;  %v4266_v21 = vrot.slane %v1619_v25, %v8689_v24  ;;  %v1596_v26 = vrot.slane %v1582_v10, %v8712_v31 }
  0xe3   : > { %v6359_v12 = vrot.slane %v6345_v13, %v8714_v32  ;;  %7800 = vst.msk [vmem:[%s8791_s27 + $0x1a0] sm:$0xff] %vm7747_vm0, %v6343_v41  ;;  %v4270_v46 = vrot.slane %v1627_v42, %v8689_v24  ;;  %v4274_v28 = vrot.slane %v1629_v22, %v8689_v24  ;;  %v1646_v34 = vcombine.high %v1638_v18, %v1638_v18  ;;  %v161_v41 = vld [vmem:[%s10739_s0 + $0xf0] sm:$0xff] }
  0xe4   : > { %v1654_v43 = vrot.slane %v1638_v18, %v8712_v31  ;;  %7799 = vst.msk [vmem:[%s8791_s27 + $0x198] sm:$0xff] %vm7747_vm0, %v6326_v40  ;;  %v6361_v44 = vcombine.low %v4262_v36, %v4266_v21  ;;  %v1598_v49 = vcombine.high %v1596_v26, %v1596_v26  ;;  %v1612_v50 = vrot.slane %v1596_v26, %v8712_v31 }
  0xe5   : > { %v6360_v27 = vcombine.low %v6352_v17, %v6359_v12  ;;  %v6362_v51 = vcombine.low %v4270_v46, %v4274_v28  ;;  %v1668_v52 = vrot.slane %v1646_v34, %v8712_v31  ;;  %v1631_v19 = vcombine.high %v159_v11, %v159_v11  ;;  %v9521_v28 = vld [vmem:[%s10739_s0 + $0xf8] sm:$0xff] }
  0xe6   : > { %v1676_v53 = vcombine.high %v1654_v43, %v1654_v43  ;;  %v4294_v54 = vrot.slane %v1654_v43, %v8689_v24  ;;  %v6369_v30 = vrot.slane %v6361_v44, %v8714_v32  ;;  %v1626_v38 = vrot.slane %v1598_v49, %v8712_v31 }
  0xe7   : > { %7801 = vst.msk [vmem:[%s8791_s27 + $0x1a8] sm:$0xff] %vm7747_vm0, %v6360_v27  ;;  %v1628_v15 = vcombine.high %v1612_v50, %v1612_v50  ;;  %v4278_v20 = vrot.slane %v1612_v50, %v8689_v24  ;;  %v6376_v57 = vrot.slane %v6362_v51, %v8714_v32  ;;  %v1678_v58 = vcombine.high %v1668_v52, %v1668_v52 }
  0xe8   : > { %v4298_v23 = vrot.slane %v1668_v52, %v8689_v24  ;;  %v4302_v33 = vrot.slane %v1676_v53, %v8689_v24  ;;  %v1630_v55 = vcombine.high %v1626_v38, %v1626_v38  ;;  %v4282_v60 = vrot.slane %v1626_v38, %v8689_v24 }
  0xe9   : > { %v4286_v14 = vrot.slane %v1628_v15, %v8689_v24  ;;  %v6377_v61 = vcombine.low %v6369_v30, %v6376_v57  ;;  %v4306_v62 = vrot.slane %v1678_v58, %v8689_v24  ;;  %v1687_v47 = vrot.slane %v160_v59, %v8712_v31 }
  0xea   : > { %v6395_v63 = vcombine.low %v4294_v54, %v4298_v23  ;;  %v4290_v0 = vrot.slane %v1630_v55, %v8689_v24  ;;  %v6378_v1 = vcombine.low %v4278_v20, %v4282_v60  ;;  %v1645_v2 = vrot.slane %v1631_v19, %v8712_v31 }
  0xeb   : > { %v1680_v3 = vcombine.high %v160_v59, %v160_v59  ;;  %7802 = vst.msk [vmem:[%s8791_s27 + $0x1b0] sm:$0xff] %vm7747_vm0, %v6377_v61  ;;  %v6396_v4 = vcombine.low %v4302_v33, %v4306_v62  ;;  %v1695_v56 = vcombine.high %v1687_v47, %v1687_v47  ;;  %v1703_v29 = vrot.slane %v1687_v47, %v8712_v31 }
  0xec   : > { %v6403_v5 = vrot.slane %v6395_v63, %v8714_v32  ;;  %v6379_v37 = vcombine.low %v4286_v14, %v4290_v0  ;;  %v6386_v6 = vrot.slane %v6378_v1, %v8714_v32  ;;  %v1647_v7 = vcombine.high %v1645_v2, %v1645_v2 }
  0xed   : > { %v1661_v45 = vrot.slane %v1645_v2, %v8712_v31  ;;  %v6410_v8 = vrot.slane %v6396_v4, %v8714_v32  ;;  %v1717_v9 = vrot.slane %v1695_v56, %v8712_v31  ;;  %v1725_v35 = vcombine.high %v1703_v29, %v1703_v29 }
  0xee   : > { %v4326_v39 = vrot.slane %v1703_v29, %v8689_v24  ;;  %v6393_v16 = vrot.slane %v6379_v37, %v8714_v32  ;;  %v1675_v25 = vrot.slane %v1647_v7, %v8712_v31  ;;  %v1694_v26 = vrot.slane %v1680_v3, %v8712_v31 }
  0xef   : > { %v1677_v10 = vcombine.high %v1661_v45, %v1661_v45  ;;  %v4310_v11 = vrot.slane %v1661_v45, %v8689_v24  ;;  %v6411_v48 = vcombine.low %v6403_v5, %v6410_v8  ;;  %v1727_v13 = vcombine.high %v1717_v9, %v1717_v9 }
  0xf0   : > { %v4330_v17 = vrot.slane %v1717_v9, %v8689_v24  ;;  %v4334_v18 = vrot.slane %v1725_v35, %v8689_v24  ;;  %v6394_v42 = vcombine.low %v6386_v6, %v6393_v16  ;;  %v1679_v22 = vcombine.high %v1675_v25, %v1675_v25 }
  0xf1   : > { %v4314_v36 = vrot.slane %v1675_v25, %v8689_v24  ;;  %v4318_v40 = vrot.slane %v1677_v10, %v8689_v24  ;;  %7804 = vst.msk [vmem:[%s8791_s27 + $0x1c0] sm:$0xff] %vm7747_vm0, %v6411_v48  ;;  %v4338_v12 = vrot.slane %v1727_v13, %v8689_v24  ;;  %v1736_v46 = vrot.slane %v161_v41, %v8712_v31 }
  0xf2   : > { %v6429_v21 = vcombine.low %v4326_v39, %v4330_v17  ;;  %7803 = vst.msk [vmem:[%s8791_s27 + $0x1b8] sm:$0xff] %vm7747_vm0, %v6394_v42  ;;  %v4322_v34 = vrot.slane %v1679_v22, %v8689_v24  ;;  %v1729_v27 = vcombine.high %v161_v41, %v161_v41  ;;  %v1785_v44 = vrot.slane %v9521_v28, %v8712_v31 }
  0xf3   : > { %v6412_v43 = vcombine.low %v4310_v11, %v4314_v36  ;;  %v6430_v49 = vcombine.low %v4334_v18, %v4338_v12  ;;  %v1696_v51 = vcombine.high %v1694_v26, %v1694_v26  ;;  %v1710_v52 = vrot.slane %v1694_v26, %v8712_v31  ;;  %v163_v12 = vld [vmem:[%s10739_s0 + $0x100] sm:$0xff] }
  0xf4   : > { %v6437_v50 = vrot.slane %v6429_v21, %v8714_v32  ;;  %v6413_v53 = vcombine.low %v4318_v40, %v4322_v34  ;;  %v1744_v30 = vcombine.high %v1736_v46, %v1736_v46  ;;  %v1752_v38 = vrot.slane %v1736_v46, %v8712_v31 }
  0xf5   : > { %v6420_v54 = vrot.slane %v6412_v43, %v8714_v32  ;;  %v6444_v15 = vrot.slane %v6430_v49, %v8714_v32  ;;  %v1724_v20 = vrot.slane %v1696_v51, %v8712_v31  ;;  %v1726_v57 = vcombine.high %v1710_v52, %v1710_v52  ;;  %v9577_v49 = vld [vmem:[%s10739_s0 + $0x108] sm:$0xff] }
  0xf6   : > { %v4342_v58 = vrot.slane %v1710_v52, %v8689_v24  ;;  %v6427_v23 = vrot.slane %v6413_v53, %v8714_v32  ;;  %v1766_v33 = vrot.slane %v1744_v30, %v8712_v31  ;;  %v1774_v59 = vcombine.high %v1752_v38, %v1752_v38 }
  0xf7   : > { %v4358_v55 = vrot.slane %v1752_v38, %v8689_v24  ;;  %v6445_v60 = vcombine.low %v6437_v50, %v6444_v15  ;;  %v1728_v14 = vcombine.high %v1724_v20, %v1724_v20  ;;  %v4346_v19 = vrot.slane %v1724_v20, %v8689_v24 }
  0xf8   : > { %v4350_v61 = vrot.slane %v1726_v57, %v8689_v24  ;;  %v6428_v62 = vcombine.low %v6420_v54, %v6427_v23  ;;  %v1776_v63 = vcombine.high %v1766_v33, %v1766_v33  ;;  %v4362_v47 = vrot.slane %v1766_v33, %v8689_v24 }
  0xf9   : > { %v4366_v0 = vrot.slane %v1774_v59, %v8689_v24  ;;  %7806 = vst.msk [vmem:[%s8791_s27 + $0x1d0] sm:$0xff] %vm7747_vm0, %v6445_v60  ;;  %v4354_v1 = vrot.slane %v1728_v14, %v8689_v24  ;;  %v6446_v2 = vcombine.low %v4342_v58, %v4346_v19  ;;  %v1743_v3 = vrot.slane %v1729_v27, %v8712_v31 }
  0xfa   : > { %v1793_v4 = vcombine.high %v1785_v44, %v1785_v44  ;;  %7805 = vst.msk [vmem:[%s8791_s27 + $0x1c8] sm:$0xff] %vm7747_vm0, %v6428_v62  ;;  %v4370_v5 = vrot.slane %v1776_v63, %v8689_v24  ;;  %v6463_v56 = vcombine.low %v4358_v55, %v4362_v47  ;;  %v1801_v29 = vrot.slane %v1785_v44, %v8712_v31 }
  0xfb   : > { %v1778_v37 = vcombine.high %v9521_v28, %v9521_v28  ;;  %v6447_v6 = vcombine.low %v4350_v61, %v4354_v1  ;;  %v6454_v7 = vrot.slane %v6446_v2, %v8714_v32  ;;  %v1745_v45 = vcombine.high %v1743_v3, %v1743_v3 }
  0xfc   : > { %v1759_v8 = vrot.slane %v1743_v3, %v8712_v31  ;;  %v6464_v9 = vcombine.low %v4366_v0, %v4370_v5  ;;  %v6471_v35 = vrot.slane %v6463_v56, %v8714_v32  ;;  %v1815_v39 = vrot.slane %v1793_v4, %v8712_v31 }
  0xfd   : > { %v1823_v16 = vcombine.high %v1801_v29, %v1801_v29  ;;  %v6461_v25 = vrot.slane %v6447_v6, %v8714_v32  ;;  %v1773_v10 = vrot.slane %v1745_v45, %v8712_v31  ;;  %v4390_v18 = vrot.slane %v1801_v29, %v8689_v24 }
  0xfe   : > { %v1775_v11 = vcombine.high %v1759_v8, %v1759_v8  ;;  %v4374_v48 = vrot.slane %v1759_v8, %v8689_v24  ;;  %v6478_v13 = vrot.slane %v6464_v9, %v8714_v32  ;;  %v1825_v17 = vcombine.high %v1815_v39, %v1815_v39 }
  0xff   : > { %v4394_v41 = vrot.slane %v1815_v39, %v8689_v24  ;;  %v6462_v42 = vcombine.low %v6454_v7, %v6461_v25  ;;  %v1777_v22 = vcombine.high %v1773_v10, %v1773_v10  ;;  %v4378_v36 = vrot.slane %v1773_v10, %v8689_v24 }
 0x100   : > { %v4382_v40 = vrot.slane %v1775_v11, %v8689_v24  ;;  %v6479_v21 = vcombine.low %v6471_v35, %v6478_v13  ;;  %v4398_v26 = vrot.slane %v1823_v16, %v8689_v24  ;;  %v4402_v46 = vrot.slane %v1825_v17, %v8689_v24 }
 0x101   : > { %v6497_v28 = vcombine.low %v4390_v18, %v4394_v41  ;;  %7807 = vst.msk [vmem:[%s8791_s27 + $0x1d8] sm:$0xff] %vm7747_vm0, %v6462_v42  ;;  %v4386_v34 = vrot.slane %v1777_v22, %v8689_v24  ;;  %v6480_v43 = vcombine.low %v4374_v48, %v4378_v36  ;;  %v1792_v27 = vrot.slane %v1778_v37, %v8712_v31 }
 0x102   : > { %v1834_v44 = vrot.slane %v163_v12, %v8712_v31  ;;  %7808 = vst.msk [vmem:[%s8791_s27 + $0x1e0] sm:$0xff] %vm7747_vm0, %v6479_v21  ;;  %v6498_v50 = vcombine.low %v4398_v26, %v4402_v46  ;;  %v1827_v52 = vcombine.high %v163_v12, %v163_v12  ;;  %v1883_v53 = vrot.slane %v9577_v49, %v8712_v31  ;;  %v165_v21 = vld [vmem:[%s10739_s0 + $0x110] sm:$0xff] }
 0x103   : > { %v6505_v51 = vrot.slane %v6497_v28, %v8714_v32  ;;  %v6481_v54 = vcombine.low %v4382_v40, %v4386_v34  ;;  %v6488_v30 = vrot.slane %v6480_v43, %v8714_v32  ;;  %v1794_v38 = vcombine.high %v1792_v27, %v1792_v27  ;;  %v9625_v43 = vld [vmem:[%s10739_s0 + $0x118] sm:$0xff] }
 0x104   : > { %v1808_v15 = vrot.slane %v1792_v27, %v8712_v31  ;;  %v6512_v20 = vrot.slane %v6498_v50, %v8714_v32  ;;  %v1842_v57 = vcombine.high %v1834_v44, %v1834_v44  ;;  %v1850_v58 = vrot.slane %v1834_v44, %v8712_v31 }
 0x105   : > { %v1841_v23 = vrot.slane %v1827_v52, %v8712_v31  ;;  %v6495_v33 = vrot.slane %v6481_v54, %v8714_v32  ;;  %v1822_v59 = vrot.slane %v1794_v38, %v8712_v31  ;;  %v1891_v6 = vcombine.high %v1883_v53, %v1883_v53 }
 0x106   : > { %v1824_v55 = vcombine.high %v1808_v15, %v1808_v15  ;;  %v4406_v60 = vrot.slane %v1808_v15, %v8689_v24  ;;  %v6513_v14 = vcombine.low %v6505_v51, %v6512_v20  ;;  %v1864_v19 = vrot.slane %v1842_v57, %v8712_v31 }
 0x107   : > { %v1872_v61 = vcombine.high %v1850_v58, %v1850_v58  ;;  %v4422_v62 = vrot.slane %v1850_v58, %v8689_v24  ;;  %v6496_v63 = vcombine.low %v6488_v30, %v6495_v33  ;;  %v1826_v47 = vcombine.high %v1822_v59, %v1822_v59 }
 0x108   : > { %v4410_v0 = vrot.slane %v1822_v59, %v8689_v24  ;;  %v4414_v1 = vrot.slane %v1824_v55, %v8689_v24  ;;  %7810 = vst.msk [vmem:[%s8791_s27 + $0x1f0] sm:$0xff] %vm7747_vm0, %v6513_v14  ;;  %v1874_v2 = vcombine.high %v1864_v19, %v1864_v19  ;;  %v4426_v3 = vrot.slane %v1864_v19, %v8689_v24 }
 0x109   : > { %v4430_v4 = vrot.slane %v1872_v61, %v8689_v24  ;;  %v1843_v5 = vcombine.high %v1841_v23, %v1841_v23  ;;  %7809 = vst.msk [vmem:[%s8791_s27 + $0x1e8] sm:$0xff] %vm7747_vm0, %v6496_v63  ;;  %v4418_v56 = vrot.slane %v1826_v47, %v8689_v24  ;;  %v1857_v37 = vrot.slane %v1841_v23, %v8712_v31 }
 0x10a   : > { %v6514_v29 = vcombine.low %v4406_v60, %v4410_v0  ;;  %v4434_v7 = vrot.slane %v1874_v2, %v8689_v24  ;;  %v6531_v45 = vcombine.low %v4422_v62, %v4426_v3  ;;  %v1899_v9 = vrot.slane %v1883_v53, %v8712_v31 }
 0x10b   : > { %v1871_v8 = vrot.slane %v1843_v5, %v8712_v31  ;;  %v6515_v35 = vcombine.low %v4414_v1, %v4418_v56  ;;  %v1873_v16 = vcombine.high %v1857_v37, %v1857_v37  ;;  %v4438_v25 = vrot.slane %v1857_v37, %v8689_v24 }
 0x10c   : > { %v6522_v39 = vrot.slane %v6514_v29, %v8714_v32  ;;  %v6532_v10 = vcombine.low %v4430_v4, %v4434_v7  ;;  %v6539_v11 = vrot.slane %v6531_v45, %v8714_v32  ;;  %v1913_v41 = vrot.slane %v1891_v6, %v8712_v31 }
 0x10d   : > { %v1875_v48 = vcombine.high %v1871_v8, %v1871_v8  ;;  %v4442_v13 = vrot.slane %v1871_v8, %v8689_v24  ;;  %v6529_v17 = vrot.slane %v6515_v35, %v8714_v32  ;;  %v4446_v18 = vrot.slane %v1873_v16, %v8689_v24 }
 0x10e   : > { %v1921_v42 = vcombine.high %v1899_v9, %v1899_v9  ;;  %v6546_v22 = vrot.slane %v6532_v10, %v8714_v32  ;;  %v4454_v12 = vrot.slane %v1899_v9, %v8689_v24  ;;  %v1923_v46 = vcombine.high %v1913_v41, %v1913_v41 }
 0x10f   : > { %v4450_v36 = vrot.slane %v1875_v48, %v8689_v24  ;;  %v6548_v40 = vcombine.low %v4438_v25, %v4442_v13  ;;  %v6530_v26 = vcombine.low %v6522_v39, %v6529_v17  ;;  %v4458_v28 = vrot.slane %v1913_v41, %v8689_v24 }
 0x110   : > { %v4462_v34 = vrot.slane %v1921_v42, %v8689_v24  ;;  %v6547_v27 = vcombine.low %v6539_v11, %v6546_v22  ;;  %v1876_v51 = vcombine.high %v9577_v49, %v9577_v49  ;;  %v4466_v52 = vrot.slane %v1923_v46, %v8689_v24 }
 0x111   : > { %v6549_v44 = vcombine.low %v4446_v18, %v4450_v36  ;;  %v6556_v50 = vrot.slane %v6548_v40, %v8714_v32  ;;  %7811 = vst.msk [vmem:[%s8791_s27 + $0x1f8] sm:$0xff] %vm7747_vm0, %v6530_v26  ;;  %v6565_v53 = vcombine.low %v4454_v12, %v4458_v28  ;;  %v1932_v54 = vrot.slane %v165_v21, %v8712_v31 }
 0x112   : > { %v1925_v30 = vcombine.high %v165_v21, %v165_v21  ;;  %7812 = vst.msk [vmem:[%s8791_s27 + $0x200] sm:$0xff] %vm7747_vm0, %v6547_v27  ;;  %v1890_v15 = vrot.slane %v1876_v51, %v8712_v31  ;;  %v1981_v20 = vrot.slane %v9625_v43, %v8712_v31  ;;  %v1974_v49 = vcombine.high %v9625_v43, %v9625_v43  ;;  %v167_v51 = vld [vmem:[%s10739_s0 + $0x120] sm:$0xff] }
 0x113   : > { %v6563_v38 = vrot.slane %v6549_v44, %v8714_v32  ;;  %v6566_v57 = vcombine.low %v4462_v34, %v4466_v52  ;;  %v6573_v58 = vrot.slane %v6565_v53, %v8714_v32  ;;  %v1940_v23 = vcombine.high %v1932_v54, %v1932_v54 }
 0x114   : > { %v1948_v33 = vrot.slane %v1932_v54, %v8712_v31  ;;  %v1892_v55 = vcombine.high %v1890_v15, %v1890_v15  ;;  %v1906_v60 = vrot.slane %v1890_v15, %v8712_v31  ;;  %v1939_v14 = vrot.slane %v1925_v30, %v8712_v31 }
 0x115   : > { %v6564_v59 = vcombine.low %v6556_v50, %v6563_v38  ;;  %v6580_v19 = vrot.slane %v6566_v57, %v8714_v32  ;;  %v1962_v61 = vrot.slane %v1940_v23, %v8712_v31  ;;  %v1989_v35 = vcombine.high %v1981_v20, %v1981_v20  ;;  %v9690_v57 = vld [vmem:[%s10739_s0 + $0x128] sm:$0xff] }
 0x116   : > { %v1970_v62 = vcombine.high %v1948_v33, %v1948_v33  ;;  %v4486_v63 = vrot.slane %v1948_v33, %v8689_v24  ;;  %v1920_v47 = vrot.slane %v1892_v55, %v8712_v31  ;;  %v1922_v0 = vcombine.high %v1906_v60, %v1906_v60 }
 0x117   : > { %7813 = vst.msk [vmem:[%s8791_s27 + $0x208] sm:$0xff] %vm7747_vm0, %v6564_v59  ;;  %v4470_v1 = vrot.slane %v1906_v60, %v8689_v24  ;;  %v1941_v2 = vcombine.high %v1939_v14, %v1939_v14  ;;  %v6581_v3 = vcombine.low %v6573_v58, %v6580_v19  ;;  %v1972_v4 = vcombine.high %v1962_v61, %v1962_v61 }
 0x118   : > { %v4490_v5 = vrot.slane %v1962_v61, %v8689_v24  ;;  %v4494_v56 = vrot.slane %v1970_v62, %v8689_v24  ;;  %v1924_v29 = vcombine.high %v1920_v47, %v1920_v47  ;;  %v4474_v37 = vrot.slane %v1920_v47, %v8689_v24 }
 0x119   : > { %v4478_v6 = vrot.slane %v1922_v0, %v8689_v24  ;;  %v1955_v7 = vrot.slane %v1939_v14, %v8712_v31  ;;  %7814 = vst.msk [vmem:[%s8791_s27 + $0x210] sm:$0xff] %vm7747_vm0, %v6581_v3  ;;  %v4498_v45 = vrot.slane %v1972_v4, %v8689_v24  ;;  %v1969_v9 = vrot.slane %v1941_v2, %v8712_v31 }
 0x11a   : > { %v6599_v8 = vcombine.low %v4486_v63, %v4490_v5  ;;  %v4482_v39 = vrot.slane %v1924_v29, %v8689_v24  ;;  %v6582_v16 = vcombine.low %v4470_v1, %v4474_v37  ;;  %v1997_v22 = vrot.slane %v1981_v20, %v8712_v31 }
 0x11b   : > { %v1971_v25 = vcombine.high %v1955_v7, %v1955_v7  ;;  %v4502_v10 = vrot.slane %v1955_v7, %v8689_v24  ;;  %v6600_v11 = vcombine.low %v4494_v56, %v4498_v45  ;;  %v1973_v13 = vcombine.high %v1969_v9, %v1969_v9 }
 0x11c   : > { %v6607_v48 = vrot.slane %v6599_v8, %v8714_v32  ;;  %v4506_v17 = vrot.slane %v1969_v9, %v8689_v24  ;;  %v6583_v18 = vcombine.low %v4478_v6, %v4482_v39  ;;  %v6590_v41 = vrot.slane %v6582_v16, %v8714_v32 }
 0x11d   : > { %v4510_v42 = vrot.slane %v1971_v25, %v8689_v24  ;;  %v6614_v36 = vrot.slane %v6600_v11, %v8714_v32  ;;  %v4514_v40 = vrot.slane %v1973_v13, %v8689_v24  ;;  %v2011_v21 = vrot.slane %v1989_v35, %v8712_v31 }
 0x11e   : > { %v6616_v12 = vcombine.low %v4502_v10, %v4506_v17  ;;  %v6597_v26 = vrot.slane %v6583_v18, %v8714_v32  ;;  %v2019_v46 = vcombine.high %v1997_v22, %v1997_v22  ;;  %v4518_v28 = vrot.slane %v1997_v22, %v8689_v24 }
 0x11f   : > { %v1988_v34 = vrot.slane %v1974_v49, %v8712_v31  ;;  %v6615_v43 = vcombine.low %v6607_v48, %v6614_v36  ;;  %v6617_v27 = vcombine.low %v4510_v42, %v4514_v40  ;;  %v2021_v50 = vcombine.high %v2011_v21, %v2011_v21 }
 0x120   : > { %v6624_v44 = vrot.slane %v6616_v12, %v8714_v32  ;;  %v6598_v52 = vcombine.low %v6590_v41, %v6597_v26  ;;  %v4522_v53 = vrot.slane %v2011_v21, %v8689_v24  ;;  %v4526_v54 = vrot.slane %v2019_v46, %v8689_v24 }
 0x121   : > { %v1990_v30 = vcombine.high %v1988_v34, %v1988_v34  ;;  %7816 = vst.msk [vmem:[%s8791_s27 + $0x220] sm:$0xff] %vm7747_vm0, %v6615_v43  ;;  %v6631_v38 = vrot.slane %v6617_v27, %v8714_v32  ;;  %v4530_v15 = vrot.slane %v2021_v50, %v8689_v24  ;;  %v2004_v20 = vrot.slane %v1988_v34, %v8712_v31  ;;  %v169_v27 = vld [vmem:[%s10739_s0 + $0x130] sm:$0xff] }
 0x122   : > { %v2030_v49 = vrot.slane %v167_v51, %v8712_v31  ;;  %7815 = vst.msk [vmem:[%s8791_s27 + $0x218] sm:$0xff] %vm7747_vm0, %v6598_v52  ;;  %v6633_v58 = vcombine.low %v4518_v28, %v4522_v53  ;;  %v2023_v33 = vcombine.high %v167_v51, %v167_v51  ;;  %v2079_v59 = vrot.slane %v9690_v57, %v8712_v31 }
 0x123   : > { %v2018_v23 = vrot.slane %v1990_v30, %v8712_v31  ;;  %v6632_v55 = vcombine.low %v6624_v44, %v6631_v38  ;;  %v6634_v60 = vcombine.low %v4526_v54, %v4530_v15  ;;  %v2020_v14 = vcombine.high %v2004_v20, %v2004_v20 }
 0x124   : > { %v4534_v19 = vrot.slane %v2004_v20, %v8689_v24  ;;  %v6641_v61 = vrot.slane %v6633_v58, %v8714_v32  ;;  %v2038_v47 = vcombine.high %v2030_v49, %v2030_v49  ;;  %v2046_v2 = vrot.slane %v2030_v49, %v8712_v31 }
 0x125   : > { %v2022_v62 = vcombine.high %v2018_v23, %v2018_v23  ;;  %v4538_v63 = vrot.slane %v2018_v23, %v8689_v24  ;;  %7817 = vst.msk [vmem:[%s8791_s27 + $0x228] sm:$0xff] %vm7747_vm0, %v6632_v55  ;;  %v6648_v0 = vrot.slane %v6634_v60, %v8714_v32  ;;  %v4542_v1 = vrot.slane %v2020_v14, %v8689_v24  ;;  %v9742_v23 = vld [vmem:[%s10739_s0 + $0x138] sm:$0xff] }
 0x126   : > { %v2037_v3 = vrot.slane %v2023_v33, %v8712_v31  ;;  %v2060_v56 = vrot.slane %v2038_v47, %v8712_v31  ;;  %v2087_v29 = vcombine.high %v2079_v59, %v2079_v59  ;;  %v2068_v6 = vcombine.high %v2046_v2, %v2046_v2 }
 0x127   : > { %v4546_v4 = vrot.slane %v2022_v62, %v8689_v24  ;;  %v6650_v5 = vcombine.low %v4534_v19, %v4538_v63  ;;  %v6649_v37 = vcombine.low %v6641_v61, %v6648_v0  ;;  %v4550_v7 = vrot.slane %v2046_v2, %v8689_v24 }
 0x128   : > { %v2039_v45 = vcombine.high %v2037_v3, %v2037_v3  ;;  %v2070_v35 = vcombine.high %v2060_v56, %v2060_v56  ;;  %v4554_v39 = vrot.slane %v2060_v56, %v8689_v24  ;;  %v4558_v16 = vrot.slane %v2068_v6, %v8689_v24 }
 0x129   : > { %v6651_v8 = vcombine.low %v4542_v1, %v4546_v4  ;;  %v6658_v9 = vrot.slane %v6650_v5, %v8714_v32  ;;  %7818 = vst.msk [vmem:[%s8791_s27 + $0x230] sm:$0xff] %vm7747_vm0, %v6649_v37  ;;  %v2053_v25 = vrot.slane %v2037_v3, %v8712_v31  ;;  %v2095_v11 = vrot.slane %v2079_v59, %v8712_v31 }
 0x12a   : > { %v2067_v10 = vrot.slane %v2039_v45, %v8712_v31  ;;  %v4562_v13 = vrot.slane %v2070_v35, %v8689_v24  ;;  %v6667_v17 = vcombine.low %v4550_v7, %v4554_v39  ;;  %v2109_v18 = vrot.slane %v2087_v29, %v8712_v31 }
 0x12b   : > { %v6665_v48 = vrot.slane %v6651_v8, %v8714_v32  ;;  %v2069_v41 = vcombine.high %v2053_v25, %v2053_v25  ;;  %v4566_v22 = vrot.slane %v2053_v25, %v8689_v24  ;;  %v2117_v26 = vcombine.high %v2095_v11, %v2095_v11 }
 0x12c   : > { %v2071_v42 = vcombine.high %v2067_v10, %v2067_v10  ;;  %v4570_v36 = vrot.slane %v2067_v10, %v8689_v24  ;;  %v6668_v12 = vcombine.low %v4558_v16, %v4562_v13  ;;  %v6675_v21 = vrot.slane %v6667_v17, %v8714_v32 }
 0x12d   : > { %v6666_v40 = vcombine.low %v6658_v9, %v6665_v48  ;;  %v4574_v46 = vrot.slane %v2069_v41, %v8689_v24  ;;  %v2119_v43 = vcombine.high %v2109_v18, %v2109_v18  ;;  %v4582_v50 = vrot.slane %v2095_v11, %v8689_v24 }
 0x12e   : > { %v4578_v28 = vrot.slane %v2071_v42, %v8689_v24  ;;  %v6684_v34 = vcombine.low %v4566_v22, %v4570_v36  ;;  %v6682_v44 = vrot.slane %v6668_v12, %v8714_v32  ;;  %v4586_v51 = vrot.slane %v2109_v18, %v8689_v24 }
 0x12f   : > { %7819 = vst.msk [vmem:[%s8791_s27 + $0x238] sm:$0xff] %vm7747_vm0, %v6666_v40  ;;  %v4590_v52 = vrot.slane %v2117_v26, %v8689_v24  ;;  %v4594_v30 = vrot.slane %v2119_v43, %v8689_v24  ;;  %v2072_v38 = vcombine.high %v9690_v57, %v9690_v57  ;;  %v2128_v49 = vrot.slane %v169_v27, %v8712_v31 }
 0x130   : > { %v6685_v53 = vcombine.low %v4574_v46, %v4578_v28  ;;  %v6692_v54 = vrot.slane %v6684_v34, %v8714_v32  ;;  %v6683_v15 = vcombine.low %v6675_v21, %v6682_v44  ;;  %v6701_v20 = vcombine.low %v4582_v50, %v4586_v51  ;;  %v171_v44 = vld [vmem:[%s10739_s0 + $0x140] sm:$0xff] }
 0x131   : > { %v2121_v58 = vcombine.high %v169_v27, %v169_v27  ;;  %v6702_v59 = vcombine.low %v4590_v52, %v4594_v30  ;;  %v2086_v55 = vrot.slane %v2072_v38, %v8712_v31  ;;  %v2177_v60 = vrot.slane %v9742_v23, %v8712_v31 }
 0x132   : > { %v6699_v33 = vrot.slane %v6685_v53, %v8714_v32  ;;  %7820 = vst.msk [vmem:[%s8791_s27 + $0x240] sm:$0xff] %vm7747_vm0, %v6683_v15  ;;  %v6709_v57 = vrot.slane %v6701_v20, %v8714_v32  ;;  %v2136_v14 = vcombine.high %v2128_v49, %v2128_v49  ;;  %v2144_v19 = vrot.slane %v2128_v49, %v8712_v31 }
 0x133   : > { %v2135_v61 = vrot.slane %v2121_v58, %v8712_v31  ;;  %v6716_v63 = vrot.slane %v6702_v59, %v8714_v32  ;;  %v2088_v47 = vcombine.high %v2086_v55, %v2086_v55  ;;  %v2102_v0 = vrot.slane %v2086_v55, %v8712_v31 }
 0x134   : > { %v6700_v62 = vcombine.low %v6692_v54, %v6699_v33  ;;  %v2158_v1 = vrot.slane %v2136_v14, %v8712_v31  ;;  %v2166_v2 = vcombine.high %v2144_v19, %v2144_v19  ;;  %v4614_v3 = vrot.slane %v2144_v19, %v8689_v24 }
 0x135   : > { %v2137_v4 = vcombine.high %v2135_v61, %v2135_v61  ;;  %v6717_v5 = vcombine.low %v6709_v57, %v6716_v63  ;;  %v2116_v56 = vrot.slane %v2088_v47, %v8712_v31  ;;  %v2118_v29 = vcombine.high %v2102_v0, %v2102_v0 }
 0x136   : > { %7821 = vst.msk [vmem:[%s8791_s27 + $0x248] sm:$0xff] %vm7747_vm0, %v6700_v62  ;;  %v4598_v37 = vrot.slane %v2102_v0, %v8689_v24  ;;  %v2168_v6 = vcombine.high %v2158_v1, %v2158_v1  ;;  %v4618_v7 = vrot.slane %v2158_v1, %v8689_v24  ;;  %v4622_v45 = vrot.slane %v2166_v2, %v8689_v24 }
 0x137   : > { %v2151_v8 = vrot.slane %v2135_v61, %v8712_v31  ;;  %7822 = vst.msk [vmem:[%s8791_s27 + $0x250] sm:$0xff] %vm7747_vm0, %v6717_v5  ;;  %v2120_v9 = vcombine.high %v2116_v56, %v2116_v56  ;;  %v4602_v35 = vrot.slane %v2116_v56, %v8689_v24  ;;  %v4606_v39 = vrot.slane %v2118_v29, %v8689_v24 }
 0x138   : > { %v2165_v16 = vrot.slane %v2137_v4, %v8712_v31  ;;  %v4626_v25 = vrot.slane %v2168_v6, %v8689_v24  ;;  %v6735_v10 = vcombine.low %v4614_v3, %v4618_v7  ;;  %v2185_v40 = vcombine.high %v2177_v60, %v2177_v60  ;;  %v172_v6 = vld [vmem:[%s10739_s0 + $0x148] sm:$0xff] }
 0x139   : > { %v2167_v11 = vcombine.high %v2151_v8, %v2151_v8  ;;  %v4630_v48 = vrot.slane %v2151_v8, %v8689_v24  ;;  %v4610_v13 = vrot.slane %v2120_v9, %v8689_v24  ;;  %v6718_v17 = vcombine.low %v4598_v37, %v4602_v35 }
 0x13a   : > { %v2169_v18 = vcombine.high %v2165_v16, %v2165_v16  ;;  %v4634_v41 = vrot.slane %v2165_v16, %v8689_v24  ;;  %v6736_v42 = vcombine.low %v4622_v45, %v4626_v25  ;;  %v6743_v22 = vrot.slane %v6735_v10, %v8714_v32 }
 0x13b   : > { %v4638_v36 = vrot.slane %v2167_v11, %v8689_v24  ;;  %v6719_v12 = vcombine.low %v4606_v39, %v4610_v13  ;;  %v6726_v21 = vrot.slane %v6718_v17, %v8714_v32  ;;  %v2193_v34 = vrot.slane %v2177_v60, %v8712_v31 }
 0x13c   : > { %v4642_v26 = vrot.slane %v2169_v18, %v8689_v24  ;;  %v6752_v46 = vcombine.low %v4630_v48, %v4634_v41  ;;  %v6750_v28 = vrot.slane %v6736_v42, %v8714_v32  ;;  %v2207_v43 = vrot.slane %v2185_v40, %v8712_v31 }
 0x13d   : > { %v2170_v27 = vcombine.high %v9742_v23, %v9742_v23  ;;  %v6733_v50 = vrot.slane %v6719_v12, %v8714_v32  ;;  %v2226_v53 = vrot.slane %v171_v44, %v8712_v31  ;;  %v2215_v30 = vcombine.high %v2193_v34, %v2193_v34 }
 0x13e   : > { %v6753_v51 = vcombine.low %v4638_v36, %v4642_v26  ;;  %v6760_v52 = vrot.slane %v6752_v46, %v8714_v32  ;;  %v6751_v54 = vcombine.low %v6743_v22, %v6750_v28  ;;  %v2217_v38 = vcombine.high %v2207_v43, %v2207_v43 }
 0x13f   : > { %v4646_v15 = vrot.slane %v2193_v34, %v8689_v24  ;;  %v6734_v20 = vcombine.low %v6726_v21, %v6733_v50  ;;  %v4650_v58 = vrot.slane %v2207_v43, %v8689_v24  ;;  %v2184_v23 = vrot.slane %v2170_v27, %v8712_v31 }
 0x140   : > { %v6767_v49 = vrot.slane %v6753_v51, %v8714_v32  ;;  %7824 = vst.msk [vmem:[%s8791_s27 + $0x260] sm:$0xff] %vm7747_vm0, %v6751_v54  ;;  %v4654_v33 = vrot.slane %v2215_v30, %v8689_v24  ;;  %v4658_v59 = vrot.slane %v2217_v38, %v8689_v24  ;;  %v2234_v55 = vcombine.high %v2226_v53, %v2226_v53  ;;  %v173_v54 = vld [vmem:[%s10739_s0 + $0x150] sm:$0xff] }
 0x141   : > { %v2242_v60 = vrot.slane %v2226_v53, %v8712_v31  ;;  %7823 = vst.msk [vmem:[%s8791_s27 + $0x258] sm:$0xff] %vm7747_vm0, %v6734_v20  ;;  %v6769_v14 = vcombine.low %v4646_v15, %v4650_v58  ;;  %v2186_v19 = vcombine.high %v2184_v23, %v2184_v23  ;;  %v2200_v61 = vrot.slane %v2184_v23, %v8712_v31 }
 0x142   : > { %v6768_v57 = vcombine.low %v6760_v52, %v6767_v49  ;;  %v6770_v62 = vcombine.low %v4654_v33, %v4658_v59  ;;  %v2256_v63 = vrot.slane %v2234_v55, %v8712_v31  ;;  %v2219_v9 = vcombine.high %v171_v44, %v171_v44  ;;  %v9846_v59 = vld [vmem:[%s10739_s0 + $0x158] sm:$0xff] }
 0x143   : > { %v2264_v47 = vcombine.high %v2242_v60, %v2242_v60  ;;  %v4678_v0 = vrot.slane %v2242_v60, %v8689_v24  ;;  %v6777_v1 = vrot.slane %v6769_v14, %v8714_v32  ;;  %v2214_v2 = vrot.slane %v2186_v19, %v8712_v31 }
 0x144   : > { %7825 = vst.msk [vmem:[%s8791_s27 + $0x268] sm:$0xff] %vm7747_vm0, %v6768_v57  ;;  %v2216_v3 = vcombine.high %v2200_v61, %v2200_v61  ;;  %v4662_v4 = vrot.slane %v2200_v61, %v8689_v24  ;;  %v6784_v5 = vrot.slane %v6770_v62, %v8714_v32  ;;  %v2266_v56 = vcombine.high %v2256_v63, %v2256_v63 }
 0x145   : > { %v4682_v29 = vrot.slane %v2256_v63, %v8689_v24  ;;  %v4686_v37 = vrot.slane %v2264_v47, %v8689_v24  ;;  %v2218_v7 = vcombine.high %v2214_v2, %v2214_v2  ;;  %v4666_v45 = vrot.slane %v2214_v2, %v8689_v24 }
 0x146   : > { %v4670_v8 = vrot.slane %v2216_v3, %v8689_v24  ;;  %v6785_v35 = vcombine.low %v6777_v1, %v6784_v5  ;;  %v4690_v39 = vrot.slane %v2266_v56, %v8689_v24  ;;  %v2275_v25 = vrot.slane %v172_v6, %v8712_v31 }
 0x147   : > { %v6803_v16 = vcombine.low %v4678_v0, %v4682_v29  ;;  %v4674_v10 = vrot.slane %v2218_v7, %v8689_v24  ;;  %v6786_v11 = vcombine.low %v4662_v4, %v4666_v45  ;;  %v2233_v48 = vrot.slane %v2219_v9, %v8712_v31 }
 0x148   : > { %v2268_v13 = vcombine.high %v172_v6, %v172_v6  ;;  %7826 = vst.msk [vmem:[%s8791_s27 + $0x270] sm:$0xff] %vm7747_vm0, %v6785_v35  ;;  %v6804_v17 = vcombine.low %v4686_v37, %v4690_v39  ;;  %v2283_v41 = vcombine.high %v2275_v25, %v2275_v25  ;;  %v2291_v42 = vrot.slane %v2275_v25, %v8712_v31 }
 0x149   : > { %v6811_v18 = vrot.slane %v6803_v16, %v8714_v32  ;;  %v6787_v22 = vcombine.low %v4670_v8, %v4674_v10  ;;  %v6794_v36 = vrot.slane %v6786_v11, %v8714_v32  ;;  %v2235_v40 = vcombine.high %v2233_v48, %v2233_v48 }
 0x14a   : > { %v2249_v12 = vrot.slane %v2233_v48, %v8712_v31  ;;  %v6818_v21 = vrot.slane %v6804_v17, %v8714_v32  ;;  %v2305_v26 = vrot.slane %v2283_v41, %v8712_v31  ;;  %v2313_v46 = vcombine.high %v2291_v42, %v2291_v42 }
 0x14b   : > { %v4710_v28 = vrot.slane %v2291_v42, %v8689_v24  ;;  %v6801_v34 = vrot.slane %v6787_v22, %v8714_v32  ;;  %v2263_v43 = vrot.slane %v2235_v40, %v8712_v31  ;;  %v2282_v23 = vrot.slane %v2268_v13, %v8712_v31 }
 0x14c   : > { %v2265_v27 = vcombine.high %v2249_v12, %v2249_v12  ;;  %v4694_v44 = vrot.slane %v2249_v12, %v8689_v24  ;;  %v6819_v50 = vcombine.low %v6811_v18, %v6818_v21  ;;  %v2315_v51 = vcombine.high %v2305_v26, %v2305_v26 }
 0x14d   : > { %v4714_v52 = vrot.slane %v2305_v26, %v8689_v24  ;;  %v4718_v53 = vrot.slane %v2313_v46, %v8689_v24  ;;  %v6802_v30 = vcombine.low %v6794_v36, %v6801_v34  ;;  %v2267_v38 = vcombine.high %v2263_v43, %v2263_v43 }
 0x14e   : > { %v4698_v15 = vrot.slane %v2263_v43, %v8689_v24  ;;  %v4702_v20 = vrot.slane %v2265_v27, %v8689_v24  ;;  %7828 = vst.msk [vmem:[%s8791_s27 + $0x280] sm:$0xff] %vm7747_vm0, %v6819_v50  ;;  %v4722_v49 = vrot.slane %v2315_v51, %v8689_v24  ;;  %v2324_v33 = vrot.slane %v173_v54, %v8712_v31 }
 0x14f   : > { %v6837_v58 = vcombine.low %v4710_v28, %v4714_v52  ;;  %7827 = vst.msk [vmem:[%s8791_s27 + $0x278] sm:$0xff] %vm7747_vm0, %v6802_v30  ;;  %v4706_v55 = vrot.slane %v2267_v38, %v8689_v24  ;;  %v2317_v57 = vcombine.high %v173_v54, %v173_v54  ;;  %v2373_v14 = vrot.slane %v9846_v59, %v8712_v31 }
 0x150   : > { %v6820_v60 = vcombine.low %v4694_v44, %v4698_v15  ;;  %v6838_v19 = vcombine.low %v4718_v53, %v4722_v49  ;;  %v2284_v62 = vcombine.high %v2282_v23, %v2282_v23  ;;  %v2298_v63 = vrot.slane %v2282_v23, %v8712_v31  ;;  %v175_v49 = vld [vmem:[%s10739_s0 + $0x160] sm:$0xff] }
 0x151   : > { %v6845_v61 = vrot.slane %v6837_v58, %v8714_v32  ;;  %v6821_v47 = vcombine.low %v4702_v20, %v4706_v55  ;;  %v2332_v1 = vcombine.high %v2324_v33, %v2324_v33  ;;  %v2340_v2 = vrot.slane %v2324_v33, %v8712_v31 }
 0x152   : > { %v6828_v0 = vrot.slane %v6820_v60, %v8714_v32  ;;  %v6852_v3 = vrot.slane %v6838_v19, %v8714_v32  ;;  %v2312_v4 = vrot.slane %v2284_v62, %v8712_v31  ;;  %v2314_v5 = vcombine.high %v2298_v63, %v2298_v63  ;;  %v9902_v19 = vld [vmem:[%s10739_s0 + $0x168] sm:$0xff] }
 0x153   : > { %v4726_v56 = vrot.slane %v2298_v63, %v8689_v24  ;;  %v6835_v29 = vrot.slane %v6821_v47, %v8714_v32  ;;  %v2354_v37 = vrot.slane %v2332_v1, %v8712_v31  ;;  %v2362_v6 = vcombine.high %v2340_v2, %v2340_v2 }
 0x154   : > { %v4742_v7 = vrot.slane %v2340_v2, %v8689_v24  ;;  %v6853_v45 = vcombine.low %v6845_v61, %v6852_v3  ;;  %v2316_v8 = vcombine.high %v2312_v4, %v2312_v4  ;;  %v4730_v9 = vrot.slane %v2312_v4, %v8689_v24 }
 0x155   : > { %v4734_v35 = vrot.slane %v2314_v5, %v8689_v24  ;;  %v6836_v39 = vcombine.low %v6828_v0, %v6835_v29  ;;  %v2364_v16 = vcombine.high %v2354_v37, %v2354_v37  ;;  %v4746_v25 = vrot.slane %v2354_v37, %v8689_v24 }
 0x156   : > { %v4750_v10 = vrot.slane %v2362_v6, %v8689_v24  ;;  %7830 = vst.msk [vmem:[%s8791_s27 + $0x290] sm:$0xff] %vm7747_vm0, %v6853_v45  ;;  %v4738_v11 = vrot.slane %v2316_v8, %v8689_v24  ;;  %v6854_v48 = vcombine.low %v4726_v56, %v4730_v9  ;;  %v2331_v13 = vrot.slane %v2317_v57, %v8712_v31 }
 0x157   : > { %v2381_v17 = vcombine.high %v2373_v14, %v2373_v14  ;;  %7829 = vst.msk [vmem:[%s8791_s27 + $0x288] sm:$0xff] %vm7747_vm0, %v6836_v39  ;;  %v4754_v18 = vrot.slane %v2364_v16, %v8689_v24  ;;  %v6871_v41 = vcombine.low %v4742_v7, %v4746_v25  ;;  %v2389_v42 = vrot.slane %v2373_v14, %v8712_v31 }
 0x158   : > { %v2366_v22 = vcombine.high %v9846_v59, %v9846_v59  ;;  %v6855_v36 = vcombine.low %v4734_v35, %v4738_v11  ;;  %v6862_v40 = vrot.slane %v6854_v48, %v8714_v32  ;;  %v2333_v12 = vcombine.high %v2331_v13, %v2331_v13 }
 0x159   : > { %v2347_v21 = vrot.slane %v2331_v13, %v8712_v31  ;;  %v6872_v26 = vcombine.low %v4750_v10, %v4754_v18  ;;  %v6879_v46 = vrot.slane %v6871_v41, %v8714_v32  ;;  %v2403_v28 = vrot.slane %v2381_v17, %v8712_v31 }
 0x15a   : > { %v2411_v34 = vcombine.high %v2389_v42, %v2389_v42  ;;  %v6869_v43 = vrot.slane %v6855_v36, %v8714_v32  ;;  %v2361_v27 = vrot.slane %v2333_v12, %v8712_v31  ;;  %v4774_v53 = vrot.slane %v2389_v42, %v8689_v24 }
 0x15b   : > { %v2363_v44 = vcombine.high %v2347_v21, %v2347_v21  ;;  %v4758_v50 = vrot.slane %v2347_v21, %v8689_v24  ;;  %v6886_v51 = vrot.slane %v6872_v26, %v8714_v32  ;;  %v2413_v52 = vcombine.high %v2403_v28, %v2403_v28 }
 0x15c   : > { %v4778_v54 = vrot.slane %v2403_v28, %v8689_v24  ;;  %v6870_v30 = vcombine.low %v6862_v40, %v6869_v43  ;;  %v2365_v38 = vcombine.high %v2361_v27, %v2361_v27  ;;  %v4762_v15 = vrot.slane %v2361_v27, %v8689_v24 }
 0x15d   : > { %v4766_v20 = vrot.slane %v2363_v44, %v8689_v24  ;;  %v6887_v58 = vcombine.low %v6879_v46, %v6886_v51  ;;  %v4782_v23 = vrot.slane %v2411_v34, %v8689_v24  ;;  %v4786_v33 = vrot.slane %v2413_v52, %v8689_v24 }
 0x15e   : > { %v6905_v59 = vcombine.low %v4774_v53, %v4778_v54  ;;  %7831 = vst.msk [vmem:[%s8791_s27 + $0x298] sm:$0xff] %vm7747_vm0, %v6870_v30  ;;  %v4770_v55 = vrot.slane %v2365_v38, %v8689_v24  ;;  %v6888_v60 = vcombine.low %v4758_v50, %v4762_v15  ;;  %v2380_v57 = vrot.slane %v2366_v22, %v8712_v31 }
 0x15f   : > { %v2422_v14 = vrot.slane %v175_v49, %v8712_v31  ;;  %7832 = vst.msk [vmem:[%s8791_s27 + $0x2a0] sm:$0xff] %vm7747_vm0, %v6887_v58  ;;  %v6906_v61 = vcombine.low %v4782_v23, %v4786_v33  ;;  %v2415_v63 = vcombine.high %v175_v49, %v175_v49  ;;  %v2471_v47 = vrot.slane %v9902_v19, %v8712_v31  ;;  %v177_v58 = vld [vmem:[%s10739_s0 + $0x170] sm:$0xff] }
 0x160   : > { %v6913_v62 = vrot.slane %v6905_v59, %v8714_v32  ;;  %v6889_v0 = vcombine.low %v4766_v20, %v4770_v55  ;;  %v6896_v1 = vrot.slane %v6888_v60, %v8714_v32  ;;  %v2382_v2 = vcombine.high %v2380_v57, %v2380_v57  ;;  %v9950_v60 = vld [vmem:[%s10739_s0 + $0x178] sm:$0xff] }
 0x161   : > { %v2396_v3 = vrot.slane %v2380_v57, %v8712_v31  ;;  %v6920_v4 = vrot.slane %v6906_v61, %v8714_v32  ;;  %v2430_v5 = vcombine.high %v2422_v14, %v2422_v14  ;;  %v2438_v56 = vrot.slane %v2422_v14, %v8712_v31 }
 0x162   : > { %v2429_v29 = vrot.slane %v2415_v63, %v8712_v31  ;;  %v6903_v37 = vrot.slane %v6889_v0, %v8714_v32  ;;  %v2410_v6 = vrot.slane %v2382_v2, %v8712_v31  ;;  %v2479_v36 = vcombine.high %v2471_v47, %v2471_v47 }
 0x163   : > { %v2412_v7 = vcombine.high %v2396_v3, %v2396_v3  ;;  %v4790_v45 = vrot.slane %v2396_v3, %v8689_v24  ;;  %v6921_v8 = vcombine.low %v6913_v62, %v6920_v4  ;;  %v2452_v9 = vrot.slane %v2430_v5, %v8712_v31 }
 0x164   : > { %v2460_v35 = vcombine.high %v2438_v56, %v2438_v56  ;;  %v4806_v39 = vrot.slane %v2438_v56, %v8689_v24  ;;  %v6904_v16 = vcombine.low %v6896_v1, %v6903_v37  ;;  %v2414_v25 = vcombine.high %v2410_v6, %v2410_v6 }
 0x165   : > { %v4794_v10 = vrot.slane %v2410_v6, %v8689_v24  ;;  %v4798_v11 = vrot.slane %v2412_v7, %v8689_v24  ;;  %7834 = vst.msk [vmem:[%s8791_s27 + $0x2b0] sm:$0xff] %vm7747_vm0, %v6921_v8  ;;  %v2462_v48 = vcombine.high %v2452_v9, %v2452_v9  ;;  %v4810_v13 = vrot.slane %v2452_v9, %v8689_v24 }
 0x166   : > { %v4814_v17 = vrot.slane %v2460_v35, %v8689_v24  ;;  %v2431_v18 = vcombine.high %v2429_v29, %v2429_v29  ;;  %7833 = vst.msk [vmem:[%s8791_s27 + $0x2a8] sm:$0xff] %vm7747_vm0, %v6904_v16  ;;  %v4802_v41 = vrot.slane %v2414_v25, %v8689_v24  ;;  %v2445_v22 = vrot.slane %v2429_v29, %v8712_v31 }
 0x167   : > { %v6922_v42 = vcombine.low %v4790_v45, %v4794_v10  ;;  %v4818_v40 = vrot.slane %v2462_v48, %v8689_v24  ;;  %v6939_v12 = vcombine.low %v4806_v39, %v4810_v13  ;;  %v2487_v26 = vrot.slane %v2471_v47, %v8712_v31 }
 0x168   : > { %v2459_v21 = vrot.slane %v2431_v18, %v8712_v31  ;;  %v6923_v46 = vcombine.low %v4798_v11, %v4802_v41  ;;  %v2461_v34 = vcombine.high %v2445_v22, %v2445_v22  ;;  %v4822_v43 = vrot.slane %v2445_v22, %v8689_v24 }
 0x169   : > { %v6930_v28 = vrot.slane %v6922_v42, %v8714_v32  ;;  %v6940_v27 = vcombine.low %v4814_v17, %v4818_v40  ;;  %v6947_v44 = vrot.slane %v6939_v12, %v8714_v32  ;;  %v2501_v54 = vrot.slane %v2479_v36, %v8712_v31 }
 0x16a   : > { %v2463_v50 = vcombine.high %v2459_v21, %v2459_v21  ;;  %v4826_v51 = vrot.slane %v2459_v21, %v8689_v24  ;;  %v6937_v52 = vrot.slane %v6923_v46, %v8714_v32  ;;  %v4830_v53 = vrot.slane %v2461_v34, %v8689_v24 }
 0x16b   : > { %v2509_v30 = vcombine.high %v2487_v26, %v2487_v26  ;;  %v6954_v38 = vrot.slane %v6940_v27, %v8714_v32  ;;  %v4838_v49 = vrot.slane %v2487_v26, %v8689_v24  ;;  %v2511_v33 = vcombine.high %v2501_v54, %v2501_v54 }
 0x16c   : > { %v4834_v15 = vrot.slane %v2463_v50, %v8689_v24  ;;  %v6956_v20 = vcombine.low %v4822_v43, %v4826_v51  ;;  %v6938_v23 = vcombine.low %v6930_v28, %v6937_v52  ;;  %v4842_v59 = vrot.slane %v2501_v54, %v8689_v24 }
 0x16d   : > { %v4846_v55 = vrot.slane %v2509_v30, %v8689_v24  ;;  %v6955_v57 = vcombine.low %v6947_v44, %v6954_v38  ;;  %v2464_v62 = vcombine.high %v9902_v19, %v9902_v19  ;;  %v4850_v63 = vrot.slane %v2511_v33, %v8689_v24 }
 0x16e   : > { %v6957_v14 = vcombine.low %v4830_v53, %v4834_v15  ;;  %v6964_v61 = vrot.slane %v6956_v20, %v8714_v32  ;;  %7835 = vst.msk [vmem:[%s8791_s27 + $0x2b8] sm:$0xff] %vm7747_vm0, %v6938_v23  ;;  %v6973_v47 = vcombine.low %v4838_v49, %v4842_v59  ;;  %v2520_v0 = vrot.slane %v177_v58, %v8712_v31 }
 0x16f   : > { %v2513_v1 = vcombine.high %v177_v58, %v177_v58  ;;  %7836 = vst.msk [vmem:[%s8791_s27 + $0x2c0] sm:$0xff] %vm7747_vm0, %v6955_v57  ;;  %v2478_v3 = vrot.slane %v2464_v62, %v8712_v31  ;;  %v2569_v4 = vrot.slane %v9950_v60, %v8712_v31  ;;  %v2562_v19 = vcombine.high %v9950_v60, %v9950_v60  ;;  %v179_v62 = vld [vmem:[%s10739_s0 + $0x180] sm:$0xff] }
 0x170   : > { %v6971_v2 = vrot.slane %v6957_v14, %v8714_v32  ;;  %v6974_v5 = vcombine.low %v4846_v55, %v4850_v63  ;;  %v6981_v56 = vrot.slane %v6973_v47, %v8714_v32  ;;  %v2528_v29 = vcombine.high %v2520_v0, %v2520_v0 }
 0x171   : > { %v2536_v37 = vrot.slane %v2520_v0, %v8712_v31  ;;  %v2480_v7 = vcombine.high %v2478_v3, %v2478_v3  ;;  %v2494_v45 = vrot.slane %v2478_v3, %v8712_v31  ;;  %v2527_v8 = vrot.slane %v2513_v1, %v8712_v31 }
 0x172   : > { %v6972_v6 = vcombine.low %v6964_v61, %v6971_v2  ;;  %v6988_v9 = vrot.slane %v6974_v5, %v8714_v32  ;;  %v2550_v35 = vrot.slane %v2528_v29, %v8712_v31  ;;  %v2577_v46 = vcombine.high %v2569_v4, %v2569_v4  ;;  %v10015_v5 = vld [vmem:[%s10739_s0 + $0x188] sm:$0xff] }
 0x173   : > { %v2558_v39 = vcombine.high %v2536_v37, %v2536_v37  ;;  %v4870_v16 = vrot.slane %v2536_v37, %v8689_v24  ;;  %v2508_v25 = vrot.slane %v2480_v7, %v8712_v31  ;;  %v2510_v10 = vcombine.high %v2494_v45, %v2494_v45 }
 0x174   : > { %7837 = vst.msk [vmem:[%s8791_s27 + $0x2c8] sm:$0xff] %vm7747_vm0, %v6972_v6  ;;  %v4854_v11 = vrot.slane %v2494_v45, %v8689_v24  ;;  %v2529_v48 = vcombine.high %v2527_v8, %v2527_v8  ;;  %v6989_v13 = vcombine.low %v6981_v56, %v6988_v9  ;;  %v2560_v17 = vcombine.high %v2550_v35, %v2550_v35 }
 0x175   : > { %v4874_v18 = vrot.slane %v2550_v35, %v8689_v24  ;;  %v4878_v41 = vrot.slane %v2558_v39, %v8689_v24  ;;  %v2512_v42 = vcombine.high %v2508_v25, %v2508_v25  ;;  %v4858_v22 = vrot.slane %v2508_v25, %v8689_v24 }
 0x176   : > { %v4862_v36 = vrot.slane %v2510_v10, %v8689_v24  ;;  %v2543_v40 = vrot.slane %v2527_v8, %v8712_v31  ;;  %7838 = vst.msk [vmem:[%s8791_s27 + $0x2d0] sm:$0xff] %vm7747_vm0, %v6989_v13  ;;  %v4882_v12 = vrot.slane %v2560_v17, %v8689_v24  ;;  %v2557_v26 = vrot.slane %v2529_v48, %v8712_v31 }
 0x177   : > { %v7007_v21 = vcombine.low %v4870_v16, %v4874_v18  ;;  %v4866_v28 = vrot.slane %v2512_v42, %v8689_v24  ;;  %v6990_v34 = vcombine.low %v4854_v11, %v4858_v22  ;;  %v2585_v38 = vrot.slane %v2569_v4, %v8712_v31 }
 0x178   : > { %v2559_v43 = vcombine.high %v2543_v40, %v2543_v40  ;;  %v4886_v27 = vrot.slane %v2543_v40, %v8689_v24  ;;  %v7008_v44 = vcombine.low %v4878_v41, %v4882_v12  ;;  %v2561_v51 = vcombine.high %v2557_v26, %v2557_v26 }
 0x179   : > { %v7015_v50 = vrot.slane %v7007_v21, %v8714_v32  ;;  %v4890_v52 = vrot.slane %v2557_v26, %v8689_v24  ;;  %v6991_v53 = vcombine.low %v4862_v36, %v4866_v28  ;;  %v6998_v54 = vrot.slane %v6990_v34, %v8714_v32 }
 0x17a   : > { %v4894_v30 = vrot.slane %v2559_v43, %v8689_v24  ;;  %v7022_v15 = vrot.slane %v7008_v44, %v8714_v32  ;;  %v4898_v20 = vrot.slane %v2561_v51, %v8689_v24  ;;  %v2599_v58 = vrot.slane %v2577_v46, %v8712_v31 }
 0x17b   : > { %v7024_v49 = vcombine.low %v4886_v27, %v4890_v52  ;;  %v7005_v23 = vrot.slane %v6991_v53, %v8714_v32  ;;  %v2607_v33 = vcombine.high %v2585_v38, %v2585_v38  ;;  %v4902_v59 = vrot.slane %v2585_v38, %v8689_v24 }
 0x17c   : > { %v2576_v55 = vrot.slane %v2562_v19, %v8712_v31  ;;  %v7023_v60 = vcombine.low %v7015_v50, %v7022_v15  ;;  %v7025_v57 = vcombine.low %v4894_v30, %v4898_v20  ;;  %v2609_v61 = vcombine.high %v2599_v58, %v2599_v58 }
 0x17d   : > { %v7032_v14 = vrot.slane %v7024_v49, %v8714_v32  ;;  %v7006_v63 = vcombine.low %v6998_v54, %v7005_v23  ;;  %v4906_v47 = vrot.slane %v2599_v58, %v8689_v24  ;;  %v4910_v0 = vrot.slane %v2607_v33, %v8689_v24 }
 0x17e   : > { %v2578_v1 = vcombine.high %v2576_v55, %v2576_v55  ;;  %7840 = vst.msk [vmem:[%s8791_s27 + $0x2e0] sm:$0xff] %vm7747_vm0, %v7023_v60  ;;  %v7039_v2 = vrot.slane %v7025_v57, %v8714_v32  ;;  %v4914_v3 = vrot.slane %v2609_v61, %v8689_v24  ;;  %v2592_v4 = vrot.slane %v2576_v55, %v8712_v31  ;;  %v181_v57 = vld [vmem:[%s10739_s0 + $0x190] sm:$0xff] }
 0x17f   : > { %v2618_v19 = vrot.slane %v179_v62, %v8712_v31  ;;  %7839 = vst.msk [vmem:[%s8791_s27 + $0x2d8] sm:$0xff] %vm7747_vm0, %v7006_v63  ;;  %v7041_v56 = vcombine.low %v4902_v59, %v4906_v47  ;;  %v2611_v37 = vcombine.high %v179_v62, %v179_v62  ;;  %v2667_v6 = vrot.slane %v10015_v5, %v8712_v31 }
 0x180   : > { %v2606_v29 = vrot.slane %v2578_v1, %v8712_v31  ;;  %v7040_v7 = vcombine.low %v7032_v14, %v7039_v2  ;;  %v7042_v45 = vcombine.low %v4910_v0, %v4914_v3  ;;  %v2608_v8 = vcombine.high %v2592_v4, %v2592_v4 }
 0x181   : > { %v4918_v9 = vrot.slane %v2592_v4, %v8689_v24  ;;  %v7049_v35 = vrot.slane %v7041_v56, %v8714_v32  ;;  %v2626_v25 = vcombine.high %v2618_v19, %v2618_v19  ;;  %v2634_v48 = vrot.slane %v2618_v19, %v8712_v31 }
 0x182   : > { %v2610_v39 = vcombine.high %v2606_v29, %v2606_v29  ;;  %v4922_v16 = vrot.slane %v2606_v29, %v8689_v24  ;;  %7841 = vst.msk [vmem:[%s8791_s27 + $0x2e8] sm:$0xff] %vm7747_vm0, %v7040_v7  ;;  %v7056_v10 = vrot.slane %v7042_v45, %v8714_v32  ;;  %v4926_v11 = vrot.slane %v2608_v8, %v8689_v24  ;;  %v10067_v29 = vld [vmem:[%s10739_s0 + $0x198] sm:$0xff] }
 0x183   : > { %v2625_v13 = vrot.slane %v2611_v37, %v8712_v31  ;;  %v2648_v41 = vrot.slane %v2626_v25, %v8712_v31  ;;  %v2675_v42 = vcombine.high %v2667_v6, %v2667_v6  ;;  %v2656_v36 = vcombine.high %v2634_v48, %v2634_v48 }
 0x184   : > { %v4930_v17 = vrot.slane %v2610_v39, %v8689_v24  ;;  %v7058_v18 = vcombine.low %v4918_v9, %v4922_v16  ;;  %v7057_v22 = vcombine.low %v7049_v35, %v7056_v10  ;;  %v4934_v40 = vrot.slane %v2634_v48, %v8689_v24 }
 0x185   : > { %v2627_v12 = vcombine.high %v2625_v13, %v2625_v13  ;;  %v2658_v46 = vcombine.high %v2648_v41, %v2648_v41  ;;  %v4938_v28 = vrot.slane %v2648_v41, %v8689_v24  ;;  %v4942_v34 = vrot.slane %v2656_v36, %v8689_v24 }
 0x186   : > { %v7059_v21 = vcombine.low %v4926_v11, %v4930_v17  ;;  %v7066_v26 = vrot.slane %v7058_v18, %v8714_v32  ;;  %7842 = vst.msk [vmem:[%s8791_s27 + $0x2f0] sm:$0xff] %vm7747_vm0, %v7057_v22  ;;  %v2641_v43 = vrot.slane %v2625_v13, %v8712_v31  ;;  %v2683_v44 = vrot.slane %v2667_v6, %v8712_v31 }
 0x187   : > { %v2655_v27 = vrot.slane %v2627_v12, %v8712_v31  ;;  %v4946_v51 = vrot.slane %v2658_v46, %v8689_v24  ;;  %v7075_v52 = vcombine.low %v4934_v40, %v4938_v28  ;;  %v2697_v53 = vrot.slane %v2675_v42, %v8712_v31 }
 0x188   : > { %v7073_v50 = vrot.slane %v7059_v21, %v8714_v32  ;;  %v2657_v54 = vcombine.high %v2641_v43, %v2641_v43  ;;  %v4950_v38 = vrot.slane %v2641_v43, %v8689_v24  ;;  %v2705_v23 = vcombine.high %v2683_v44, %v2683_v44 }
 0x189   : > { %v2659_v30 = vcombine.high %v2655_v27, %v2655_v27  ;;  %v4954_v15 = vrot.slane %v2655_v27, %v8689_v24  ;;  %v7076_v49 = vcombine.low %v4942_v34, %v4946_v51  ;;  %v7083_v58 = vrot.slane %v7075_v52, %v8714_v32 }
 0x18a   : > { %v7074_v20 = vcombine.low %v7066_v26, %v7073_v50  ;;  %v4958_v33 = vrot.slane %v2657_v54, %v8689_v24  ;;  %v2707_v60 = vcombine.high %v2697_v53, %v2697_v53  ;;  %v4966_v61 = vrot.slane %v2683_v44, %v8689_v24 }
 0x18b   : > { %v4962_v59 = vrot.slane %v2659_v30, %v8689_v24  ;;  %v7092_v55 = vcombine.low %v4950_v38, %v4954_v15  ;;  %v7090_v14 = vrot.slane %v7076_v49, %v8714_v32  ;;  %v4970_v62 = vrot.slane %v2697_v53, %v8689_v24 }
 0x18c   : > { %7843 = vst.msk [vmem:[%s8791_s27 + $0x2f8] sm:$0xff] %vm7747_vm0, %v7074_v20  ;;  %v4974_v63 = vrot.slane %v2705_v23, %v8689_v24  ;;  %v4978_v1 = vrot.slane %v2707_v60, %v8689_v24  ;;  %v2660_v2 = vcombine.high %v10015_v5, %v10015_v5  ;;  %v2716_v19 = vrot.slane %v181_v57, %v8712_v31 }
 0x18d   : > { %v7093_v47 = vcombine.low %v4958_v33, %v4962_v59  ;;  %v7100_v0 = vrot.slane %v7092_v55, %v8714_v32  ;;  %v7091_v3 = vcombine.low %v7083_v58, %v7090_v14  ;;  %v7109_v4 = vcombine.low %v4966_v61, %v4970_v62  ;;  %v183_v14 = vld [vmem:[%s10739_s0 + $0x1a0] sm:$0xff] }
 0x18e   : > { %v2709_v56 = vcombine.high %v181_v57, %v181_v57  ;;  %v7110_v6 = vcombine.low %v4974_v63, %v4978_v1  ;;  %v2674_v7 = vrot.slane %v2660_v2, %v8712_v31  ;;  %v2765_v45 = vrot.slane %v10067_v29, %v8712_v31 }
 0x18f   : > { %v7107_v37 = vrot.slane %v7093_v47, %v8714_v32  ;;  %7844 = vst.msk [vmem:[%s8791_s27 + $0x300] sm:$0xff] %vm7747_vm0, %v7091_v3  ;;  %v7117_v5 = vrot.slane %v7109_v4, %v8714_v32  ;;  %v2724_v8 = vcombine.high %v2716_v19, %v2716_v19  ;;  %v2732_v9 = vrot.slane %v2716_v19, %v8712_v31 }
 0x190   : > { %v2723_v35 = vrot.slane %v2709_v56, %v8712_v31  ;;  %v7124_v16 = vrot.slane %v7110_v6, %v8714_v32  ;;  %v2676_v25 = vcombine.high %v2674_v7, %v2674_v7  ;;  %v2690_v10 = vrot.slane %v2674_v7, %v8712_v31 }
 0x191   : > { %v7108_v39 = vcombine.low %v7100_v0, %v7107_v37  ;;  %v2746_v11 = vrot.slane %v2724_v8, %v8712_v31  ;;  %v2754_v48 = vcombine.high %v2732_v9, %v2732_v9  ;;  %v4998_v13 = vrot.slane %v2732_v9, %v8689_v24 }
 0x192   : > { %v2725_v17 = vcombine.high %v2723_v35, %v2723_v35  ;;  %v7125_v18 = vcombine.low %v7117_v5, %v7124_v16  ;;  %v2704_v41 = vrot.slane %v2676_v25, %v8712_v31  ;;  %v2706_v42 = vcombine.high %v2690_v10, %v2690_v10 }
 0x193   : > { %7845 = vst.msk [vmem:[%s8791_s27 + $0x308] sm:$0xff] %vm7747_vm0, %v7108_v39  ;;  %v4982_v22 = vrot.slane %v2690_v10, %v8689_v24  ;;  %v2756_v36 = vcombine.high %v2746_v11, %v2746_v11  ;;  %v5002_v40 = vrot.slane %v2746_v11, %v8689_v24  ;;  %v5006_v12 = vrot.slane %v2754_v48, %v8689_v24 }
 0x194   : > { %v2739_v21 = vrot.slane %v2723_v35, %v8712_v31  ;;  %7846 = vst.msk [vmem:[%s8791_s27 + $0x310] sm:$0xff] %vm7747_vm0, %v7125_v18  ;;  %v2708_v26 = vcombine.high %v2704_v41, %v2704_v41  ;;  %v4986_v46 = vrot.slane %v2704_v41, %v8689_v24  ;;  %v4990_v28 = vrot.slane %v2706_v42, %v8689_v24 }
 0x195   : > { %v2753_v34 = vrot.slane %v2725_v17, %v8712_v31  ;;  %v5010_v43 = vrot.slane %v2756_v36, %v8689_v24  ;;  %v7143_v27 = vcombine.low %v4998_v13, %v5002_v40  ;;  %v2773_v20 = vcombine.high %v2765_v45, %v2765_v45  ;;  %v184_v36 = vld [vmem:[%s10739_s0 + $0x1a8] sm:$0xff] }
 0x196   : > { %v2755_v44 = vcombine.high %v2739_v21, %v2739_v21  ;;  %v5014_v50 = vrot.slane %v2739_v21, %v8689_v24  ;;  %v4994_v51 = vrot.slane %v2708_v26, %v8689_v24  ;;  %v7126_v52 = vcombine.low %v4982_v22, %v4986_v46 }
 0x197   : > { %v2757_v53 = vcombine.high %v2753_v34, %v2753_v34  ;;  %v5018_v54 = vrot.slane %v2753_v34, %v8689_v24  ;;  %v7144_v30 = vcombine.low %v5006_v12, %v5010_v43  ;;  %v7151_v38 = vrot.slane %v7143_v27, %v8714_v32 }
 0x198   : > { %v5022_v15 = vrot.slane %v2755_v44, %v8689_v24  ;;  %v7127_v49 = vcombine.low %v4990_v28, %v4994_v51  ;;  %v7134_v58 = vrot.slane %v7126_v52, %v8714_v32  ;;  %v2781_v55 = vrot.slane %v2765_v45, %v8712_v31 }
 0x199   : > { %v5026_v23 = vrot.slane %v2757_v53, %v8689_v24  ;;  %v7160_v33 = vcombine.low %v5014_v50, %v5018_v54  ;;  %v7158_v59 = vrot.slane %v7144_v30, %v8714_v32  ;;  %v2795_v60 = vrot.slane %v2773_v20, %v8712_v31 }
 0x19a   : > { %v2758_v57 = vcombine.high %v10067_v29, %v10067_v29  ;;  %v7141_v61 = vrot.slane %v7127_v49, %v8714_v32  ;;  %v2814_v47 = vrot.slane %v183_v14, %v8712_v31  ;;  %v2803_v1 = vcombine.high %v2781_v55, %v2781_v55 }
 0x19b   : > { %v7161_v62 = vcombine.low %v5022_v15, %v5026_v23  ;;  %v7168_v63 = vrot.slane %v7160_v33, %v8714_v32  ;;  %v7159_v0 = vcombine.low %v7151_v38, %v7158_v59  ;;  %v2805_v2 = vcombine.high %v2795_v60, %v2795_v60 }
 0x19c   : > { %v5030_v3 = vrot.slane %v2781_v55, %v8689_v24  ;;  %v7142_v4 = vcombine.low %v7134_v58, %v7141_v61  ;;  %v5034_v56 = vrot.slane %v2795_v60, %v8689_v24  ;;  %v2772_v29 = vrot.slane %v2758_v57, %v8712_v31 }
 0x19d   : > { %v7175_v19 = vrot.slane %v7161_v62, %v8714_v32  ;;  %7848 = vst.msk [vmem:[%s8791_s27 + $0x320] sm:$0xff] %vm7747_vm0, %v7159_v0  ;;  %v5038_v37 = vrot.slane %v2803_v1, %v8689_v24  ;;  %v5042_v6 = vrot.slane %v2805_v2, %v8689_v24  ;;  %v2822_v7 = vcombine.high %v2814_v47, %v2814_v47  ;;  %v185_v0 = vld [vmem:[%s10739_s0 + $0x1b0] sm:$0xff] }
 0x19e   : > { %v2830_v45 = vrot.slane %v2814_v47, %v8712_v31  ;;  %7847 = vst.msk [vmem:[%s8791_s27 + $0x318] sm:$0xff] %vm7747_vm0, %v7142_v4  ;;  %v7177_v8 = vcombine.low %v5030_v3, %v5034_v56  ;;  %v2774_v9 = vcombine.high %v2772_v29, %v2772_v29  ;;  %v2788_v35 = vrot.slane %v2772_v29, %v8712_v31 }
 0x19f   : > { %v7176_v5 = vcombine.low %v7168_v63, %v7175_v19  ;;  %v7178_v39 = vcombine.low %v5038_v37, %v5042_v6  ;;  %v2844_v16 = vrot.slane %v2822_v7, %v8712_v31  ;;  %v2807_v26 = vcombine.high %v183_v14, %v183_v14  ;;  %v10171_v6 = vld [vmem:[%s10739_s0 + $0x1b8] sm:$0xff] }
 0x1a0   : > { %v2852_v25 = vcombine.high %v2830_v45, %v2830_v45  ;;  %v5062_v10 = vrot.slane %v2830_v45, %v8689_v24  ;;  %v7185_v11 = vrot.slane %v7177_v8, %v8714_v32  ;;  %v2802_v48 = vrot.slane %v2774_v9, %v8712_v31 }
 0x1a1   : > { %7849 = vst.msk [vmem:[%s8791_s27 + $0x328] sm:$0xff] %vm7747_vm0, %v7176_v5  ;;  %v2804_v13 = vcombine.high %v2788_v35, %v2788_v35  ;;  %v5046_v17 = vrot.slane %v2788_v35, %v8689_v24  ;;  %v7192_v18 = vrot.slane %v7178_v39, %v8714_v32  ;;  %v2854_v41 = vcombine.high %v2844_v16, %v2844_v16 }
 0x1a2   : > { %v5066_v42 = vrot.slane %v2844_v16, %v8689_v24  ;;  %v5070_v22 = vrot.slane %v2852_v25, %v8689_v24  ;;  %v2806_v40 = vcombine.high %v2802_v48, %v2802_v48  ;;  %v5050_v12 = vrot.slane %v2802_v48, %v8689_v24 }
 0x1a3   : > { %v5054_v21 = vrot.slane %v2804_v13, %v8689_v24  ;;  %v7193_v46 = vcombine.low %v7185_v11, %v7192_v18  ;;  %v5074_v28 = vrot.slane %v2854_v41, %v8689_v24  ;;  %v2863_v43 = vrot.slane %v184_v36, %v8712_v31 }
 0x1a4   : > { %v7211_v34 = vcombine.low %v5062_v10, %v5066_v42  ;;  %v5058_v27 = vrot.slane %v2806_v40, %v8689_v24  ;;  %v7194_v44 = vcombine.low %v5046_v17, %v5050_v12  ;;  %v2821_v50 = vrot.slane %v2807_v26, %v8712_v31 }
 0x1a5   : > { %v2856_v51 = vcombine.high %v184_v36, %v184_v36  ;;  %7850 = vst.msk [vmem:[%s8791_s27 + $0x330] sm:$0xff] %vm7747_vm0, %v7193_v46  ;;  %v7212_v52 = vcombine.low %v5070_v22, %v5074_v28  ;;  %v2871_v54 = vcombine.high %v2863_v43, %v2863_v43  ;;  %v2879_v30 = vrot.slane %v2863_v43, %v8712_v31 }
 0x1a6   : > { %v7219_v53 = vrot.slane %v7211_v34, %v8714_v32  ;;  %v7195_v38 = vcombine.low %v5054_v21, %v5058_v27  ;;  %v7202_v15 = vrot.slane %v7194_v44, %v8714_v32  ;;  %v2823_v20 = vcombine.high %v2821_v50, %v2821_v50 }
 0x1a7   : > { %v2837_v49 = vrot.slane %v2821_v50, %v8712_v31  ;;  %v7226_v58 = vrot.slane %v7212_v52, %v8714_v32  ;;  %v2893_v23 = vrot.slane %v2871_v54, %v8712_v31  ;;  %v2901_v33 = vcombine.high %v2879_v30, %v2879_v30 }
 0x1a8   : > { %v5094_v59 = vrot.slane %v2879_v30, %v8689_v24  ;;  %v7209_v55 = vrot.slane %v7195_v38, %v8714_v32  ;;  %v2851_v60 = vrot.slane %v2823_v20, %v8712_v31  ;;  %v2870_v29 = vrot.slane %v2856_v51, %v8712_v31 }
 0x1a9   : > { %v2853_v57 = vcombine.high %v2837_v49, %v2837_v49  ;;  %v5078_v14 = vrot.slane %v2837_v49, %v8689_v24  ;;  %v7227_v61 = vcombine.low %v7219_v53, %v7226_v58  ;;  %v2903_v62 = vcombine.high %v2893_v23, %v2893_v23 }
 0x1aa   : > { %v5098_v63 = vrot.slane %v2893_v23, %v8689_v24  ;;  %v5102_v47 = vrot.slane %v2901_v33, %v8689_v24  ;;  %v7210_v1 = vcombine.low %v7202_v15, %v7209_v55  ;;  %v2855_v2 = vcombine.high %v2851_v60, %v2851_v60 }
 0x1ab   : > { %v5082_v3 = vrot.slane %v2851_v60, %v8689_v24  ;;  %v5086_v4 = vrot.slane %v2853_v57, %v8689_v24  ;;  %7852 = vst.msk [vmem:[%s8791_s27 + $0x340] sm:$0xff] %vm7747_vm0, %v7227_v61  ;;  %v5106_v19 = vrot.slane %v2903_v62, %v8689_v24  ;;  %v2912_v37 = vrot.slane %v185_v0, %v8712_v31 }
 0x1ac   : > { %v7245_v56 = vcombine.low %v5094_v59, %v5098_v63  ;;  %7851 = vst.msk [vmem:[%s8791_s27 + $0x338] sm:$0xff] %vm7747_vm0, %v7210_v1  ;;  %v5090_v7 = vrot.slane %v2855_v2, %v8689_v24  ;;  %v2905_v5 = vcombine.high %v185_v0, %v185_v0  ;;  %v2961_v8 = vrot.slane %v10171_v6, %v8712_v31 }
 0x1ad   : > { %v7228_v45 = vcombine.low %v5078_v14, %v5082_v3  ;;  %v7246_v9 = vcombine.low %v5102_v47, %v5106_v19  ;;  %v2872_v39 = vcombine.high %v2870_v29, %v2870_v29  ;;  %v2886_v16 = vrot.slane %v2870_v29, %v8712_v31  ;;  %v187_v19 = vld [vmem:[%s10739_s0 + $0x1c0] sm:$0xff] }
 0x1ae   : > { %v7253_v35 = vrot.slane %v7245_v56, %v8714_v32  ;;  %v7229_v25 = vcombine.low %v5086_v4, %v5090_v7  ;;  %v2920_v11 = vcombine.high %v2912_v37, %v2912_v37  ;;  %v2928_v48 = vrot.slane %v2912_v37, %v8712_v31 }
 0x1af   : > { %v7236_v10 = vrot.slane %v7228_v45, %v8714_v32  ;;  %v7260_v13 = vrot.slane %v7246_v9, %v8714_v32  ;;  %v2900_v17 = vrot.slane %v2872_v39, %v8712_v31  ;;  %v2902_v18 = vcombine.high %v2886_v16, %v2886_v16  ;;  %v10227_v9 = vld [vmem:[%s10739_s0 + $0x1c8] sm:$0xff] }
 0x1b0   : > { %v5110_v41 = vrot.slane %v2886_v16, %v8689_v24  ;;  %v7243_v42 = vrot.slane %v7229_v25, %v8714_v32  ;;  %v2942_v22 = vrot.slane %v2920_v11, %v8712_v31  ;;  %v2950_v36 = vcombine.high %v2928_v48, %v2928_v48 }
 0x1b1   : > { %v5126_v40 = vrot.slane %v2928_v48, %v8689_v24  ;;  %v7261_v12 = vcombine.low %v7253_v35, %v7260_v13  ;;  %v2904_v21 = vcombine.high %v2900_v17, %v2900_v17  ;;  %v5114_v26 = vrot.slane %v2900_v17, %v8689_v24 }
 0x1b2   : > { %v5118_v46 = vrot.slane %v2902_v18, %v8689_v24  ;;  %v7244_v28 = vcombine.low %v7236_v10, %v7243_v42  ;;  %v2952_v34 = vcombine.high %v2942_v22, %v2942_v22  ;;  %v5130_v43 = vrot.slane %v2942_v22, %v8689_v24 }
 0x1b3   : > { %v5134_v27 = vrot.slane %v2950_v36, %v8689_v24  ;;  %7854 = vst.msk [vmem:[%s8791_s27 + $0x350] sm:$0xff] %vm7747_vm0, %v7261_v12  ;;  %v5122_v44 = vrot.slane %v2904_v21, %v8689_v24  ;;  %v7262_v50 = vcombine.low %v5110_v41, %v5114_v26  ;;  %v2919_v51 = vrot.slane %v2905_v5, %v8712_v31 }
 0x1b4   : > { %v2969_v52 = vcombine.high %v2961_v8, %v2961_v8  ;;  %7853 = vst.msk [vmem:[%s8791_s27 + $0x348] sm:$0xff] %vm7747_vm0, %v7244_v28  ;;  %v5138_v53 = vrot.slane %v2952_v34, %v8689_v24  ;;  %v7279_v54 = vcombine.low %v5126_v40, %v5130_v43  ;;  %v2977_v30 = vrot.slane %v2961_v8, %v8712_v31 }
 0x1b5   : > { %v2954_v38 = vcombine.high %v10171_v6, %v10171_v6  ;;  %v7263_v15 = vcombine.low %v5118_v46, %v5122_v44  ;;  %v7270_v20 = vrot.slane %v7262_v50, %v8714_v32  ;;  %v2921_v49 = vcombine.high %v2919_v51, %v2919_v51 }
 0x1b6   : > { %v2935_v58 = vrot.slane %v2919_v51, %v8712_v31  ;;  %v7280_v23 = vcombine.low %v5134_v27, %v5138_v53  ;;  %v7287_v33 = vrot.slane %v7279_v54, %v8714_v32  ;;  %v2991_v59 = vrot.slane %v2969_v52, %v8712_v31 }
 0x1b7   : > { %v2999_v55 = vcombine.high %v2977_v30, %v2977_v30  ;;  %v7277_v60 = vrot.slane %v7263_v15, %v8714_v32  ;;  %v2949_v57 = vrot.slane %v2921_v49, %v8712_v31  ;;  %v5158_v47 = vrot.slane %v2977_v30, %v8689_v24 }
 0x1b8   : > { %v2951_v14 = vcombine.high %v2935_v58, %v2935_v58  ;;  %v5142_v61 = vrot.slane %v2935_v58, %v8689_v24  ;;  %v7294_v62 = vrot.slane %v7280_v23, %v8714_v32  ;;  %v3001_v63 = vcombine.high %v2991_v59, %v2991_v59 }
 0x1b9   : > { %v5162_v0 = vrot.slane %v2991_v59, %v8689_v24  ;;  %v7278_v1 = vcombine.low %v7270_v20, %v7277_v60  ;;  %v2953_v2 = vcombine.high %v2949_v57, %v2949_v57  ;;  %v5146_v3 = vrot.slane %v2949_v57, %v8689_v24 }
 0x1ba   : > { %v5150_v4 = vrot.slane %v2951_v14, %v8689_v24  ;;  %v7295_v56 = vcombine.low %v7287_v33, %v7294_v62  ;;  %v5166_v29 = vrot.slane %v2999_v55, %v8689_v24  ;;  %v5170_v37 = vrot.slane %v3001_v63, %v8689_v24 }
 0x1bb   : > { %v7313_v6 = vcombine.low %v5158_v47, %v5162_v0  ;;  %7855 = vst.msk [vmem:[%s8791_s27 + $0x358] sm:$0xff] %vm7747_vm0, %v7278_v1  ;;  %v5154_v7 = vrot.slane %v2953_v2, %v8689_v24  ;;  %v7296_v45 = vcombine.low %v5142_v61, %v5146_v3  ;;  %v2968_v5 = vrot.slane %v2954_v38, %v8712_v31 }
 0x1bc   : > { %v3010_v8 = vrot.slane %v187_v19, %v8712_v31  ;;  %7856 = vst.msk [vmem:[%s8791_s27 + $0x360] sm:$0xff] %vm7747_vm0, %v7295_v56  ;;  %v7314_v35 = vcombine.low %v5166_v29, %v5170_v37  ;;  %v3003_v16 = vcombine.high %v187_v19, %v187_v19  ;;  %v3059_v25 = vrot.slane %v10227_v9, %v8712_v31  ;;  %v189_v56 = vld [vmem:[%s10739_s0 + $0x1d0] sm:$0xff] }
 0x1bd   : > { %v7321_v39 = vrot.slane %v7313_v6, %v8714_v32  ;;  %v7297_v10 = vcombine.low %v5150_v4, %v5154_v7  ;;  %v7304_v11 = vrot.slane %v7296_v45, %v8714_v32  ;;  %v2970_v48 = vcombine.high %v2968_v5, %v2968_v5  ;;  %v10275_v45 = vld [vmem:[%s10739_s0 + $0x1d8] sm:$0xff] }
 0x1be   : > { %v2984_v13 = vrot.slane %v2968_v5, %v8712_v31  ;;  %v7328_v17 = vrot.slane %v7314_v35, %v8714_v32  ;;  %v3018_v18 = vcombine.high %v3010_v8, %v3010_v8  ;;  %v3026_v41 = vrot.slane %v3010_v8, %v8712_v31 }
 0x1bf   : > { %v3017_v42 = vrot.slane %v3003_v16, %v8712_v31  ;;  %v7311_v22 = vrot.slane %v7297_v10, %v8714_v32  ;;  %v2998_v36 = vrot.slane %v2970_v48, %v8712_v31  ;;  %v3067_v15 = vcombine.high %v3059_v25, %v3059_v25 }
 0x1c0   : > { %v3000_v40 = vcombine.high %v2984_v13, %v2984_v13  ;;  %v5174_v12 = vrot.slane %v2984_v13, %v8689_v24  ;;  %v7329_v21 = vcombine.low %v7321_v39, %v7328_v17  ;;  %v3040_v26 = vrot.slane %v3018_v18, %v8712_v31 }
 0x1c1   : > { %v3048_v46 = vcombine.high %v3026_v41, %v3026_v41  ;;  %v5190_v28 = vrot.slane %v3026_v41, %v8689_v24  ;;  %v7312_v34 = vcombine.low %v7304_v11, %v7311_v22  ;;  %v3002_v43 = vcombine.high %v2998_v36, %v2998_v36 }
 0x1c2   : > { %v5178_v27 = vrot.slane %v2998_v36, %v8689_v24  ;;  %v5182_v44 = vrot.slane %v3000_v40, %v8689_v24  ;;  %7858 = vst.msk [vmem:[%s8791_s27 + $0x370] sm:$0xff] %vm7747_vm0, %v7329_v21  ;;  %v3050_v50 = vcombine.high %v3040_v26, %v3040_v26  ;;  %v5194_v51 = vrot.slane %v3040_v26, %v8689_v24 }
 0x1c3   : > { %v5198_v52 = vrot.slane %v3048_v46, %v8689_v24  ;;  %v3019_v53 = vcombine.high %v3017_v42, %v3017_v42  ;;  %7857 = vst.msk [vmem:[%s8791_s27 + $0x368] sm:$0xff] %vm7747_vm0, %v7312_v34  ;;  %v5186_v54 = vrot.slane %v3002_v43, %v8689_v24  ;;  %v3033_v38 = vrot.slane %v3017_v42, %v8712_v31 }
 0x1c4   : > { %v7330_v30 = vcombine.low %v5174_v12, %v5178_v27  ;;  %v5202_v20 = vrot.slane %v3050_v50, %v8689_v24  ;;  %v7347_v49 = vcombine.low %v5190_v28, %v5194_v51  ;;  %v3075_v23 = vrot.slane %v3059_v25, %v8712_v31 }
 0x1c5   : > { %v3047_v58 = vrot.slane %v3019_v53, %v8712_v31  ;;  %v7331_v33 = vcombine.low %v5182_v44, %v5186_v54  ;;  %v3049_v55 = vcombine.high %v3033_v38, %v3033_v38  ;;  %v5206_v60 = vrot.slane %v3033_v38, %v8689_v24 }
 0x1c6   : > { %v7338_v59 = vrot.slane %v7330_v30, %v8714_v32  ;;  %v7348_v57 = vcombine.low %v5198_v52, %v5202_v20  ;;  %v7355_v14 = vrot.slane %v7347_v49, %v8714_v32  ;;  %v3089_v0 = vrot.slane %v3067_v15, %v8712_v31 }
 0x1c7   : > { %v3051_v61 = vcombine.high %v3047_v58, %v3047_v58  ;;  %v5210_v62 = vrot.slane %v3047_v58, %v8689_v24  ;;  %v7345_v63 = vrot.slane %v7331_v33, %v8714_v32  ;;  %v5214_v47 = vrot.slane %v3049_v55, %v8689_v24 }
 0x1c8   : > { %v3097_v1 = vcombine.high %v3075_v23, %v3075_v23  ;;  %v7362_v2 = vrot.slane %v7348_v57, %v8714_v32  ;;  %v5222_v19 = vrot.slane %v3075_v23, %v8689_v24  ;;  %v3099_v37 = vcombine.high %v3089_v0, %v3089_v0 }
 0x1c9   : > { %v5218_v3 = vrot.slane %v3051_v61, %v8689_v24  ;;  %v7364_v4 = vcombine.low %v5206_v60, %v5210_v62  ;;  %v7346_v29 = vcombine.low %v7338_v59, %v7345_v63  ;;  %v5226_v6 = vrot.slane %v3089_v0, %v8689_v24 }
 0x1ca   : > { %v5230_v7 = vrot.slane %v3097_v1, %v8689_v24  ;;  %v7363_v5 = vcombine.low %v7355_v14, %v7362_v2  ;;  %v3052_v39 = vcombine.high %v10227_v9, %v10227_v9  ;;  %v5234_v16 = vrot.slane %v3099_v37, %v8689_v24 }
 0x1cb   : > { %v7365_v8 = vcombine.low %v5214_v47, %v5218_v3  ;;  %v7372_v35 = vrot.slane %v7364_v4, %v8714_v32  ;;  %7859 = vst.msk [vmem:[%s8791_s27 + $0x378] sm:$0xff] %vm7747_vm0, %v7346_v29  ;;  %v7381_v25 = vcombine.low %v5222_v19, %v5226_v6  ;;  %v3108_v10 = vrot.slane %v189_v56, %v8712_v31 }
 0x1cc   : > { %v3101_v11 = vcombine.high %v189_v56, %v189_v56  ;;  %7860 = vst.msk [vmem:[%s8791_s27 + $0x380] sm:$0xff] %vm7747_vm0, %v7363_v5  ;;  %v3066_v13 = vrot.slane %v3052_v39, %v8712_v31  ;;  %v3157_v17 = vrot.slane %v10275_v45, %v8712_v31  ;;  %v3150_v9 = vcombine.high %v10275_v45, %v10275_v45  ;;  %v191_v39 = vld [vmem:[%s10739_s0 + $0x1e0] sm:$0xff] }
 0x1cd   : > { %v7379_v48 = vrot.slane %v7365_v8, %v8714_v32  ;;  %v7382_v18 = vcombine.low %v5230_v7, %v5234_v16  ;;  %v7389_v41 = vrot.slane %v7381_v25, %v8714_v32  ;;  %v3116_v42 = vcombine.high %v3108_v10, %v3108_v10 }
 0x1ce   : > { %v3124_v22 = vrot.slane %v3108_v10, %v8712_v31  ;;  %v3068_v40 = vcombine.high %v3066_v13, %v3066_v13  ;;  %v3082_v12 = vrot.slane %v3066_v13, %v8712_v31  ;;  %v3115_v21 = vrot.slane %v3101_v11, %v8712_v31 }
 0x1cf   : > { %v7380_v36 = vcombine.low %v7372_v35, %v7379_v48  ;;  %v7396_v26 = vrot.slane %v7382_v18, %v8714_v32  ;;  %v3138_v46 = vrot.slane %v3116_v42, %v8712_v31  ;;  %v3165_v33 = vcombine.high %v3157_v17, %v3157_v17  ;;  %v10340_v18 = vld [vmem:[%s10739_s0 + $0x1e8] sm:$0xff] }
 0x1d0   : > { %v3146_v28 = vcombine.high %v3124_v22, %v3124_v22  ;;  %v5254_v34 = vrot.slane %v3124_v22, %v8689_v24  ;;  %v3096_v43 = vrot.slane %v3068_v40, %v8712_v31  ;;  %v3098_v27 = vcombine.high %v3082_v12, %v3082_v12 }
 0x1d1   : > { %7861 = vst.msk [vmem:[%s8791_s27 + $0x388] sm:$0xff] %vm7747_vm0, %v7380_v36  ;;  %v5238_v44 = vrot.slane %v3082_v12, %v8689_v24  ;;  %v3117_v50 = vcombine.high %v3115_v21, %v3115_v21  ;;  %v7397_v51 = vcombine.low %v7389_v41, %v7396_v26  ;;  %v3148_v52 = vcombine.high %v3138_v46, %v3138_v46 }
 0x1d2   : > { %v5258_v53 = vrot.slane %v3138_v46, %v8689_v24  ;;  %v5262_v54 = vrot.slane %v3146_v28, %v8689_v24  ;;  %v3100_v30 = vcombine.high %v3096_v43, %v3096_v43  ;;  %v5242_v38 = vrot.slane %v3096_v43, %v8689_v24 }
 0x1d3   : > { %v5246_v15 = vrot.slane %v3098_v27, %v8689_v24  ;;  %v3131_v20 = vrot.slane %v3115_v21, %v8712_v31  ;;  %7862 = vst.msk [vmem:[%s8791_s27 + $0x390] sm:$0xff] %vm7747_vm0, %v7397_v51  ;;  %v5266_v49 = vrot.slane %v3148_v52, %v8689_v24  ;;  %v3145_v23 = vrot.slane %v3117_v50, %v8712_v31 }
 0x1d4   : > { %v7415_v58 = vcombine.low %v5254_v34, %v5258_v53  ;;  %v5250_v59 = vrot.slane %v3100_v30, %v8689_v24  ;;  %v7398_v55 = vcombine.low %v5238_v44, %v5242_v38  ;;  %v3173_v2 = vrot.slane %v3157_v17, %v8712_v31 }
 0x1d5   : > { %v3147_v60 = vcombine.high %v3131_v20, %v3131_v20  ;;  %v5270_v57 = vrot.slane %v3131_v20, %v8689_v24  ;;  %v7416_v14 = vcombine.low %v5262_v54, %v5266_v49  ;;  %v3149_v62 = vcombine.high %v3145_v23, %v3145_v23 }
 0x1d6   : > { %v7423_v61 = vrot.slane %v7415_v58, %v8714_v32  ;;  %v5274_v63 = vrot.slane %v3145_v23, %v8689_v24  ;;  %v7399_v47 = vcombine.low %v5246_v15, %v5250_v59  ;;  %v7406_v0 = vrot.slane %v7398_v55, %v8714_v32 }
 0x1d7   : > { %v5278_v1 = vrot.slane %v3147_v60, %v8689_v24  ;;  %v7430_v3 = vrot.slane %v7416_v14, %v8714_v32  ;;  %v5282_v4 = vrot.slane %v3149_v62, %v8689_v24  ;;  %v3187_v56 = vrot.slane %v3165_v33, %v8712_v31 }
 0x1d8   : > { %v7432_v19 = vcombine.low %v5270_v57, %v5274_v63  ;;  %v7413_v29 = vrot.slane %v7399_v47, %v8714_v32  ;;  %v3195_v37 = vcombine.high %v3173_v2, %v3173_v2  ;;  %v5286_v6 = vrot.slane %v3173_v2, %v8689_v24 }
 0x1d9   : > { %v3164_v7 = vrot.slane %v3150_v9, %v8712_v31  ;;  %v7431_v45 = vcombine.low %v7423_v61, %v7430_v3  ;;  %v7433_v5 = vcombine.low %v5278_v1, %v5282_v4  ;;  %v3197_v35 = vcombine.high %v3187_v56, %v3187_v56 }
 0x1da   : > { %v7440_v8 = vrot.slane %v7432_v19, %v8714_v32  ;;  %v7414_v16 = vcombine.low %v7406_v0, %v7413_v29  ;;  %v5290_v25 = vrot.slane %v3187_v56, %v8689_v24  ;;  %v5294_v10 = vrot.slane %v3195_v37, %v8689_v24 }
 0x1db   : > { %v3166_v11 = vcombine.high %v3164_v7, %v3164_v7  ;;  %7864 = vst.msk [vmem:[%s8791_s27 + $0x3a0] sm:$0xff] %vm7747_vm0, %v7431_v45  ;;  %v7447_v48 = vrot.slane %v7433_v5, %v8714_v32  ;;  %v5298_v13 = vrot.slane %v3197_v35, %v8689_v24  ;;  %v3180_v17 = vrot.slane %v3164_v7, %v8712_v31  ;;  %v193_v5 = vld [vmem:[%s10739_s0 + $0x1f0] sm:$0xff] }
 0x1dc   : > { %v3206_v9 = vrot.slane %v191_v39, %v8712_v31  ;;  %7863 = vst.msk [vmem:[%s8791_s27 + $0x398] sm:$0xff] %vm7747_vm0, %v7414_v16  ;;  %v7449_v41 = vcombine.low %v5286_v6, %v5290_v25  ;;  %v3199_v22 = vcombine.high %v191_v39, %v191_v39  ;;  %v3255_v36 = vrot.slane %v10340_v18, %v8712_v31 }
 0x1dd   : > { %v3194_v42 = vrot.slane %v3166_v11, %v8712_v31  ;;  %v7448_v40 = vcombine.low %v7440_v8, %v7447_v48  ;;  %v7450_v12 = vcombine.low %v5294_v10, %v5298_v13  ;;  %v3196_v21 = vcombine.high %v3180_v17, %v3180_v17 }
 0x1de   : > { %v5302_v26 = vrot.slane %v3180_v17, %v8689_v24  ;;  %v7457_v46 = vrot.slane %v7449_v41, %v8714_v32  ;;  %v3214_v43 = vcombine.high %v3206_v9, %v3206_v9  ;;  %v3222_v50 = vrot.slane %v3206_v9, %v8712_v31 }
 0x1df   : > { %v3198_v28 = vcombine.high %v3194_v42, %v3194_v42  ;;  %v5306_v34 = vrot.slane %v3194_v42, %v8689_v24  ;;  %7865 = vst.msk [vmem:[%s8791_s27 + $0x3a8] sm:$0xff] %vm7747_vm0, %v7448_v40  ;;  %v7464_v27 = vrot.slane %v7450_v12, %v8714_v32  ;;  %v5310_v44 = vrot.slane %v3196_v21, %v8689_v24  ;;  %v10392_v42 = vld [vmem:[%s10739_s0 + $0x1f8] sm:$0xff] }
 0x1e0   : > { %v3213_v51 = vrot.slane %v3199_v22, %v8712_v31  ;;  %v3236_v54 = vrot.slane %v3214_v43, %v8712_v31  ;;  %v3263_v30 = vcombine.high %v3255_v36, %v3255_v36  ;;  %v3244_v15 = vcombine.high %v3222_v50, %v3222_v50 }
 0x1e1   : > { %v5314_v52 = vrot.slane %v3198_v28, %v8689_v24  ;;  %v7466_v53 = vcombine.low %v5302_v26, %v5306_v34  ;;  %v7465_v38 = vcombine.low %v7457_v46, %v7464_v27  ;;  %v5318_v20 = vrot.slane %v3222_v50, %v8689_v24 }
 0x1e2   : > { %v3215_v49 = vcombine.high %v3213_v51, %v3213_v51  ;;  %v3246_v33 = vcombine.high %v3236_v54, %v3236_v54  ;;  %v5322_v59 = vrot.slane %v3236_v54, %v8689_v24  ;;  %v5326_v55 = vrot.slane %v3244_v15, %v8689_v24 }
 0x1e3   : > { %v7467_v58 = vcombine.low %v5310_v44, %v5314_v52  ;;  %v7474_v23 = vrot.slane %v7466_v53, %v8714_v32  ;;  %7866 = vst.msk [vmem:[%s8791_s27 + $0x3b0] sm:$0xff] %vm7747_vm0, %v7465_v38  ;;  %v3229_v60 = vrot.slane %v3213_v51, %v8712_v31  ;;  %v3271_v14 = vrot.slane %v3255_v36, %v8712_v31 }
 0x1e4   : > { %v3243_v57 = vrot.slane %v3215_v49, %v8712_v31  ;;  %v5330_v62 = vrot.slane %v3246_v33, %v8689_v24  ;;  %v7483_v63 = vcombine.low %v5318_v20, %v5322_v59  ;;  %v3285_v47 = vrot.slane %v3263_v30, %v8712_v31 }
 0x1e5   : > { %v7481_v61 = vrot.slane %v7467_v58, %v8714_v32  ;;  %v3245_v0 = vcombine.high %v3229_v60, %v3229_v60  ;;  %v5334_v2 = vrot.slane %v3229_v60, %v8689_v24  ;;  %v3293_v29 = vcombine.high %v3271_v14, %v3271_v14 }
 0x1e6   : > { %v3247_v1 = vcombine.high %v3243_v57, %v3243_v57  ;;  %v5338_v3 = vrot.slane %v3243_v57, %v8689_v24  ;;  %v7484_v19 = vcombine.low %v5326_v55, %v5330_v62  ;;  %v7491_v56 = vrot.slane %v7483_v63, %v8714_v32 }
 0x1e7   : > { %v7482_v4 = vcombine.low %v7474_v23, %v7481_v61  ;;  %v5342_v37 = vrot.slane %v3245_v0, %v8689_v24  ;;  %v3295_v45 = vcombine.high %v3285_v47, %v3285_v47  ;;  %v5350_v35 = vrot.slane %v3271_v14, %v8689_v24 }
 0x1e8   : > { %v5346_v6 = vrot.slane %v3247_v1, %v8689_v24  ;;  %v7500_v7 = vcombine.low %v5334_v2, %v5338_v3  ;;  %v7498_v8 = vrot.slane %v7484_v19, %v8714_v32  ;;  %v5354_v39 = vrot.slane %v3285_v47, %v8689_v24 }
 0x1e9   : > { %7867 = vst.msk [vmem:[%s8791_s27 + $0x3b8] sm:$0xff] %vm7747_vm0, %v7482_v4  ;;  %v5358_v16 = vrot.slane %v3293_v29, %v8689_v24  ;;  %v5362_v11 = vrot.slane %v3295_v45, %v8689_v24  ;;  %v3248_v48 = vcombine.high %v10340_v18, %v10340_v18  ;;  %v3304_v9 = vrot.slane %v193_v5, %v8712_v31 }
 0x1ea   : > { %v7501_v25 = vcombine.low %v5342_v37, %v5346_v6  ;;  %v7508_v10 = vrot.slane %v7500_v7, %v8714_v32  ;;  %v7499_v13 = vcombine.low %v7491_v56, %v7498_v8  ;;  %v7517_v17 = vcombine.low %v5350_v35, %v5354_v39 }
 0x1eb   : > { %v3297_v41 = vcombine.high %v193_v5, %v193_v5  ;;  %v7518_v36 = vcombine.low %v5358_v16, %v5362_v11  ;;  %v3262_v40 = vrot.slane %v3248_v48, %v8712_v31  ;;  %v3353_v12 = vrot.slane %v10392_v42, %v8712_v31 }
 0x1ec   : > { %v7515_v22 = vrot.slane %v7501_v25, %v8714_v32  ;;  %7868 = vst.msk [vmem:[%s8791_s27 + $0x3c0] sm:$0xff] %vm7747_vm0, %v7499_v13  ;;  %v7525_v18 = vrot.slane %v7517_v17, %v8714_v32  ;;  %v3312_v21 = vcombine.high %v3304_v9, %v3304_v9  ;;  %v3320_v26 = vrot.slane %v3304_v9, %v8712_v31 }
 0x1ed   : > { %v3311_v46 = vrot.slane %v3297_v41, %v8712_v31  ;;  %v7532_v34 = vrot.slane %v7518_v36, %v8714_v32  ;;  %v3264_v43 = vcombine.high %v3262_v40, %v3262_v40  ;;  %v3278_v27 = vrot.slane %v3262_v40, %v8712_v31 }
 0x1ee   : > { %v7516_v28 = vcombine.low %v7508_v10, %v7515_v22  ;;  %v3334_v44 = vrot.slane %v3312_v21, %v8712_v31  ;;  %v3342_v50 = vcombine.high %v3320_v26, %v3320_v26  ;;  %v5382_v51 = vrot.slane %v3320_v26, %v8689_v24 }
 0x1ef   : > { %v3313_v52 = vcombine.high %v3311_v46, %v3311_v46  ;;  %v7533_v53 = vcombine.low %v7525_v18, %v7532_v34  ;;  %v3292_v54 = vrot.slane %v3264_v43, %v8712_v31  ;;  %v3294_v30 = vcombine.high %v3278_v27, %v3278_v27 }
 0x1f0   : > { %7869 = vst.msk [vmem:[%s8791_s27 + $0x3c8] sm:$0xff] %vm7747_vm0, %v7516_v28  ;;  %v5366_v38 = vrot.slane %v3278_v27, %v8689_v24  ;;  %v3344_v15 = vcombine.high %v3334_v44, %v3334_v44  ;;  %v5386_v20 = vrot.slane %v3334_v44, %v8689_v24  ;;  %v5390_v49 = vrot.slane %v3342_v50, %v8689_v24 }
 0x1f1   : > { %v3327_v58 = vrot.slane %v3311_v46, %v8712_v31  ;;  %7870 = vst.msk [vmem:[%s8791_s27 + $0x3d0] sm:$0xff] %vm7747_vm0, %v7533_v53  ;;  %v3296_v23 = vcombine.high %v3292_v54, %v3292_v54  ;;  %v5370_v33 = vrot.slane %v3292_v54, %v8689_v24  ;;  %v5374_v59 = vrot.slane %v3294_v30, %v8689_v24 }
 0x1f2   : > { %v3341_v55 = vrot.slane %v3313_v52, %v8712_v31  ;;  %v5394_v60 = vrot.slane %v3344_v15, %v8689_v24  ;;  %v7551_v57 = vcombine.low %v5382_v51, %v5386_v20  ;;  %v3361_v4 = vcombine.high %v3353_v12, %v3353_v12  ;;  %v8176_v15 = vld [vmem:[%s8791_s27 + $0x18] sm:$0xff] (%p8632_p3)  ;;  %v8178_v20 = vld [vmem:[%s8791_s27 + $0x20] sm:$0xff] (%p8632_p3) }
 0x1f3   : > { %v3343_v14 = vcombine.high %v3327_v58, %v3327_v58  ;;  %v5398_v61 = vrot.slane %v3327_v58, %v8689_v24  ;;  %v5378_v62 = vrot.slane %v3296_v23, %v8689_v24  ;;  %v7534_v63 = vcombine.low %v5366_v38, %v5370_v33  ;;  %v8172_v38 = vld [vmem:[%s8791_s27 + $0x8] sm:$0xff] (%p8632_p3)  ;;  %8177 = vst [vmem:[%s10469_s24 + $0x18] sm:$0xff] (%p8632_p3), %v8176_v15  ;;  %v8182_v58 = vld [vmem:[%s8791_s27 + $0x30] sm:$0xff] (%p8632_p3)  ;;  %v8184_v23 = vld [vmem:[%s8791_s27 + $0x38] sm:$0xff] (%p8632_p3) }
 0x1f4   : > { %v3345_v47 = vcombine.high %v3341_v55, %v3341_v55  ;;  %v5402_v0 = vrot.slane %v3341_v55, %v8689_v24  ;;  %v7552_v1 = vcombine.low %v5390_v49, %v5394_v60  ;;  %v7559_v2 = vrot.slane %v7551_v57, %v8714_v32  ;;  %v8180_v49 = vld [vmem:[%s8791_s27 + $0x28] sm:$0xff] (%p8632_p3)  ;;  %8173 = vst [vmem:[%s10469_s24 + $0x8] sm:$0xff] (%p8632_p3), %v8172_v38  ;;  %v8186_v33 = vld [vmem:[%s8791_s27 + $0x40] sm:$0xff] (%p8632_p3)  ;;  %v8190_v55 = vld [vmem:[%s8791_s27 + $0x50] sm:$0xff] (%p8632_p3) }
 0x1f5   : > { %v5406_v3 = vrot.slane %v3343_v14, %v8689_v24  ;;  %v7535_v19 = vcombine.low %v5374_v59, %v5378_v62  ;;  %v7542_v56 = vrot.slane %v7534_v63, %v8714_v32  ;;  %v3369_v7 = vrot.slane %v3353_v12, %v8712_v31  ;;  %8179 = vst [vmem:[%s10469_s24 + $0x40] sm:$0xff] (%p8632_p3), %v8178_v20  ;;  %v8188_v59 = vld [vmem:[%s8791_s27 + $0x48] sm:$0xff] (%p8632_p3)  ;;  %v8192_v60 = vld [vmem:[%s8791_s27 + $0x58] sm:$0xff] (%p8632_p3)  ;;  %v8194_v57 = vld [vmem:[%s8791_s27 + $0x60] sm:$0xff] (%p8632_p3) }
 0x1f6   : > { %v5410_v29 = vrot.slane %v3345_v47, %v8689_v24  ;;  %v7568_v37 = vcombine.low %v5398_v61, %v5402_v0  ;;  %v7566_v6 = vrot.slane %v7552_v1, %v8714_v32  ;;  %v3383_v45 = vrot.slane %v3361_v4, %v8712_v31  ;;  %8181 = vst [vmem:[%s10469_s24 + $0x48] sm:$0xff] (%p8632_p3), %v8180_v49  ;;  %v8196_v14 = vld [vmem:[%s8791_s27 + $0x68] sm:$0xff] (%p8632_p3)  ;;  %v8198_v61 = vld [vmem:[%s8791_s27 + $0x70] sm:$0xff] (%p8632_p3)  ;;  %v8200_v62 = vld [vmem:[%s8791_s27 + $0x78] sm:$0xff] (%p8632_p3) }
 0x1f7   : > { %v3346_v5 = vcombine.high %v10392_v42, %v10392_v42  ;;  %v7549_v8 = vrot.slane %v7535_v19, %v8714_v32  ;;  %v3391_v25 = vcombine.high %v3369_v7, %v3369_v7  ;;  %v5414_v11 = vrot.slane %v3369_v7, %v8689_v24  ;;  %8183 = vst [vmem:[%s10469_s24 + $0x50] sm:$0xff] (%p8632_p3), %v8182_v58  ;;  %v8202_v63 = vld [vmem:[%s8791_s27 + $0x80] sm:$0xff] (%p8632_p3)  ;;  %v8204_v47 = vld [vmem:[%s8791_s27 + $0x88] sm:$0xff] (%p8632_p3)  ;;  %v8206_v0 = vld [vmem:[%s8791_s27 + $0x90] sm:$0xff] (%p8632_p3) }
 0x1f8   : > { %v7569_v35 = vcombine.low %v5406_v3, %v5410_v29  ;;  %v7576_v39 = vrot.slane %v7568_v37, %v8714_v32  ;;  %v7567_v16 = vcombine.low %v7559_v2, %v7566_v6  ;;  %v3393_v10 = vcombine.high %v3383_v45, %v3383_v45  ;;  %8185 = vst [vmem:[%s10469_s24 + $0x58] sm:$0xff] (%p8632_p3), %v8184_v23  ;;  %v8208_v1 = vld [vmem:[%s8791_s27 + $0x98] sm:$0xff] (%p8632_p3)  ;;  %v8210_v2 = vld [vmem:[%s8791_s27 + $0xa0] sm:$0xff] (%p8632_p3)  ;;  %v8212_v3 = vld [vmem:[%s8791_s27 + $0xa8] sm:$0xff] (%p8632_p3) }
 0x1f9   : > { %v7550_v48 = vcombine.low %v7542_v56, %v7549_v8  ;;  %v5418_v17 = vrot.slane %v3383_v45, %v8689_v24  ;;  %v3360_v9 = vrot.slane %v3346_v5, %v8712_v31  ;;  %v5422_v41 = vrot.slane %v3391_v25, %v8689_v24  ;;  %8187 = vst [vmem:[%s10469_s24 + $0x80] sm:$0xff] (%p8632_p3), %v8186_v33  ;;  %v8214_v4 = vld [vmem:[%s8791_s27 + $0xb0] sm:$0xff] (%p8632_p3)  ;;  %v8216_v19 = vld [vmem:[%s8791_s27 + $0xb8] sm:$0xff] (%p8632_p3)  ;;  %v8218_v56 = vld [vmem:[%s8791_s27 + $0xc0] sm:$0xff] (%p8632_p3) }
 0x1fa   : > { %v7583_v13 = vrot.slane %v7569_v35, %v8714_v32  ;;  %7872 = vst.msk [vmem:[%s8791_s27 + $0x3e0] sm:$0xff] %vm7747_vm0, %v7567_v16  ;;  %v5426_v42 = vrot.slane %v3393_v10, %v8689_v24  ;;  %8189 = vst [vmem:[%s10469_s24 + $0x88] sm:$0xff] (%p8632_p3), %v8188_v59  ;;  %v8220_v29 = vld [vmem:[%s8791_s27 + $0xc8] sm:$0xff] (%p8632_p3)  ;;  %v8222_v37 = vld [vmem:[%s8791_s27 + $0xd0] sm:$0xff] (%p8632_p3) }
 0x1fb   : > { %7871 = vst.msk [vmem:[%s8791_s27 + $0x3d8] sm:$0xff] %vm7747_vm0, %v7550_v48  ;;  %v7585_v36 = vcombine.low %v5414_v11, %v5418_v17  ;;  %v3362_v40 = vcombine.high %v3360_v9, %v3360_v9  ;;  %v3376_v12 = vrot.slane %v3360_v9, %v8712_v31  ;;  %8191 = vst [vmem:[%s10469_s24 + $0x90] sm:$0xff] (%p8632_p3), %v8190_v55  ;;  %v8224_v6 = vld [vmem:[%s8791_s27 + $0xd8] sm:$0xff] (%p8632_p3)  ;;  %v8226_v7 = vld [vmem:[%s8791_s27 + $0xe0] sm:$0xff] (%p8632_p3) }
 0x1fc   : > { %v7584_v22 = vcombine.low %v7576_v39, %v7583_v13  ;;  %v7586_v18 = vcombine.low %v5422_v41, %v5426_v42  ;;  %8193 = vst [vmem:[%s10469_s24 + $0x98] sm:$0xff] (%p8632_p3), %v8192_v60  ;;  %8195 = vst [vmem:[%s10469_s24 + $0xc0] sm:$0xff] (%p8632_p3), %v8194_v57  ;;  %v8228_v45 = vld [vmem:[%s8791_s27 + $0xe8] sm:$0xff] (%p8632_p3)  ;;  %v8230_v5 = vld [vmem:[%s8791_s27 + $0xf0] sm:$0xff] (%p8632_p3) }
 0x1fd   : > { %v7593_v21 = vrot.slane %v7585_v36, %v8714_v32  ;;  %v3390_v26 = vrot.slane %v3362_v40, %v8712_v31  ;;  %v3392_v46 = vcombine.high %v3376_v12, %v3376_v12  ;;  %v5430_v28 = vrot.slane %v3376_v12, %v8689_v24  ;;  %8197 = vst [vmem:[%s10469_s24 + $0xc8] sm:$0xff] (%p8632_p3), %v8196_v14  ;;  %v8232_v8 = vld [vmem:[%s8791_s27 + $0xf8] sm:$0xff] (%p8632_p3)  ;;  %v8234_v35 = vld [vmem:[%s8791_s27 + $0x100] sm:$0xff] (%p8632_p3)  ;;  %v8236_v39 = vld [vmem:[%s8791_s27 + $0x108] sm:$0xff] (%p8632_p3) }
 0x1fe   : > { %7873 = vst.msk [vmem:[%s8791_s27 + $0x3e8] sm:$0xff] %vm7747_vm0, %v7584_v22  ;;  %v7600_v34 = vrot.slane %v7586_v18, %v8714_v32  ;;  %8199 = vst [vmem:[%s10469_s24 + $0xd0] sm:$0xff] (%p8632_p3), %v8198_v61  ;;  %v8238_v16 = vld [vmem:[%s8791_s27 + $0x110] sm:$0xff] (%p8632_p3)  ;;  %v8240_v25 = vld [vmem:[%s8791_s27 + $0x118] sm:$0xff] (%p8632_p3) }
 0x1ff   : > { %v3394_v43 = vcombine.high %v3390_v26, %v3390_v26  ;;  %v5434_v27 = vrot.slane %v3390_v26, %v8689_v24  ;;  %v5438_v44 = vrot.slane %v3392_v46, %v8689_v24  ;;  %8201 = vst [vmem:[%s10469_s24 + $0xd8] sm:$0xff] (%p8632_p3), %v8200_v62  ;;  %8203 = vst [vmem:[%s10469_s24 + $0x100] sm:$0xff] (%p8632_p3), %v8202_v63  ;;  %v8242_v10 = vld [vmem:[%s8791_s27 + $0x120] sm:$0xff] (%p8632_p3)  ;;  %v8244_v11 = vld [vmem:[%s8791_s27 + $0x128] sm:$0xff] (%p8632_p3) }
 0x200   : > { %v7601_v50 = vcombine.low %v7593_v21, %v7600_v34  ;;  %8205 = vst [vmem:[%s10469_s24 + $0x108] sm:$0xff] (%p8632_p3), %v8204_v47  ;;  %8207 = vst [vmem:[%s10469_s24 + $0x110] sm:$0xff] (%p8632_p3), %v8206_v0  ;;  %v8246_v48 = vld [vmem:[%s8791_s27 + $0x130] sm:$0xff] (%p8632_p3)  ;;  %v8248_v13 = vld [vmem:[%s8791_s27 + $0x138] sm:$0xff] (%p8632_p3) }
 0x201   : > { %v5442_v51 = vrot.slane %v3394_v43, %v8689_v24  ;;  %v7602_v52 = vcombine.low %v5430_v28, %v5434_v27  ;;  %v8170_v24 = vld [vmem:[%s8791_s27] sm:$0xff] (%p8632_p3)  ;;  %8209 = vst [vmem:[%s10469_s24 + $0x118] sm:$0xff] (%p8632_p3), %v8208_v1  ;;  %8211 = vst [vmem:[%s10469_s24 + $0x140] sm:$0xff] (%p8632_p3), %v8210_v2  ;;  %v8252_v9 = vld [vmem:[%s8791_s27 + $0x148] sm:$0xff] (%p8632_p3) }
 0x202   : > { %7874 = vst.msk [vmem:[%s8791_s27 + $0x3f0] sm:$0xff] %vm7747_vm0, %v7601_v50  ;;  %8171 = vst [vmem:[%s10469_s24] sm:$0xff] (%p8632_p3), %v8170_v24  ;;  %v8250_v17 = vld [vmem:[%s8791_s27 + $0x140] sm:$0xff] (%p8632_p3)  ;;  %v8254_v41 = vld [vmem:[%s8791_s27 + $0x150] sm:$0xff] (%p8632_p3) }
 0x203   : > { %v7603_v53 = vcombine.low %v5438_v44, %v5442_v51  ;;  %v7610_v54 = vrot.slane %v7602_v52, %v8714_v32  ;;  %7882 = sbr.rel (!%p8632_p3) target bundleno = 570 (0x23a), region = 28  ;;  %8213 = vst [vmem:[%s10469_s24 + $0x148] sm:$0xff] (%p8632_p3), %v8212_v3  ;;  %8215 = vst [vmem:[%s10469_s24 + $0x150] sm:$0xff] (%p8632_p3), %v8214_v4  ;;  %v8256_v42 = vld [vmem:[%s8791_s27 + $0x158] sm:$0xff] (%p8632_p3)  ;;  %v8258_v22 = vld [vmem:[%s8791_s27 + $0x160] sm:$0xff] (%p8632_p3) }
 0x204   : > { %8217 = vst [vmem:[%s10469_s24 + $0x158] sm:$0xff] (%p8632_p3), %v8216_v19  ;;  %8219 = vst [vmem:[%s10469_s24 + $0x180] sm:$0xff] (%p8632_p3), %v8218_v56  ;;  %v8260_v36 = vld [vmem:[%s8791_s27 + $0x168] sm:$0xff] (%p8632_p3)  ;;  %v8262_v40 = vld [vmem:[%s8791_s27 + $0x170] sm:$0xff] (%p8632_p3) }
 0x205   : > { %v7617_v31 = vrot.slane %v7603_v53, %v8714_v32  ;;  %v8174_v32 = vld [vmem:[%s8791_s27 + $0x10] sm:$0xff] (%p8632_p3)  ;;  %8221 = vst [vmem:[%s10469_s24 + $0x188] sm:$0xff] (%p8632_p3), %v8220_v29  ;;  %8223 = vst [vmem:[%s10469_s24 + $0x190] sm:$0xff] (%p8632_p3), %v8222_v37  ;;  %v8264_v12 = vld [vmem:[%s8791_s27 + $0x178] sm:$0xff] (%p8632_p3) }
 0x206   : > { %8175 = vst [vmem:[%s10469_s24 + $0x10] sm:$0xff] (%p8632_p3), %v8174_v32  ;;  %8225 = vst [vmem:[%s10469_s24 + $0x198] sm:$0xff] (%p8632_p3), %v8224_v6  ;;  %v8266_v18 = vld [vmem:[%s8791_s27 + $0x180] sm:$0xff] (%p8632_p3)  ;;  %v8268_v21 = vld [vmem:[%s8791_s27 + $0x188] sm:$0xff] (%p8632_p3) }
 0x207   : > { %v7618_v30 = vcombine.low %v7610_v54, %v7617_v31  ;;  %8227 = vst [vmem:[%s10469_s24 + $0x1c0] sm:$0xff] (%p8632_p3), %v8226_v7  ;;  %8229 = vst [vmem:[%s10469_s24 + $0x1c8] sm:$0xff] (%p8632_p3), %v8228_v45  ;;  %v8270_v26 = vld [vmem:[%s8791_s27 + $0x190] sm:$0xff] (%p8632_p3)  ;;  %v8272_v46 = vld [vmem:[%s8791_s27 + $0x198] sm:$0xff] (%p8632_p3) }
 0x208   : > { %8231 = vst [vmem:[%s10469_s24 + $0x1d0] sm:$0xff] (%p8632_p3), %v8230_v5  ;;  %8233 = vst [vmem:[%s10469_s24 + $0x1d8] sm:$0xff] (%p8632_p3), %v8232_v8  ;;  %v8274_v28 = vld [vmem:[%s8791_s27 + $0x1a0] sm:$0xff] (%p8632_p3)  ;;  %v8276_v34 = vld [vmem:[%s8791_s27 + $0x1a8] sm:$0xff] (%p8632_p3) }
 0x209   : > { %7875 = vst.msk [vmem:[%s8791_s27 + $0x3f8] sm:$0xff] %vm7747_vm0, %v7618_v30  ;;  %8235 = vst [vmem:[%s10469_s24 + $0x200] sm:$0xff] (%p8632_p3), %v8234_v35  ;;  %v8278_v43 = vld [vmem:[%s8791_s27 + $0x1b0] sm:$0xff] (%p8632_p3)  ;;  %v8280_v27 = vld [vmem:[%s8791_s27 + $0x1b8] sm:$0xff] (%p8632_p3) }
 0x20a   : > { %8237 = vst [vmem:[%s10469_s24 + $0x208] sm:$0xff] %v8236_v39  ;;  %8239 = vst [vmem:[%s10469_s24 + $0x210] sm:$0xff] %v8238_v16  ;;  %v8282_v44 = vld [vmem:[%s8791_s27 + $0x1c0] sm:$0xff]  ;;  %v8284_v50 = vld [vmem:[%s8791_s27 + $0x1c8] sm:$0xff] }
 0x20b   : > { %8241 = vst [vmem:[%s10469_s24 + $0x218] sm:$0xff] %v8240_v25  ;;  %8243 = vst [vmem:[%s10469_s24 + $0x240] sm:$0xff] %v8242_v10  ;;  %v8286_v51 = vld [vmem:[%s8791_s27 + $0x1d0] sm:$0xff]  ;;  %v8288_v52 = vld [vmem:[%s8791_s27 + $0x1d8] sm:$0xff] }
 0x20c   : > { %8245 = vst [vmem:[%s10469_s24 + $0x248] sm:$0xff] %v8244_v11  ;;  %8247 = vst [vmem:[%s10469_s24 + $0x250] sm:$0xff] %v8246_v48  ;;  %v8290_v53 = vld [vmem:[%s8791_s27 + $0x1e0] sm:$0xff]  ;;  %v8292_v54 = vld [vmem:[%s8791_s27 + $0x1e8] sm:$0xff] }
 0x20d   : > { %8249 = vst [vmem:[%s10469_s24 + $0x258] sm:$0xff] %v8248_v13  ;;  %8251 = vst [vmem:[%s10469_s24 + $0x280] sm:$0xff] %v8250_v17  ;;  %v8294_v31 = vld [vmem:[%s8791_s27 + $0x1f0] sm:$0xff]  ;;  %v8296_v30 = vld [vmem:[%s8791_s27 + $0x1f8] sm:$0xff] }
 0x20e   : > { %8253 = vst [vmem:[%s10469_s24 + $0x288] sm:$0xff] %v8252_v9  ;;  %8255 = vst [vmem:[%s10469_s24 + $0x290] sm:$0xff] %v8254_v41  ;;  %v8298_v24 = vld [vmem:[%s8791_s27 + $0x200] sm:$0xff]  ;;  %v8300_v38 = vld [vmem:[%s8791_s27 + $0x208] sm:$0xff] }
 0x20f   : > { %8257 = vst [vmem:[%s10469_s24 + $0x298] sm:$0xff] %v8256_v42  ;;  %8259 = vst [vmem:[%s10469_s24 + $0x2c0] sm:$0xff] %v8258_v22  ;;  %v8302_v32 = vld [vmem:[%s8791_s27 + $0x210] sm:$0xff]  ;;  %v8304_v15 = vld [vmem:[%s8791_s27 + $0x218] sm:$0xff] }
 0x210   : > { %8261 = vst [vmem:[%s10469_s24 + $0x2c8] sm:$0xff] %v8260_v36  ;;  %8263 = vst [vmem:[%s10469_s24 + $0x2d0] sm:$0xff] %v8262_v40  ;;  %v8306_v20 = vld [vmem:[%s8791_s27 + $0x220] sm:$0xff]  ;;  %v8308_v49 = vld [vmem:[%s8791_s27 + $0x228] sm:$0xff] }
 0x211   : > { %8265 = vst [vmem:[%s10469_s24 + $0x2d8] sm:$0xff] %v8264_v12  ;;  %8267 = vst [vmem:[%s10469_s24 + $0x300] sm:$0xff] %v8266_v18  ;;  %v8310_v58 = vld [vmem:[%s8791_s27 + $0x230] sm:$0xff]  ;;  %v8312_v23 = vld [vmem:[%s8791_s27 + $0x238] sm:$0xff] }
 0x212   : > { %8269 = vst [vmem:[%s10469_s24 + $0x308] sm:$0xff] %v8268_v21  ;;  %8271 = vst [vmem:[%s10469_s24 + $0x310] sm:$0xff] %v8270_v26  ;;  %v8314_v33 = vld [vmem:[%s8791_s27 + $0x240] sm:$0xff]  ;;  %v8316_v59 = vld [vmem:[%s8791_s27 + $0x248] sm:$0xff] }
 0x213   : > { %8273 = vst [vmem:[%s10469_s24 + $0x318] sm:$0xff] %v8272_v46  ;;  %8275 = vst [vmem:[%s10469_s24 + $0x340] sm:$0xff] %v8274_v28  ;;  %v8318_v55 = vld [vmem:[%s8791_s27 + $0x250] sm:$0xff]  ;;  %v8320_v60 = vld [vmem:[%s8791_s27 + $0x258] sm:$0xff] }
 0x214   : > { %8277 = vst [vmem:[%s10469_s24 + $0x348] sm:$0xff] %v8276_v34  ;;  %8279 = vst [vmem:[%s10469_s24 + $0x350] sm:$0xff] %v8278_v43  ;;  %v8322_v57 = vld [vmem:[%s8791_s27 + $0x260] sm:$0xff]  ;;  %v8324_v14 = vld [vmem:[%s8791_s27 + $0x268] sm:$0xff] }
 0x215   : > { %8281 = vst [vmem:[%s10469_s24 + $0x358] sm:$0xff] %v8280_v27  ;;  %8283 = vst [vmem:[%s10469_s24 + $0x380] sm:$0xff] %v8282_v44  ;;  %v8326_v61 = vld [vmem:[%s8791_s27 + $0x270] sm:$0xff]  ;;  %v8328_v62 = vld [vmem:[%s8791_s27 + $0x278] sm:$0xff] }
 0x216   : > { %8285 = vst [vmem:[%s10469_s24 + $0x388] sm:$0xff] %v8284_v50  ;;  %8287 = vst [vmem:[%s10469_s24 + $0x390] sm:$0xff] %v8286_v51  ;;  %v8330_v63 = vld [vmem:[%s8791_s27 + $0x280] sm:$0xff]  ;;  %v8332_v47 = vld [vmem:[%s8791_s27 + $0x288] sm:$0xff] }
 0x217   : > { %8289 = vst [vmem:[%s10469_s24 + $0x398] sm:$0xff] %v8288_v52  ;;  %8291 = vst [vmem:[%s10469_s24 + $0x3c0] sm:$0xff] %v8290_v53  ;;  %v8334_v0 = vld [vmem:[%s8791_s27 + $0x290] sm:$0xff]  ;;  %v8336_v1 = vld [vmem:[%s8791_s27 + $0x298] sm:$0xff] }
 0x218   : > { %8293 = vst [vmem:[%s10469_s24 + $0x3c8] sm:$0xff] %v8292_v54  ;;  %8295 = vst [vmem:[%s10469_s24 + $0x3d0] sm:$0xff] %v8294_v31  ;;  %v8338_v2 = vld [vmem:[%s8791_s27 + $0x2a0] sm:$0xff]  ;;  %v8340_v3 = vld [vmem:[%s8791_s27 + $0x2a8] sm:$0xff] }
 0x219   : > { %8297 = vst [vmem:[%s10469_s24 + $0x3d8] sm:$0xff] %v8296_v30  ;;  %8299 = vst [vmem:[%s10469_s24 + $0x400] sm:$0xff] %v8298_v24  ;;  %v8342_v4 = vld [vmem:[%s8791_s27 + $0x2b0] sm:$0xff]  ;;  %v8344_v19 = vld [vmem:[%s8791_s27 + $0x2b8] sm:$0xff] }
 0x21a   : > { %8301 = vst [vmem:[%s10469_s24 + $0x408] sm:$0xff] %v8300_v38  ;;  %8303 = vst [vmem:[%s10469_s24 + $0x410] sm:$0xff] %v8302_v32  ;;  %v8346_v56 = vld [vmem:[%s8791_s27 + $0x2c0] sm:$0xff]  ;;  %v8348_v29 = vld [vmem:[%s8791_s27 + $0x2c8] sm:$0xff] }
 0x21b   : > { %8305 = vst [vmem:[%s10469_s24 + $0x418] sm:$0xff] %v8304_v15  ;;  %8307 = vst [vmem:[%s10469_s24 + $0x440] sm:$0xff] %v8306_v20  ;;  %v8350_v37 = vld [vmem:[%s8791_s27 + $0x2d0] sm:$0xff]  ;;  %v8352_v6 = vld [vmem:[%s8791_s27 + $0x2d8] sm:$0xff] }
 0x21c   : > { %8309 = vst [vmem:[%s10469_s24 + $0x448] sm:$0xff] %v8308_v49  ;;  %8311 = vst [vmem:[%s10469_s24 + $0x450] sm:$0xff] %v8310_v58  ;;  %v8354_v7 = vld [vmem:[%s8791_s27 + $0x2e0] sm:$0xff]  ;;  %v8356_v45 = vld [vmem:[%s8791_s27 + $0x2e8] sm:$0xff] }
 0x21d   : > { %8313 = vst [vmem:[%s10469_s24 + $0x458] sm:$0xff] %v8312_v23  ;;  %8315 = vst [vmem:[%s10469_s24 + $0x480] sm:$0xff] %v8314_v33  ;;  %v8358_v5 = vld [vmem:[%s8791_s27 + $0x2f0] sm:$0xff]  ;;  %v8360_v8 = vld [vmem:[%s8791_s27 + $0x2f8] sm:$0xff] }
 0x21e   : > { %8317 = vst [vmem:[%s10469_s24 + $0x488] sm:$0xff] %v8316_v59  ;;  %8319 = vst [vmem:[%s10469_s24 + $0x490] sm:$0xff] %v8318_v55  ;;  %v8362_v35 = vld [vmem:[%s8791_s27 + $0x300] sm:$0xff]  ;;  %v8364_v39 = vld [vmem:[%s8791_s27 + $0x308] sm:$0xff] }
 0x21f   : > { %8321 = vst [vmem:[%s10469_s24 + $0x498] sm:$0xff] %v8320_v60  ;;  %8323 = vst [vmem:[%s10469_s24 + $0x4c0] sm:$0xff] %v8322_v57  ;;  %v8366_v16 = vld [vmem:[%s8791_s27 + $0x310] sm:$0xff]  ;;  %v8368_v25 = vld [vmem:[%s8791_s27 + $0x318] sm:$0xff] }
 0x220   : > { %8325 = vst [vmem:[%s10469_s24 + $0x4c8] sm:$0xff] %v8324_v14  ;;  %8327 = vst [vmem:[%s10469_s24 + $0x4d0] sm:$0xff] %v8326_v61  ;;  %v8370_v10 = vld [vmem:[%s8791_s27 + $0x320] sm:$0xff]  ;;  %v8372_v11 = vld [vmem:[%s8791_s27 + $0x328] sm:$0xff] }
 0x221   : > { %8329 = vst [vmem:[%s10469_s24 + $0x4d8] sm:$0xff] %v8328_v62  ;;  %8331 = vst [vmem:[%s10469_s24 + $0x500] sm:$0xff] %v8330_v63  ;;  %v8374_v48 = vld [vmem:[%s8791_s27 + $0x330] sm:$0xff]  ;;  %v8376_v13 = vld [vmem:[%s8791_s27 + $0x338] sm:$0xff] }
 0x222   : > { %8333 = vst [vmem:[%s10469_s24 + $0x508] sm:$0xff] %v8332_v47  ;;  %8335 = vst [vmem:[%s10469_s24 + $0x510] sm:$0xff] %v8334_v0  ;;  %v8378_v17 = vld [vmem:[%s8791_s27 + $0x340] sm:$0xff]  ;;  %v8380_v9 = vld [vmem:[%s8791_s27 + $0x348] sm:$0xff] }
 0x223   : > { %8337 = vst [vmem:[%s10469_s24 + $0x518] sm:$0xff] %v8336_v1  ;;  %8339 = vst [vmem:[%s10469_s24 + $0x540] sm:$0xff] %v8338_v2  ;;  %v8382_v41 = vld [vmem:[%s8791_s27 + $0x350] sm:$0xff]  ;;  %v8384_v42 = vld [vmem:[%s8791_s27 + $0x358] sm:$0xff] }
 0x224   : > { %8341 = vst [vmem:[%s10469_s24 + $0x548] sm:$0xff] %v8340_v3  ;;  %8343 = vst [vmem:[%s10469_s24 + $0x550] sm:$0xff] %v8342_v4  ;;  %v8386_v22 = vld [vmem:[%s8791_s27 + $0x360] sm:$0xff]  ;;  %v8388_v36 = vld [vmem:[%s8791_s27 + $0x368] sm:$0xff] }
 0x225   : > { %8345 = vst [vmem:[%s10469_s24 + $0x558] sm:$0xff] %v8344_v19  ;;  %8347 = vst [vmem:[%s10469_s24 + $0x580] sm:$0xff] %v8346_v56  ;;  %v8390_v40 = vld [vmem:[%s8791_s27 + $0x370] sm:$0xff]  ;;  %v8392_v12 = vld [vmem:[%s8791_s27 + $0x378] sm:$0xff] }
 0x226   : > { %8349 = vst [vmem:[%s10469_s24 + $0x588] sm:$0xff] %v8348_v29  ;;  %8351 = vst [vmem:[%s10469_s24 + $0x590] sm:$0xff] %v8350_v37  ;;  %v8394_v18 = vld [vmem:[%s8791_s27 + $0x380] sm:$0xff]  ;;  %v8396_v21 = vld [vmem:[%s8791_s27 + $0x388] sm:$0xff] }
 0x227   : > { %8353 = vst [vmem:[%s10469_s24 + $0x598] sm:$0xff] %v8352_v6  ;;  %8355 = vst [vmem:[%s10469_s24 + $0x5c0] sm:$0xff] %v8354_v7  ;;  %v8398_v26 = vld [vmem:[%s8791_s27 + $0x390] sm:$0xff]  ;;  %v8400_v46 = vld [vmem:[%s8791_s27 + $0x398] sm:$0xff] }
 0x228   : > { %8357 = vst [vmem:[%s10469_s24 + $0x5c8] sm:$0xff] %v8356_v45  ;;  %8359 = vst [vmem:[%s10469_s24 + $0x5d0] sm:$0xff] %v8358_v5  ;;  %v8402_v28 = vld [vmem:[%s8791_s27 + $0x3a0] sm:$0xff]  ;;  %v8404_v34 = vld [vmem:[%s8791_s27 + $0x3a8] sm:$0xff] }
 0x229   : > { %8361 = vst [vmem:[%s10469_s24 + $0x5d8] sm:$0xff] %v8360_v8  ;;  %8363 = vst [vmem:[%s10469_s24 + $0x600] sm:$0xff] %v8362_v35  ;;  %v8406_v43 = vld [vmem:[%s8791_s27 + $0x3b0] sm:$0xff]  ;;  %v8408_v27 = vld [vmem:[%s8791_s27 + $0x3b8] sm:$0xff] }
 0x22a   : > { %8365 = vst [vmem:[%s10469_s24 + $0x608] sm:$0xff] %v8364_v39  ;;  %8367 = vst [vmem:[%s10469_s24 + $0x610] sm:$0xff] %v8366_v16  ;;  %v8410_v44 = vld [vmem:[%s8791_s27 + $0x3c0] sm:$0xff]  ;;  %v8412_v50 = vld [vmem:[%s8791_s27 + $0x3c8] sm:$0xff] }
 0x22b   : > { %8369 = vst [vmem:[%s10469_s24 + $0x618] sm:$0xff] %v8368_v25  ;;  %8371 = vst [vmem:[%s10469_s24 + $0x640] sm:$0xff] %v8370_v10  ;;  %v8414_v51 = vld [vmem:[%s8791_s27 + $0x3d0] sm:$0xff]  ;;  %v8416_v52 = vld [vmem:[%s8791_s27 + $0x3d8] sm:$0xff] }
 0x22c   : > { %8373 = vst [vmem:[%s10469_s24 + $0x648] sm:$0xff] %v8372_v11  ;;  %8375 = vst [vmem:[%s10469_s24 + $0x650] sm:$0xff] %v8374_v48  ;;  %v8418_v53 = vld [vmem:[%s8791_s27 + $0x3e0] sm:$0xff]  ;;  %v8420_v54 = vld [vmem:[%s8791_s27 + $0x3e8] sm:$0xff] }
 0x22d   : > { %8377 = vst [vmem:[%s10469_s24 + $0x658] sm:$0xff] %v8376_v13  ;;  %8379 = vst [vmem:[%s10469_s24 + $0x680] sm:$0xff] %v8378_v17  ;;  %v8422_v31 = vld [vmem:[%s8791_s27 + $0x3f0] sm:$0xff]  ;;  %v8424_v30 = vld [vmem:[%s8791_s27 + $0x3f8] sm:$0xff] }
 0x22e   : > { %8381 = vst [vmem:[%s10469_s24 + $0x688] sm:$0xff] %v8380_v9  ;;  %8383 = vst [vmem:[%s10469_s24 + $0x690] sm:$0xff] %v8382_v41 }
 0x22f   : > { %8385 = vst [vmem:[%s10469_s24 + $0x698] sm:$0xff] %v8384_v42  ;;  %8387 = vst [vmem:[%s10469_s24 + $0x6c0] sm:$0xff] %v8386_v22 }
 0x230   : > { %8389 = vst [vmem:[%s10469_s24 + $0x6c8] sm:$0xff] %v8388_v36  ;;  %8391 = vst [vmem:[%s10469_s24 + $0x6d0] sm:$0xff] %v8390_v40 }
 0x231   : > { %8393 = vst [vmem:[%s10469_s24 + $0x6d8] sm:$0xff] %v8392_v12  ;;  %8395 = vst [vmem:[%s10469_s24 + $0x700] sm:$0xff] %v8394_v18 }
 0x232   : > { %8397 = vst [vmem:[%s10469_s24 + $0x708] sm:$0xff] %v8396_v21  ;;  %8399 = vst [vmem:[%s10469_s24 + $0x710] sm:$0xff] %v8398_v26 }
 0x233   : > { %8401 = vst [vmem:[%s10469_s24 + $0x718] sm:$0xff] %v8400_v46  ;;  %8403 = vst [vmem:[%s10469_s24 + $0x740] sm:$0xff] %v8402_v28 }
 0x234   : > { %8405 = vst [vmem:[%s10469_s24 + $0x748] sm:$0xff] %v8404_v34  ;;  %8407 = vst [vmem:[%s10469_s24 + $0x750] sm:$0xff] %v8406_v43 }
 0x235   : > { %8409 = vst [vmem:[%s10469_s24 + $0x758] sm:$0xff] %v8408_v27  ;;  %8411 = vst [vmem:[%s10469_s24 + $0x780] sm:$0xff] %v8410_v44 }
 0x236   : > { %8413 = vst [vmem:[%s10469_s24 + $0x788] sm:$0xff] %v8412_v50  ;;  %8415 = vst [vmem:[%s10469_s24 + $0x790] sm:$0xff] %v8414_v51 }
 0x237   : > { %8417 = vst [vmem:[%s10469_s24 + $0x798] sm:$0xff] %v8416_v52  ;;  %8419 = vst [vmem:[%s10469_s24 + $0x7c0] sm:$0xff] %v8418_v53 }
 0x238   : > { %8421 = vst [vmem:[%s10469_s24 + $0x7c8] sm:$0xff] %v8420_v54  ;;  %8423 = vst [vmem:[%s10469_s24 + $0x7d0] sm:$0xff] %v8422_v31 }
 0x239   : > { %8425 = vst [vmem:[%s10469_s24 + $0x7d8] sm:$0xff] %v8424_v30 }
 0x23a PF: > { %s11_s10 = sadd.s32 1, %s8586_s10   ;;  %s10742_s6 = smov %s8574_s7 }
 0x23b   : > { %p8_p8 = scmp.ge.s32.totalorder %s11_s10, 4   ;;  %s10743_s7 = smov %s8641_s16 }
 0x23c   : > { %s10744_s8 = smov %s8582_s9  ;;  %s10745_s9 = smov %s10747_s12 }
 0x23d   :  { %10 = sbr.rel (!%p8_p8) target bundleno = 3 (0x3), region = 92 }

</bundles_post_ra>
